<compile_context>
chip_gen: v7x
topology: tpu7x:2x2x1
jax: 0.10.0
libtpu: 0.0.40
codegen_flags: <defaults>
</compile_context>

<pallas_src>
import functools

import jax
import jax.numpy as jnp
from jax import lax
from jax.experimental import pallas as pl
from jax.experimental.pallas import tpu as pltpu

WS_EPS = 1e-10          # StdConv2d eps
GN_EPS = 1e-5           # nn.GroupNorm default eps
GROUPS = 32
LANE = 128


def _default_vmem_limit():
    try:
        info = pltpu.get_tpu_info()
        for attr in ("vmem_capacity_bytes", "vmem_size_bytes", "vmem_bytes"):
            cap = getattr(info, attr, None)
            if cap:
                return int(min(int(cap) * 3 // 4, 100 * 1024 * 1024))
    except Exception:
        pass
    return 48 * 1024 * 1024


_VMEM_LIMIT = _default_vmem_limit()


# ----------------------------------------------------------------------------
# tiling helpers
# ----------------------------------------------------------------------------
def _round_up(v, m):
    return -(-v // m) * m


def _choose_tile(dim, preferred, granule):
    """Largest tile <= preferred that is a multiple of `granule` and divides
    `dim`; falls back to the full dim (always legal for BlockSpec)."""
    if dim <= preferred:
        return dim
    if dim % granule != 0:
        return dim
    t = (preferred // granule) * granule
    while t >= granule:
        if dim % t == 0:
            return t
        t -= granule
    return dim


def _choose_divisor(dim, preferred):
    best = 1
    for d in range(1, dim + 1):
        if dim % d == 0 and d <= preferred:
            best = d
    return best


def _pref(itemsize):
    return 512 if itemsize <= 2 else 256


# ----------------------------------------------------------------------------
# weight standardization prepass (runs once per conv weight)
# ----------------------------------------------------------------------------
def _ws_kernel(w_ref, o_ref):
    w = w_ref[...].astype(jnp.float32)                    # (K, tn)
    k = w.shape[0]
    mean = jnp.sum(w, axis=0, keepdims=True) * (1.0 / k)
    cw = w - mean
    var = jnp.sum(cw * cw, axis=0, keepdims=True) * (1.0 / k)
    o_ref[...] = (cw * lax.rsqrt(var + WS_EPS)).astype(o_ref.dtype)


def prep_weight(w_oihw, compute_dtype, pad_in=0, pad_out=0):
    """Standardize a conv weight once (per output channel over (Cin,kh,kw))
    and lay it out as (kh*kw*Cin_padded, Cout_padded) in the compute dtype.
    Output-channel padding is applied before WS (zero columns stay zero);
    input-channel padding is applied after WS (per tap) so stats are exact."""
    O, I, kh, kw = w_oihw.shape
    K = kh * kw * I
    wk = jnp.transpose(w_oihw, (2, 3, 1, 0)).reshape(K, O).astype(jnp.float32)
    Op = O + pad_out
    if pad_out:
        wk = jnp.pad(wk, ((0, 0), (0, pad_out)))
    tn = _choose_tile(Op, 256, 128)
    wstd = pl.pallas_call(
        _ws_kernel,
        out_shape=jax.ShapeDtypeStruct((K, Op), compute_dtype),
        grid=(Op // tn,),
        in_specs=[pl.BlockSpec((K, tn), lambda j: (0, j))],
        out_specs=pl.BlockSpec((K, tn), lambda j: (0, j)),
        compiler_params=pltpu.CompilerParams(
            dimension_semantics=("parallel",),
            vmem_limit_bytes=_VMEM_LIMIT),
    )(wk)
    if pad_in:
        wstd = wstd.reshape(kh * kw, I, Op)
        wstd = jnp.pad(wstd, ((0, 0), (0, pad_in), (0, 0)))
        wstd = wstd.reshape(kh * kw * (I + pad_in), Op)
    return wstd


# ----------------------------------------------------------------------------
# GroupNorm stats (only needed standalone for gn1; gn2/gn3 stats are fused
# into the producing conv kernels' epilogues)
# ----------------------------------------------------------------------------
def _gn_stats_kernel(x_ref, sum_ref, sq_ref):
    t = pl.program_id(1)

    @pl.when(t == 0)
    def _():
        sum_ref[...] = jnp.zeros_like(sum_ref)
        sq_ref[...] = jnp.zeros_like(sq_ref)

    x = x_ref[0].astype(jnp.float32)                       # (tm, C)
    sum_ref[...] += jnp.sum(x, axis=0).reshape(1, 1, -1)
    sq_ref[...] += jnp.sum(x * x, axis=0).reshape(1, 1, -1)


def gn_stats(x_nhwc):
    N, H, W, C = x_nhwc.shape
    HW = H * W
    x3 = x_nhwc.reshape(N, HW, C)
    itemsize = jnp.dtype(x_nhwc.dtype).itemsize
    tm = _choose_tile(HW, 2 * _pref(itemsize), 8)
    grid = (N, HW // tm)
    return pl.pallas_call(
        _gn_stats_kernel,
        out_shape=(jax.ShapeDtypeStruct((N, 1, C), jnp.float32),
                   jax.ShapeDtypeStruct((N, 1, C), jnp.float32)),
        grid=grid,
        in_specs=[pl.BlockSpec((1, tm, C), lambda n, t: (n, t, 0))],
        out_specs=(pl.BlockSpec((1, 1, C), lambda n, t: (n, 0, 0)),
                   pl.BlockSpec((1, 1, C), lambda n, t: (n, 0, 0))),
        compiler_params=pltpu.CompilerParams(
            dimension_semantics=("parallel", "arbitrary"),
            vmem_limit_bytes=_VMEM_LIMIT),
    )(x3)


def _gn_scale_shift(sum_, sq, gamma, beta, count, groups, c_real, c_pad):
    """Tiny (N, C) wrapper math: turn fused sum/sumsq stats into per-(sample,
    channel) scale/shift (f32), zero-padded to the lane-padded channel count."""
    s = sum_[:, 0, :c_real]
    q = sq[:, 0, :c_real]
    cpg = c_real // groups
    cnt = float(count * cpg)
    gs = jnp.sum(s.reshape(-1, groups, cpg), axis=-1)
    gq = jnp.sum(q.reshape(-1, groups, cpg), axis=-1)
    gm = gs / cnt
    gv = jnp.maximum(gq / cnt - gm * gm, 0.0)
    inv = lax.rsqrt(gv + GN_EPS)
    mean_c = jnp.repeat(gm, cpg, axis=-1)
    inv_c = jnp.repeat(inv, cpg, axis=-1)
    g32 = gamma.astype(jnp.float32)[None, :]
    b32 = beta.astype(jnp.float32)[None, :]
    scale = inv_c * g32
    shift = b32 - mean_c * scale
    if c_pad > c_real:
        scale = jnp.pad(scale, ((0, 0), (0, c_pad - c_real)))
        shift = jnp.pad(shift, ((0, 0), (0, c_pad - c_real)))
    n = scale.shape[0]
    return scale.reshape(n, 1, c_pad), shift.reshape(n, 1, c_pad)


# ----------------------------------------------------------------------------
# fused [GN-apply+ReLU] -> 1x1 conv -> [residual add] -> [next-GN stats]
# ----------------------------------------------------------------------------
def _conv1x1_gn_kernel(*refs, with_residual, with_stats):
    scale_ref, shift_ref, x_ref, w_ref = refs[:4]
    pos = 4
    res_ref = None
    if with_residual:
        res_ref = refs[pos]
        pos += 1
    o_ref = refs[pos]
    pos += 1
    sum_ref = sq_ref = None
    if with_stats:
        sum_ref, sq_ref = refs[pos], refs[pos + 1]

    # GN-apply + ReLU prologue (f32 elementwise), then MXU matmul.
    a = x_ref[0].astype(jnp.float32)                       # (tm, K)
    a = jnp.maximum(a * scale_ref[0] + shift_ref[0], 0.0)
    a = a.astype(w_ref.dtype)
    out = jnp.dot(a, w_ref[...], preferred_element_type=jnp.float32)

    if with_stats:
        t = pl.program_id(2)

        @pl.when(t == 0)
        def _():
            sum_ref[...] = jnp.zeros_like(sum_ref)
            sq_ref[...] = jnp.zeros_like(sq_ref)

        sum_ref[...] += jnp.sum(out, axis=0).reshape(1, 1, -1)
        sq_ref[...] += jnp.sum(out * out, axis=0).reshape(1, 1, -1)

    if with_residual:
        out = out + res_ref[0].astype(jnp.float32)
    o_ref[0] = out.astype(o_ref.dtype)


def conv1x1_gn(x_nhwc, scale, shift, w_kn, *, out_dtype, with_stats,
               residual=None):
    N, H, W, K = x_nhwc.shape
    Kw, Cout = w_kn.shape
    assert Kw == K, (Kw, K)
    HW = H * W
    x3 = x_nhwc.reshape(N, HW, K)
    itemsize = jnp.dtype(x_nhwc.dtype).itemsize
    tm = _choose_tile(HW, _pref(itemsize), 8)
    tn = _choose_tile(Cout, _pref(itemsize), 128)
    grid = (N, Cout // tn, HW // tm)

    in_specs = [
        pl.BlockSpec((1, 1, K), lambda n, j, t: (n, 0, 0)),      # scale
        pl.BlockSpec((1, 1, K), lambda n, j, t: (n, 0, 0)),      # shift
        pl.BlockSpec((1, tm, K), lambda n, j, t: (n, t, 0)),     # activation
        pl.BlockSpec((K, tn), lambda n, j, t: (0, j)),           # weight (resident over t)
    ]
    args = [scale, shift, x3, w_kn]
    res_bytes = 0
    if residual is not None:
        r3 = residual.reshape(N, HW, Cout).astype(jnp.float32)
        in_specs.append(pl.BlockSpec((1, tm, tn), lambda n, j, t: (n, t, j)))
        args.append(r3)
        res_bytes = int(r3.size * 4)

    out_shapes = [jax.ShapeDtypeStruct((N, HW, Cout), out_dtype)]
    out_specs = [pl.BlockSpec((1, tm, tn), lambda n, j, t: (n, t, j))]
    if with_stats:
        out_shapes += [jax.ShapeDtypeStruct((N, 1, Cout), jnp.float32)] * 2
        out_specs += [pl.BlockSpec((1, 1, tn), lambda n, j, t: (n, 0, j))] * 2

    kern = functools.partial(_conv1x1_gn_kernel,
                             with_residual=residual is not None,
                             with_stats=with_stats)
    multi = len(out_shapes) > 1
    outs = pl.pallas_call(
        kern,
        out_shape=tuple(out_shapes) if multi else out_shapes[0],
        grid=grid,
        in_specs=in_specs,
        out_specs=tuple(out_specs) if multi else out_specs[0],
        compiler_params=pltpu.CompilerParams(
            dimension_semantics=("parallel", "parallel", "arbitrary"),
            vmem_limit_bytes=_VMEM_LIMIT),
        cost_estimate=pl.CostEstimate(
            flops=int(2 * N * HW * K * Cout),
            transcendentals=0,
            bytes_accessed=int(x3.size * itemsize
                               + w_kn.size * jnp.dtype(w_kn.dtype).itemsize
                               + N * HW * Cout * jnp.dtype(out_dtype).itemsize
                               + res_bytes)),
    )(*args)
    if with_stats:
        o, s, q = outs
        return o.reshape(N, H, W, Cout), s, q
    return outs.reshape(N, H, W, Cout)


# ----------------------------------------------------------------------------
# 3x3 conv (phase-decomposed, spatially row-tiled, fused next-GN stats)
# ----------------------------------------------------------------------------
def _conv3x3_gn_kernel(x_ref, w_ref, o_ref, sum_ref, sq_ref, acc_ref,
                       *, s, cin, th, wo):
    r = pl.program_id(2)
    acc_ref[...] = jnp.zeros_like(acc_ref)
    row_base = pl.multiple_of(r * th, th)
    # 9-tap accumulation straight into the VMEM f32 accumulator; the input was
    # phase-decomposed so every tap is a contiguous (unstrided) window.
    for ki in range(3):
        for kj in range(3):
            p = (ki % s) * s + (kj % s)
            ri = ki // s
            ci = kj // s
            win = x_ref[0, p, pl.ds(row_base + ri, th), ci:ci + wo, :]
            win = win.reshape(th * wo, cin)
            t = ki * 3 + kj
            acc_ref[...] += jnp.dot(win, w_ref[t * cin:(t + 1) * cin, :],
                                    preferred_element_type=jnp.float32)
    out = acc_ref[...]                                     # (th*wo, tn) f32

    @pl.when(r == 0)
    def _():
        sum_ref[...] = jnp.zeros_like(sum_ref)
        sq_ref[...] = jnp.zeros_like(sq_ref)

    sum_ref[...] += jnp.sum(out, axis=0).reshape(1, 1, -1)
    sq_ref[...] += jnp.sum(out * out, axis=0).reshape(1, 1, -1)
    o_ref[0] = out.reshape(th, wo, out.shape[-1]).astype(o_ref.dtype)


def conv3x3_gn(xph, w_kn, dims, *, out_dtype):
    N, PH, Hp2, Wp2, Cin = xph.shape
    s, Ho, Wo = dims
    Cout = w_kn.shape[1]
    itemsize = jnp.dtype(xph.dtype).itemsize
    tn = _choose_tile(Cout, _pref(itemsize), 128)
    th = _choose_divisor(Ho, max(1, 512 // Wo))
    grid = (N, Cout // tn, Ho // th)

    kern = functools.partial(_conv3x3_gn_kernel, s=s, cin=Cin, th=th, wo=Wo)
    return pl.pallas_call(
        kern,
        out_shape=(jax.ShapeDtypeStruct((N, Ho, Wo, Cout), out_dtype),
                   jax.ShapeDtypeStruct((N, 1, Cout), jnp.float32),
                   jax.ShapeDtypeStruct((N, 1, Cout), jnp.float32)),
        grid=grid,
        in_specs=[
            pl.BlockSpec((1, PH, Hp2, Wp2, Cin),
                         lambda n, j, r: (n, 0, 0, 0, 0)),   # resident sample
            pl.BlockSpec((9 * Cin, tn), lambda n, j, r: (0, j)),
        ],
        out_specs=(pl.BlockSpec((1, th, Wo, tn), lambda n, j, r: (n, r, 0, j)),
                   pl.BlockSpec((1, 1, tn), lambda n, j, r: (n, 0, j)),
                   pl.BlockSpec((1, 1, tn), lambda n, j, r: (n, 0, j))),
        scratch_shapes=[pltpu.VMEM((th * Wo, tn), jnp.float32)],
        compiler_params=pltpu.CompilerParams(
            dimension_semantics=("parallel", "parallel", "arbitrary"),
            vmem_limit_bytes=_VMEM_LIMIT),
        cost_estimate=pl.CostEstimate(
            flops=int(2 * N * Ho * Wo * 9 * Cin * Cout),
            transcendentals=0,
            bytes_accessed=int(xph.size * itemsize
                               + w_kn.size * itemsize
                               + N * Ho * Wo * Cout
                               * jnp.dtype(out_dtype).itemsize)),
    )(xph, w_kn)


def _gn_pad_phase(out1, scale, shift, stride, compute_dtype):
    """gn2-apply+ReLU fused into the pad / phase-decompose (single XLA fusion)
    feeding the Pallas 3x3 kernel.  TODO(synk): move in-kernel with masking."""
    N, H, W, C = out1.shape
    s = stride
    Ho = (H + 2 - 3) // s + 1
    Wo = (W + 2 - 3) // s + 1
    xg = jnp.maximum(out1.astype(jnp.float32) * scale.reshape(N, 1, 1, C)
                     + shift.reshape(N, 1, 1, C), 0.0).astype(compute_dtype)
    Hp2 = -(-(H + 2) // s)
    Wp2 = -(-(W + 2) // s)
    xp = jnp.pad(xg, ((0, 0), (1, Hp2 * s - H - 1), (1, Wp2 * s - W - 1), (0, 0)))
    xph = xp.reshape(N, Hp2, s, Wp2, s, C)
    xph = jnp.transpose(xph, (0, 2, 4, 1, 3, 5)).reshape(N, s * s, Hp2, Wp2, C)
    return xph, (s, Ho, Wo)


# ----------------------------------------------------------------------------
# PreActBottleneck forward (NCHW in / NCHW out, like the PyTorch module)
# ----------------------------------------------------------------------------
def preact_bottleneck_forward(x_nchw, params, stride,
                              compute_dtype=jnp.bfloat16, groups=GROUPS):
    x = jnp.transpose(x_nchw, (0, 2, 3, 1)).astype(jnp.float32)   # NCHW -> NHWC
    N, H, W, cin = x.shape
    cout = params["conv3_w"].shape[0]
    cmid = params["conv1_w"].shape[0]
    cmid_p = max(_round_up(cmid, LANE), LANE)
    pad_mid = cmid_p - cmid

    xc = x.astype(compute_dtype)

    # one-off weight standardization (+ lane padding of cmid) in compute dtype
    w1 = prep_weight(params["conv1_w"], compute_dtype, pad_out=pad_mid)
    w2 = prep_weight(params["conv2_w"], compute_dtype,
                     pad_in=pad_mid, pad_out=pad_mid)
    w3 = prep_weight(params["conv3_w"], compute_dtype, pad_in=pad_mid)
    has_ds = (stride != 1) or (cin != cout)
    if has_ds:
        wd = prep_weight(params["ds_w"], compute_dtype)

    # gn1 stats over x (the only GN whose producer lives outside this block)
    s1, q1 = gn_stats(xc)
    scale1, shift1 = _gn_scale_shift(s1, q1, params["gn1_w"], params["gn1_b"],
                                     H * W, groups, cin, cin)

    # conv1: gn1-apply prologue + 1x1 matmul + gn2-stats epilogue
    out1, s2, q2 = conv1x1_gn(xc, scale1, shift1, w1,
                              out_dtype=compute_dtype, with_stats=True)

    # residual branch
    if has_ds:
        xs = xc[:, ::stride, ::stride, :] if stride != 1 else xc
        residual = conv1x1_gn(xs, scale1, shift1, wd,
                              out_dtype=jnp.float32, with_stats=False)
    else:
        residual = x                                             # identity (f32)

    scale2, shift2 = _gn_scale_shift(s2, q2, params["gn2_w"], params["gn2_b"],
                                     H * W, groups, cmid, cmid_p)

    # conv2: gn2-apply fused into pad/phase-decompose, then the 3x3 kernel
    # (row-tiled, VMEM accumulator) with gn3-stats epilogue.
    xph, dims = _gn_pad_phase(out1, scale2, shift2, stride, compute_dtype)
    out2, s3, q3 = conv3x3_gn(xph, w2, dims, out_dtype=compute_dtype)
    Ho, Wo = out2.shape[1], out2.shape[2]

    scale3, shift3 = _gn_scale_shift(s3, q3, params["gn3_w"], params["gn3_b"],
                                     Ho * Wo, groups, cmid, cmid_p)

    # conv3: gn3-apply prologue + 1x1 matmul + fused residual add (f32 out)
    out = conv1x1_gn(out2, scale3, shift3, w3, out_dtype=jnp.float32,
                     with_stats=False, residual=residual)
    return jnp.transpose(out, (0, 3, 1, 2))                      # NHWC -> NCHW


# ----------------------------------------------------------------------------
# Pure-JAX reference (for correctness checks)
# ----------------------------------------------------------------------------
def _ref_std_conv(x_nhwc, w_oihw, stride, padding):
    w = w_oihw.astype(jnp.float32)
    m = jnp.mean(w, axis=(1, 2, 3), keepdims=True)
    v = jnp.mean((w - m) ** 2, axis=(1, 2, 3), keepdims=True)
    w = (w - m) / jnp.sqrt(v + WS_EPS)
    w_hwio = jnp.transpose(w, (2, 3, 1, 0))
    return lax.conv_general_dilated(
        x_nhwc, w_hwio, (stride, stride), [(padding, padding)] * 2,
        dimension_numbers=("NHWC", "HWIO", "NHWC"))


def _ref_gn_relu(x_nhwc, gamma, beta, groups=GROUPS):
    N, H, W, C = x_nhwc.shape
    xg = x_nhwc.reshape(N, H, W, groups, C // groups)
    m = jnp.mean(xg, axis=(1, 2, 4), keepdims=True)
    v = jnp.mean((xg - m) ** 2, axis=(1, 2, 4), keepdims=True)
    y = ((xg - m) / jnp.sqrt(v + GN_EPS)).reshape(N, H, W, C)
    return jnp.maximum(y * gamma + beta, 0.0)


def _ref_forward(x_nchw, params, stride):
    x = jnp.transpose(x_nchw, (0, 2, 3, 1)).astype(jnp.float32)
    cin = x.shape[-1]
    cout = params["conv3_w"].shape[0]
    out = _ref_gn_relu(x, params["gn1_w"], params["gn1_b"])
    if stride != 1 or cin != cout:
        residual = _ref_std_conv(out, params["ds_w"], stride, 0)
    else:
        residual = x
    out = _ref_std_conv(out, params["conv1_w"], 1, 0)
    out = _ref_gn_relu(out, params["gn2_w"], params["gn2_b"])
    out = _ref_std_conv(out, params["conv2_w"], stride, 1)
    out = _ref_gn_relu(out, params["gn3_w"], params["gn3_b"])
    out = _ref_std_conv(out, params["conv3_w"], 1, 0) + residual
    return jnp.transpose(out, (0, 3, 1, 2))


# ----------------------------------------------------------------------------
def _make_params(key, cin, cout, cmid, with_ds):
    ks = jax.random.split(key, 10)
    p = {
        "gn1_w": 1.0 + 0.1 * jax.random.normal(ks[0], (cin,), jnp.float32),
        "gn1_b": 0.1 * jax.random.normal(ks[1], (cin,), jnp.float32),
        "conv1_w": 0.1 * jax.random.normal(ks[2], (cmid, cin, 1, 1), jnp.float32),
        "gn2_w": 1.0 + 0.1 * jax.random.normal(ks[3], (cmid,), jnp.float32),
        "gn2_b": 0.1 * jax.random.normal(ks[4], (cmid,), jnp.float32),
        "conv2_w": 0.1 * jax.random.normal(ks[5], (cmid, cmid, 3, 3), jnp.float32),
        "gn3_w": 1.0 + 0.1 * jax.random.normal(ks[6], (cmid,), jnp.float32),
        "gn3_b": 0.1 * jax.random.normal(ks[7], (cmid,), jnp.float32),
        "conv3_w": 0.1 * jax.random.normal(ks[8], (cout, cmid, 1, 1), jnp.float32),
    }
    if with_ds:
        p["ds_w"] = 0.1 * jax.random.normal(ks[9], (cout, cin, 1, 1), jnp.float32)
    return p


if __name__ == "__main__":
    root = jax.random.PRNGKey(0)
    k_pA, k_xA, k_pB, k_xB = jax.random.split(root, 4)

    # Config A: cin=64 -> cout=128, cmid=32, stride=2 (downsample path).
    pA = _make_params(k_pA, 64, 128, 32, with_ds=True)
    xA = jax.random.normal(k_xA, (2, 64, 8, 8), jnp.float32)      # NCHW
    refA = _ref_forward(xA, pA, 2)

    fwdA32 = jax.jit(functools.partial(preact_bottleneck_forward, stride=2,
                                       compute_dtype=jnp.float32))
    outA32 = jax.block_until_ready(fwdA32(xA, pA))
    assert outA32.shape == (2, 128, 4, 4), outA32.shape
    assert jnp.allclose(outA32, refA, rtol=2e-3, atol=2e-3), \
        float(jnp.max(jnp.abs(outA32 - refA)))

    # bf16-operand default path (v6e/v7x MXU), f32 accumulation & GN stats.
    fwdA16 = jax.jit(functools.partial(preact_bottleneck_forward, stride=2))
    outA16 = jax.block_until_ready(fwdA16(xA, pA))
    relA = float(jnp.max(jnp.abs(outA16 - refA))
                 / (float(jnp.max(jnp.abs(refA))) + 1e-6))
    assert relA < 5e-2, relA

    # Config B: cin=cout=64, cmid=32, stride=1 (identity residual path).
    pB = _make_params(k_pB, 64, 64, 32, with_ds=False)
    xB = jax.random.normal(k_xB, (2, 64, 8, 8), jnp.float32)
    refB = _ref_forward(xB, pB, 1)

    fwdB32 = jax.jit(functools.partial(preact_bottleneck_forward, stride=1,
                                       compute_dtype=jnp.float32))
    outB32 = jax.block_until_ready(fwdB32(xB, pB))
    assert outB32.shape == (2, 64, 8, 8), outB32.shape
    assert jnp.allclose(outB32, refB, rtol=2e-3, atol=2e-3), \
        float(jnp.max(jnp.abs(outB32 - refB)))

    fwdB16 = jax.jit(functools.partial(preact_bottleneck_forward, stride=1))
    outB16 = jax.block_until_ready(fwdB16(xB, pB))
    relB = float(jnp.max(jnp.abs(outB16 - refB))
                 / (float(jnp.max(jnp.abs(refB))) + 1e-6))
    assert relB < 5e-2, relB

    print("KERNEL_OK")
</pallas_src>

<mosaic_0001>
module attributes {stable_mosaic.version = 11 : i64} {
  func.func @_gn_stats_kernel(%arg0: i32, %arg1: i32, %arg2: memref<1x64x64xf32, #tpu.memory_space<vmem>>, %arg3: memref<1x1x64xf32, #tpu.memory_space<vmem>>, %arg4: memref<1x1x64xf32, #tpu.memory_space<vmem>>) attributes {dimension_semantics = [#tpu.dimension_semantics<parallel>, #tpu.dimension_semantics<arbitrary>], iteration_bounds = array<i64: 2, 1>, scalar_prefetch = 0 : i64, scratch_operands = 0 : i64, tpu.core_type = #tpu.core_type<tc>, window_params = [{transform_indices = @transform_0, window_bounds = array<i64: 1, 64, 64>}, {transform_indices = @transform_1, window_bounds = array<i64: 1, 1, 64>}, {transform_indices = @transform_2, window_bounds = array<i64: 1, 1, 64>}]} {
    %c0_i32 = arith.constant 0 : i32
    %0 = arith.cmpi eq, %arg1, %c0_i32 : i32
    %1 = arith.extui %0 : i1 to i32
    %c0_i32_0 = arith.constant 0 : i32
    %2 = arith.cmpi ne, %1, %c0_i32_0 : i32
    scf.if %2 {
      %cst_16 = arith.constant 0.000000e+00 : f32
      %16 = vector.broadcast %cst_16 : f32 to vector<1x1x64xf32>
      %c0_17 = arith.constant 0 : index
      %c0_18 = arith.constant 0 : index
      %c0_19 = arith.constant 0 : index
      %17 = vector.load %arg3[%c0_17, %c0_18, %c0_19] : memref<1x1x64xf32, #tpu.memory_space<vmem>>, vector<1x1x64xf32>
      tpu.vector_store %arg3[%c0_17, %c0_18, %c0_19], %16 {strides = array<i32>} : memref<1x1x64xf32, #tpu.memory_space<vmem>>, vector<1x1x64xf32>,
      %cst_20 = arith.constant 0.000000e+00 : f32
      %18 = vector.broadcast %cst_20 : f32 to vector<1x1x64xf32>
      %c0_21 = arith.constant 0 : index
      %c0_22 = arith.constant 0 : index
      %c0_23 = arith.constant 0 : index
      %19 = vector.load %arg4[%c0_21, %c0_22, %c0_23] : memref<1x1x64xf32, #tpu.memory_space<vmem>>, vector<1x1x64xf32>
      tpu.vector_store %arg4[%c0_21, %c0_22, %c0_23], %18 {strides = array<i32>} : memref<1x1x64xf32, #tpu.memory_space<vmem>>, vector<1x1x64xf32>,
    } else {
    }
    %c0 = arith.constant 0 : index
    %c0_1 = arith.constant 0 : index
    %c0_2 = arith.constant 0 : index
    %3 = vector.load %arg2[%c0, %c0_1, %c0_2] : memref<1x64x64xf32, #tpu.memory_space<vmem>>, vector<1x64x64xf32>
    %4 = vector.shape_cast %3 : vector<1x64x64xf32> to vector<64x64xf32>
    %c0_3 = arith.constant 0 : index
    %c0_4 = arith.constant 0 : index
    %c0_5 = arith.constant 0 : index
    %5 = vector.load %arg3[%c0_3, %c0_4, %c0_5] : memref<1x1x64xf32, #tpu.memory_space<vmem>>, vector<1x1x64xf32>
    %cst = arith.constant dense<0.000000e+00> : vector<64xf32>
    %6 = vector.multi_reduction <add>, %4, %cst [0] : vector<64x64xf32> to vector<64xf32>
    %7 = vector.shape_cast %6 : vector<64xf32> to vector<1x1x64xf32>
    %8 = arith.addf %5, %7 : vector<1x1x64xf32>
    %c0_6 = arith.constant 0 : index
    %c0_7 = arith.constant 0 : index
    %c0_8 = arith.constant 0 : index
    %9 = vector.load %arg3[%c0_6, %c0_7, %c0_8] : memref<1x1x64xf32, #tpu.memory_space<vmem>>, vector<1x1x64xf32>
    tpu.vector_store %arg3[%c0_6, %c0_7, %c0_8], %8 {strides = array<i32>} : memref<1x1x64xf32, #tpu.memory_space<vmem>>, vector<1x1x64xf32>,
    %c0_9 = arith.constant 0 : index
    %c0_10 = arith.constant 0 : index
    %c0_11 = arith.constant 0 : index
    %10 = vector.load %arg4[%c0_9, %c0_10, %c0_11] : memref<1x1x64xf32, #tpu.memory_space<vmem>>, vector<1x1x64xf32>
    %11 = arith.mulf %4, %4 : vector<64x64xf32>
    %cst_12 = arith.constant dense<0.000000e+00> : vector<64xf32>
    %12 = vector.multi_reduction <add>, %11, %cst_12 [0] : vector<64x64xf32> to vector<64xf32>
    %13 = vector.shape_cast %12 : vector<64xf32> to vector<1x1x64xf32>
    %14 = arith.addf %10, %13 : vector<1x1x64xf32>
    %c0_13 = arith.constant 0 : index
    %c0_14 = arith.constant 0 : index
    %c0_15 = arith.constant 0 : index
    %15 = vector.load %arg4[%c0_13, %c0_14, %c0_15] : memref<1x1x64xf32, #tpu.memory_space<vmem>>, vector<1x1x64xf32>
    tpu.vector_store %arg4[%c0_13, %c0_14, %c0_15], %14 {strides = array<i32>} : memref<1x1x64xf32, #tpu.memory_space<vmem>>, vector<1x1x64xf32>,
    return
  }
  func.func @transform_0(%arg0: i32, %arg1: i32) -> (i32, i32, i32) {
    %c0_i32 = arith.constant 0 : i32
    %c0_i32_0 = arith.constant 0 : i32
    return %arg0, %arg1, %c0_i32 : i32, i32, i32
  }
  func.func @transform_1(%arg0: i32, %arg1: i32) -> (i32, i32, i32) {
    %c0_i32 = arith.constant 0 : i32
    %c0_i32_0 = arith.constant 0 : i32
    %c0_i32_1 = arith.constant 0 : i32
    return %arg0, %c0_i32, %c0_i32_0 : i32, i32, i32
  }
  func.func @transform_2(%arg0: i32, %arg1: i32) -> (i32, i32, i32) {
    %c0_i32 = arith.constant 0 : i32
    %c0_i32_0 = arith.constant 0 : i32
    %c0_i32_1 = arith.constant 0 : i32
    return %arg0, %c0_i32, %c0_i32_0 : i32, i32, i32
  }
}

module attributes {stable_mosaic.version = 11 : i64} {
  func.func @_ws_kernel(%arg0: i32, %arg1: memref<64x128xf32, #tpu.memory_space<vmem>>, %arg2: memref<64x128xf32, #tpu.memory_space<vmem>>) attributes {dimension_semantics = [#tpu.dimension_semantics<parallel>], iteration_bounds = array<i64: 1>, scalar_prefetch = 0 : i64, scratch_operands = 0 : i64, tpu.core_type = #tpu.core_type<tc>, window_params = [{transform_indices = @transform_0, window_bounds = array<i64: 64, 128>}, {transform_indices = @transform_1, window_bounds = array<i64: 64, 128>}]} {
    %c0 = arith.constant 0 : index
    %c0_0 = arith.constant 0 : index
    %0 = vector.load %arg1[%c0, %c0_0] : memref<64x128xf32, #tpu.memory_space<vmem>>, vector<64x128xf32>
    %cst = arith.constant dense<0.000000e+00> : vector<128xf32>
    %1 = vector.multi_reduction <add>, %0, %cst [0] : vector<64x128xf32> to vector<128xf32>
    %2 = vector.shape_cast %1 : vector<128xf32> to vector<1x128xf32>
    %cst_1 = arith.constant 1.562500e-02 : f32
    %3 = vector.broadcast %cst_1 : f32 to vector<1x128xf32>
    %4 = arith.mulf %2, %3 : vector<1x128xf32>
    %5 = vector.broadcast %4 : vector<1x128xf32> to vector<64x128xf32>
    %6 = arith.subf %0, %5 : vector<64x128xf32>
    %7 = arith.mulf %6, %6 : vector<64x128xf32>
    %cst_2 = arith.constant dense<0.000000e+00> : vector<128xf32>
    %8 = vector.multi_reduction <add>, %7, %cst_2 [0] : vector<64x128xf32> to vector<128xf32>
    %9 = vector.shape_cast %8 : vector<128xf32> to vector<1x128xf32>
    %cst_3 = arith.constant 1.562500e-02 : f32
    %10 = vector.broadcast %cst_3 : f32 to vector<1x128xf32>
    %11 = arith.mulf %9, %10 : vector<1x128xf32>
    %cst_4 = arith.constant 1.000000e-10 : f32
    %12 = vector.broadcast %cst_4 : f32 to vector<1x128xf32>
    %13 = arith.addf %11, %12 : vector<1x128xf32>
    %14 = math.rsqrt %13 : vector<1x128xf32>
    %15 = vector.broadcast %14 : vector<1x128xf32> to vector<64x128xf32>
    %16 = arith.mulf %6, %15 : vector<64x128xf32>
    %c0_5 = arith.constant 0 : index
    %c0_6 = arith.constant 0 : index
    %17 = vector.load %arg2[%c0_5, %c0_6] : memref<64x128xf32, #tpu.memory_space<vmem>>, vector<64x128xf32>
    tpu.vector_store %arg2[%c0_5, %c0_6], %16 {strides = array<i32>} : memref<64x128xf32, #tpu.memory_space<vmem>>, vector<64x128xf32>,
    return
  }
  func.func @transform_0(%arg0: i32) -> (i32, i32) {
    %c0_i32 = arith.constant 0 : i32
    %c0_i32_0 = arith.constant 0 : i32
    return %c0_i32, %arg0 : i32, i32
  }
  func.func @transform_1(%arg0: i32) -> (i32, i32) {
    %c0_i32 = arith.constant 0 : i32
    %c0_i32_0 = arith.constant 0 : i32
    return %c0_i32, %arg0 : i32, i32
  }
}

module attributes {stable_mosaic.version = 11 : i64} {
  func.func @_conv1x1_gn_kernel(%arg0: i32, %arg1: i32, %arg2: i32, %arg3: memref<1x1x64xf32, #tpu.memory_space<vmem>>, %arg4: memref<1x1x64xf32, #tpu.memory_space<vmem>>, %arg5: memref<1x64x64xf32, #tpu.memory_space<vmem>>, %arg6: memref<64x128xf32, #tpu.memory_space<vmem>>, %arg7: memref<1x64x128xf32, #tpu.memory_space<vmem>>, %arg8: memref<1x1x128xf32, #tpu.memory_space<vmem>>, %arg9: memref<1x1x128xf32, #tpu.memory_space<vmem>>) attributes {dimension_semantics = [#tpu.dimension_semantics<parallel>, #tpu.dimension_semantics<parallel>, #tpu.dimension_semantics<arbitrary>], iteration_bounds = array<i64: 2, 1, 1>, scalar_prefetch = 0 : i64, scratch_operands = 0 : i64, tpu.core_type = #tpu.core_type<tc>, window_params = [{transform_indices = @transform_0, window_bounds = array<i64: 1, 1, 64>}, {transform_indices = @transform_1, window_bounds = array<i64: 1, 1, 64>}, {transform_indices = @transform_2, window_bounds = array<i64: 1, 64, 64>}, {transform_indices = @transform_3, window_bounds = array<i64: 64, 128>}, {transform_indices = @transform_4, window_bounds = array<i64: 1, 64, 128>}, {transform_indices = @transform_5, window_bounds = array<i64: 1, 1, 128>}, {transform_indices = @transform_6, window_bounds = array<i64: 1, 1, 128>}]} {
    %c0 = arith.constant 0 : index
    %c0_0 = arith.constant 0 : index
    %c0_1 = arith.constant 0 : index
    %0 = vector.load %arg5[%c0, %c0_0, %c0_1] : memref<1x64x64xf32, #tpu.memory_space<vmem>>, vector<1x64x64xf32>
    %1 = vector.shape_cast %0 : vector<1x64x64xf32> to vector<64x64xf32>
    %c0_2 = arith.constant 0 : index
    %c0_3 = arith.constant 0 : index
    %c0_4 = arith.constant 0 : index
    %2 = vector.load %arg3[%c0_2, %c0_3, %c0_4] : memref<1x1x64xf32, #tpu.memory_space<vmem>>, vector<1x1x64xf32>
    %3 = vector.shape_cast %2 : vector<1x1x64xf32> to vector<1x64xf32>
    %4 = vector.broadcast %3 : vector<1x64xf32> to vector<64x64xf32>
    %5 = arith.mulf %1, %4 : vector<64x64xf32>
    %c0_5 = arith.constant 0 : index
    %c0_6 = arith.constant 0 : index
    %c0_7 = arith.constant 0 : index
    %6 = vector.load %arg4[%c0_5, %c0_6, %c0_7] : memref<1x1x64xf32, #tpu.memory_space<vmem>>, vector<1x1x64xf32>
    %7 = vector.shape_cast %6 : vector<1x1x64xf32> to vector<1x64xf32>
    %8 = vector.broadcast %7 : vector<1x64xf32> to vector<64x64xf32>
    %9 = arith.addf %5, %8 : vector<64x64xf32>
    %cst = arith.constant 0.000000e+00 : f32
    %10 = vector.broadcast %cst : f32 to vector<64x64xf32>
    %11 = arith.maximumf %9, %10 : vector<64x64xf32>
    %c0_8 = arith.constant 0 : index
    %c0_9 = arith.constant 0 : index
    %12 = vector.load %arg6[%c0_8, %c0_9] : memref<64x128xf32, #tpu.memory_space<vmem>>, vector<64x128xf32>
    %cst_10 = arith.constant dense<0.000000e+00> : vector<64x128xf32>
    %13 = tpu.matmul %11, %12, %cst_10 {dimension_numbers = #tpu.dot_dimension_numbers<[1], [0], [0], [1], [0, 0, 1, 1], [], []>} : vector<64x64xf32>, vector<64x128xf32>, vector<64x128xf32> -> vector<64x128xf32>
    %c0_i32 = arith.constant 0 : i32
    %14 = arith.cmpi eq, %arg2, %c0_i32 : i32
    %15 = arith.extui %14 : i1 to i32
    %c0_i32_11 = arith.constant 0 : i32
    %16 = arith.cmpi ne, %15, %c0_i32_11 : i32
    scf.if %16 {
      %cst_29 = arith.constant 0.000000e+00 : f32
      %31 = vector.broadcast %cst_29 : f32 to vector<1x1x128xf32>
      %c0_30 = arith.constant 0 : index
      %c0_31 = arith.constant 0 : index
      %c0_32 = arith.constant 0 : index
      %32 = vector.load %arg8[%c0_30, %c0_31, %c0_32] : memref<1x1x128xf32, #tpu.memory_space<vmem>>, vector<1x1x128xf32>
      tpu.vector_store %arg8[%c0_30, %c0_31, %c0_32], %31 {strides = array<i32>} : memref<1x1x128xf32, #tpu.memory_space<vmem>>, vector<1x1x128xf32>,
      %cst_33 = arith.constant 0.000000e+00 : f32
      %33 = vector.broadcast %cst_33 : f32 to vector<1x1x128xf32>
      %c0_34 = arith.constant 0 : index
      %c0_35 = arith.constant 0 : index
      %c0_36 = arith.constant 0 : index
      %34 = vector.load %arg9[%c0_34, %c0_35, %c0_36] : memref<1x1x128xf32, #tpu.memory_space<vmem>>, vector<1x1x128xf32>
      tpu.vector_store %arg9[%c0_34, %c0_35, %c0_36], %33 {strides = array<i32>} : memref<1x1x128xf32, #tpu.memory_space<vmem>>, vector<1x1x128xf32>,
    } else {
    }
    %c0_12 = arith.constant 0 : index
    %c0_13 = arith.constant 0 : index
    %c0_14 = arith.constant 0 : index
    %17 = vector.load %arg8[%c0_12, %c0_13, %c0_14] : memref<1x1x128xf32, #tpu.memory_space<vmem>>, vector<1x1x128xf32>
    %cst_15 = arith.constant dense<0.000000e+00> : vector<128xf32>
    %18 = vector.multi_reduction <add>, %13, %cst_15 [0] : vector<64x128xf32> to vector<128xf32>
    %19 = vector.shape_cast %18 : vector<128xf32> to vector<1x1x128xf32>
    %20 = arith.addf %17, %19 : vector<1x1x128xf32>
    %c0_16 = arith.constant 0 : index
    %c0_17 = arith.constant 0 : index
    %c0_18 = arith.constant 0 : index
    %21 = vector.load %arg8[%c0_16, %c0_17, %c0_18] : memref<1x1x128xf32, #tpu.memory_space<vmem>>, vector<1x1x128xf32>
    tpu.vector_store %arg8[%c0_16, %c0_17, %c0_18], %20 {strides = array<i32>} : memref<1x1x128xf32, #tpu.memory_space<vmem>>, vector<1x1x128xf32>,
    %c0_19 = arith.constant 0 : index
    %c0_20 = arith.constant 0 : index
    %c0_21 = arith.constant 0 : index
    %22 = vector.load %arg9[%c0_19, %c0_20, %c0_21] : memref<1x1x128xf32, #tpu.memory_space<vmem>>, vector<1x1x128xf32>
    %23 = arith.mulf %13, %13 : vector<64x128xf32>
    %cst_22 = arith.constant dense<0.000000e+00> : vector<128xf32>
    %24 = vector.multi_reduction <add>, %23, %cst_22 [0] : vector<64x128xf32> to vector<128xf32>
    %25 = vector.shape_cast %24 : vector<128xf32> to vector<1x1x128xf32>
    %26 = arith.addf %22, %25 : vector<1x1x128xf32>
    %c0_23 = arith.constant 0 : index
    %c0_24 = arith.constant 0 : index
    %c0_25 = arith.constant 0 : index
    %27 = vector.load %arg9[%c0_23, %c0_24, %c0_25] : memref<1x1x128xf32, #tpu.memory_space<vmem>>, vector<1x1x128xf32>
    tpu.vector_store %arg9[%c0_23, %c0_24, %c0_25], %26 {strides = array<i32>} : memref<1x1x128xf32, #tpu.memory_space<vmem>>, vector<1x1x128xf32>,
    %c0_26 = arith.constant 0 : index
    %c0_27 = arith.constant 0 : index
    %c0_28 = arith.constant 0 : index
    %28 = vector.load %arg7[%c0_26, %c0_27, %c0_28] : memref<1x64x128xf32, #tpu.memory_space<vmem>>, vector<1x64x128xf32>
    %29 = vector.shape_cast %28 : vector<1x64x128xf32> to vector<64x128xf32>
    %30 = vector.shape_cast %13 : vector<64x128xf32> to vector<1x64x128xf32>
    tpu.vector_store %arg7[%c0_26, %c0_27, %c0_28], %30 {strides = array<i32>} : memref<1x64x128xf32, #tpu.memory_space<vmem>>, vector<1x64x128xf32>,
    return
  }
  func.func @transform_0(%arg0: i32, %arg1: i32, %arg2: i32) -> (i32, i32, i32) {
    %c0_i32 = arith.constant 0 : i32
    %c0_i32_0 = arith.constant 0 : i32
    %c0_i32_1 = arith.constant 0 : i32
    return %arg0, %c0_i32, %c0_i32_0 : i32, i32, i32
  }
  func.func @transform_1(%arg0: i32, %arg1: i32, %arg2: i32) -> (i32, i32, i32) {
    %c0_i32 = arith.constant 0 : i32
    %c0_i32_0 = arith.constant 0 : i32
    %c0_i32_1 = arith.constant 0 : i32
    return %arg0, %c0_i32, %c0_i32_0 : i32, i32, i32
  }
  func.func @transform_2(%arg0: i32, %arg1: i32, %arg2: i32) -> (i32, i32, i32) {
    %c0_i32 = arith.constant 0 : i32
    %c0_i32_0 = arith.constant 0 : i32
    return %arg0, %arg2, %c0_i32 : i32, i32, i32
  }
  func.func @transform_3(%arg0: i32, %arg1: i32, %arg2: i32) -> (i32, i32) {
    %c0_i32 = arith.constant 0 : i32
    %c0_i32_0 = arith.constant 0 : i32
    return %c0_i32, %arg1 : i32, i32
  }
  func.func @transform_4(%arg0: i32, %arg1: i32, %arg2: i32) -> (i32, i32, i32) {
    %c0_i32 = arith.constant 0 : i32
    return %arg0, %arg2, %arg1 : i32, i32, i32
  }
  func.func @transform_5(%arg0: i32, %arg1: i32, %arg2: i32) -> (i32, i32, i32) {
    %c0_i32 = arith.constant 0 : i32
    %c0_i32_0 = arith.constant 0 : i32
    return %arg0, %c0_i32, %arg1 : i32, i32, i32
  }
  func.func @transform_6(%arg0: i32, %arg1: i32, %arg2: i32) -> (i32, i32, i32) {
    %c0_i32 = arith.constant 0 : i32
    %c0_i32_0 = arith.constant 0 : i32
    return %arg0, %c0_i32, %arg1 : i32, i32, i32
  }
}

module attributes {stable_mosaic.version = 11 : i64} {
  func.func @_ws_kernel(%arg0: i32, %arg1: memref<288x128xf32, #tpu.memory_space<vmem>>, %arg2: memref<288x128xf32, #tpu.memory_space<vmem>>) attributes {dimension_semantics = [#tpu.dimension_semantics<parallel>], iteration_bounds = array<i64: 1>, scalar_prefetch = 0 : i64, scratch_operands = 0 : i64, tpu.core_type = #tpu.core_type<tc>, window_params = [{transform_indices = @transform_0, window_bounds = array<i64: 288, 128>}, {transform_indices = @transform_1, window_bounds = array<i64: 288, 128>}]} {
    %c0 = arith.constant 0 : index
    %c0_0 = arith.constant 0 : index
    %0 = vector.load %arg1[%c0, %c0_0] : memref<288x128xf32, #tpu.memory_space<vmem>>, vector<288x128xf32>
    %cst = arith.constant dense<0.000000e+00> : vector<128xf32>
    %1 = vector.multi_reduction <add>, %0, %cst [0] : vector<288x128xf32> to vector<128xf32>
    %2 = vector.shape_cast %1 : vector<128xf32> to vector<1x128xf32>
    %cst_1 = arith.constant 0.00347222225 : f32
    %3 = vector.broadcast %cst_1 : f32 to vector<1x128xf32>
    %4 = arith.mulf %2, %3 : vector<1x128xf32>
    %5 = vector.broadcast %4 : vector<1x128xf32> to vector<288x128xf32>
    %6 = arith.subf %0, %5 : vector<288x128xf32>
    %7 = arith.mulf %6, %6 : vector<288x128xf32>
    %cst_2 = arith.constant dense<0.000000e+00> : vector<128xf32>
    %8 = vector.multi_reduction <add>, %7, %cst_2 [0] : vector<288x128xf32> to vector<128xf32>
    %9 = vector.shape_cast %8 : vector<128xf32> to vector<1x128xf32>
    %cst_3 = arith.constant 0.00347222225 : f32
    %10 = vector.broadcast %cst_3 : f32 to vector<1x128xf32>
    %11 = arith.mulf %9, %10 : vector<1x128xf32>
    %cst_4 = arith.constant 1.000000e-10 : f32
    %12 = vector.broadcast %cst_4 : f32 to vector<1x128xf32>
    %13 = arith.addf %11, %12 : vector<1x128xf32>
    %14 = math.rsqrt %13 : vector<1x128xf32>
    %15 = vector.broadcast %14 : vector<1x128xf32> to vector<288x128xf32>
    %16 = arith.mulf %6, %15 : vector<288x128xf32>
    %c0_5 = arith.constant 0 : index
    %c0_6 = arith.constant 0 : index
    %17 = vector.load %arg2[%c0_5, %c0_6] : memref<288x128xf32, #tpu.memory_space<vmem>>, vector<288x128xf32>
    tpu.vector_store %arg2[%c0_5, %c0_6], %16 {strides = array<i32>} : memref<288x128xf32, #tpu.memory_space<vmem>>, vector<288x128xf32>,
    return
  }
  func.func @transform_0(%arg0: i32) -> (i32, i32) {
    %c0_i32 = arith.constant 0 : i32
    %c0_i32_0 = arith.constant 0 : i32
    return %c0_i32, %arg0 : i32, i32
  }
  func.func @transform_1(%arg0: i32) -> (i32, i32) {
    %c0_i32 = arith.constant 0 : i32
    %c0_i32_0 = arith.constant 0 : i32
    return %c0_i32, %arg0 : i32, i32
  }
}

module attributes {stable_mosaic.version = 11 : i64} {
  func.func @_conv3x3_gn_kernel(%arg0: i32, %arg1: i32, %arg2: i32, %arg3: memref<1x4x5x5x128xf32, #tpu.memory_space<vmem>>, %arg4: memref<1152x128xf32, #tpu.memory_space<vmem>>, %arg5: memref<1x4x4x128xf32, #tpu.memory_space<vmem>>, %arg6: memref<1x1x128xf32, #tpu.memory_space<vmem>>, %arg7: memref<1x1x128xf32, #tpu.memory_space<vmem>>, %arg8: memref<16x128xf32, #tpu.memory_space<vmem>>) attributes {dimension_semantics = [#tpu.dimension_semantics<parallel>, #tpu.dimension_semantics<parallel>, #tpu.dimension_semantics<arbitrary>], iteration_bounds = array<i64: 2, 1, 1>, scalar_prefetch = 0 : i64, scratch_operands = 1 : i64, tpu.core_type = #tpu.core_type<tc>, window_params = [{transform_indices = @transform_0, window_bounds = array<i64: 1, 4, 5, 5, 128>}, {transform_indices = @transform_1, window_bounds = array<i64: 1152, 128>}, {transform_indices = @transform_2, window_bounds = array<i64: 1, 4, 4, 128>}, {transform_indices = @transform_3, window_bounds = array<i64: 1, 1, 128>}, {transform_indices = @transform_4, window_bounds = array<i64: 1, 1, 128>}]} {
    %cst = arith.constant 0.000000e+00 : f32
    %0 = vector.broadcast %cst : f32 to vector<16x128xf32>
    %c0 = arith.constant 0 : index
    %c0_0 = arith.constant 0 : index
    %1 = vector.load %arg8[%c0, %c0_0] : memref<16x128xf32, #tpu.memory_space<vmem>>, vector<16x128xf32>
    tpu.vector_store %arg8[%c0, %c0_0], %0 {strides = array<i32>} : memref<16x128xf32, #tpu.memory_space<vmem>>, vector<16x128xf32>,
    %c4_i32 = arith.constant 4 : i32
    %2 = arith.muli %arg2, %c4_i32 : i32
    %3 = tpu.assume_multiple %2, 4 : i32
    %c0_i32 = arith.constant 0 : i32
    %4 = arith.addi %3, %c0_i32 : i32
    %c0_1 = arith.constant 0 : index
    %c0_2 = arith.constant 0 : index
    %5 = arith.index_cast %4 : i32 to index
    %c0_3 = arith.constant 0 : index
    %c0_4 = arith.constant 0 : index
    %6 = vector.load %arg3[%c0_1, %c0_2, %5, %c0_3, %c0_4] : memref<1x4x5x5x128xf32, #tpu.memory_space<vmem>>, vector<1x1x4x4x128xf32>
    %7 = vector.shape_cast %6 : vector<1x1x4x4x128xf32> to vector<4x4x128xf32>
    %8 = vector.shape_cast %7 : vector<4x4x128xf32> to vector<16x128xf32>
    %c0_5 = arith.constant 0 : index
    %c0_6 = arith.constant 0 : index
    %9 = vector.load %arg8[%c0_5, %c0_6] : memref<16x128xf32, #tpu.memory_space<vmem>>, vector<16x128xf32>
    %c0_7 = arith.constant 0 : index
    %c0_8 = arith.constant 0 : index
    %10 = vector.load %arg4[%c0_7, %c0_8] : memref<1152x128xf32, #tpu.memory_space<vmem>>, vector<128x128xf32>
    %cst_9 = arith.constant dense<0.000000e+00> : vector<16x128xf32>
    %11 = tpu.matmul %8, %10, %cst_9 {dimension_numbers = #tpu.dot_dimension_numbers<[1], [0], [0], [1], [0, 0, 1, 1], [], []>} : vector<16x128xf32>, vector<128x128xf32>, vector<16x128xf32> -> vector<16x128xf32>
    %12 = arith.addf %9, %11 : vector<16x128xf32>
    %c0_10 = arith.constant 0 : index
    %c0_11 = arith.constant 0 : index
    %13 = vector.load %arg8[%c0_10, %c0_11] : memref<16x128xf32, #tpu.memory_space<vmem>>, vector<16x128xf32>
    tpu.vector_store %arg8[%c0_10, %c0_11], %12 {strides = array<i32>} : memref<16x128xf32, #tpu.memory_space<vmem>>, vector<16x128xf32>,
    %c0_i32_12 = arith.constant 0 : i32
    %14 = arith.addi %3, %c0_i32_12 : i32
    %c0_13 = arith.constant 0 : index
    %c1 = arith.constant 1 : index
    %15 = arith.index_cast %14 : i32 to index
    %c0_14 = arith.constant 0 : index
    %c0_15 = arith.constant 0 : index
    %16 = vector.load %arg3[%c0_13, %c1, %15, %c0_14, %c0_15] : memref<1x4x5x5x128xf32, #tpu.memory_space<vmem>>, vector<1x1x4x4x128xf32>
    %17 = vector.shape_cast %16 : vector<1x1x4x4x128xf32> to vector<4x4x128xf32>
    %18 = vector.shape_cast %17 : vector<4x4x128xf32> to vector<16x128xf32>
    %c0_16 = arith.constant 0 : index
    %c0_17 = arith.constant 0 : index
    %19 = vector.load %arg8[%c0_16, %c0_17] : memref<16x128xf32, #tpu.memory_space<vmem>>, vector<16x128xf32>
    %c128 = arith.constant 128 : index
    %c0_18 = arith.constant 0 : index
    %20 = vector.load %arg4[%c128, %c0_18] : memref<1152x128xf32, #tpu.memory_space<vmem>>, vector<128x128xf32>
    %cst_19 = arith.constant dense<0.000000e+00> : vector<16x128xf32>
    %21 = tpu.matmul %18, %20, %cst_19 {dimension_numbers = #tpu.dot_dimension_numbers<[1], [0], [0], [1], [0, 0, 1, 1], [], []>} : vector<16x128xf32>, vector<128x128xf32>, vector<16x128xf32> -> vector<16x128xf32>
    %22 = arith.addf %19, %21 : vector<16x128xf32>
    %c0_20 = arith.constant 0 : index
    %c0_21 = arith.constant 0 : index
    %23 = vector.load %arg8[%c0_20, %c0_21] : memref<16x128xf32, #tpu.memory_space<vmem>>, vector<16x128xf32>
    tpu.vector_store %arg8[%c0_20, %c0_21], %22 {strides = array<i32>} : memref<16x128xf32, #tpu.memory_space<vmem>>, vector<16x128xf32>,
    %c0_i32_22 = arith.constant 0 : i32
    %24 = arith.addi %3, %c0_i32_22 : i32
    %c0_23 = arith.constant 0 : index
    %c0_24 = arith.constant 0 : index
    %25 = arith.index_cast %24 : i32 to index
    %c1_25 = arith.constant 1 : index
    %c0_26 = arith.constant 0 : index
    %26 = vector.load %arg3[%c0_23, %c0_24, %25, %c1_25, %c0_26] : memref<1x4x5x5x128xf32, #tpu.memory_space<vmem>>, vector<1x1x4x4x128xf32>
    %27 = vector.shape_cast %26 : vector<1x1x4x4x128xf32> to vector<4x4x128xf32>
    %28 = vector.shape_cast %27 : vector<4x4x128xf32> to vector<16x128xf32>
    %c0_27 = arith.constant 0 : index
    %c0_28 = arith.constant 0 : index
    %29 = vector.load %arg8[%c0_27, %c0_28] : memref<16x128xf32, #tpu.memory_space<vmem>>, vector<16x128xf32>
    %c256 = arith.constant 256 : index
    %c0_29 = arith.constant 0 : index
    %30 = vector.load %arg4[%c256, %c0_29] : memref<1152x128xf32, #tpu.memory_space<vmem>>, vector<128x128xf32>
    %cst_30 = arith.constant dense<0.000000e+00> : vector<16x128xf32>
    %31 = tpu.matmul %28, %30, %cst_30 {dimension_numbers = #tpu.dot_dimension_numbers<[1], [0], [0], [1], [0, 0, 1, 1], [], []>} : vector<16x128xf32>, vector<128x128xf32>, vector<16x128xf32> -> vector<16x128xf32>
    %32 = arith.addf %29, %31 : vector<16x128xf32>
    %c0_31 = arith.constant 0 : index
    %c0_32 = arith.constant 0 : index
    %33 = vector.load %arg8[%c0_31, %c0_32] : memref<16x128xf32, #tpu.memory_space<vmem>>, vector<16x128xf32>
    tpu.vector_store %arg8[%c0_31, %c0_32], %32 {strides = array<i32>} : memref<16x128xf32, #tpu.memory_space<vmem>>, vector<16x128xf32>,
    %c0_i32_33 = arith.constant 0 : i32
    %34 = arith.addi %3, %c0_i32_33 : i32
    %c0_34 = arith.constant 0 : index
    %c2 = arith.constant 2 : index
    %35 = arith.index_cast %34 : i32 to index
    %c0_35 = arith.constant 0 : index
    %c0_36 = arith.constant 0 : index
    %36 = vector.load %arg3[%c0_34, %c2, %35, %c0_35, %c0_36] : memref<1x4x5x5x128xf32, #tpu.memory_space<vmem>>, vector<1x1x4x4x128xf32>
    %37 = vector.shape_cast %36 : vector<1x1x4x4x128xf32> to vector<4x4x128xf32>
    %38 = vector.shape_cast %37 : vector<4x4x128xf32> to vector<16x128xf32>
    %c0_37 = arith.constant 0 : index
    %c0_38 = arith.constant 0 : index
    %39 = vector.load %arg8[%c0_37, %c0_38] : memref<16x128xf32, #tpu.memory_space<vmem>>, vector<16x128xf32>
    %c384 = arith.constant 384 : index
    %c0_39 = arith.constant 0 : index
    %40 = vector.load %arg4[%c384, %c0_39] : memref<1152x128xf32, #tpu.memory_space<vmem>>, vector<128x128xf32>
    %cst_40 = arith.constant dense<0.000000e+00> : vector<16x128xf32>
    %41 = tpu.matmul %38, %40, %cst_40 {dimension_numbers = #tpu.dot_dimension_numbers<[1], [0], [0], [1], [0, 0, 1, 1], [], []>} : vector<16x128xf32>, vector<128x128xf32>, vector<16x128xf32> -> vector<16x128xf32>
    %42 = arith.addf %39, %41 : vector<16x128xf32>
    %c0_41 = arith.constant 0 : index
    %c0_42 = arith.constant 0 : index
    %43 = vector.load %arg8[%c0_41, %c0_42] : memref<16x128xf32, #tpu.memory_space<vmem>>, vector<16x128xf32>
    tpu.vector_store %arg8[%c0_41, %c0_42], %42 {strides = array<i32>} : memref<16x128xf32, #tpu.memory_space<vmem>>, vector<16x128xf32>,
    %c0_i32_43 = arith.constant 0 : i32
    %44 = arith.addi %3, %c0_i32_43 : i32
    %c0_44 = arith.constant 0 : index
    %c3 = arith.constant 3 : index
    %45 = arith.index_cast %44 : i32 to index
    %c0_45 = arith.constant 0 : index
    %c0_46 = arith.constant 0 : index
    %46 = vector.load %arg3[%c0_44, %c3, %45, %c0_45, %c0_46] : memref<1x4x5x5x128xf32, #tpu.memory_space<vmem>>, vector<1x1x4x4x128xf32>
    %47 = vector.shape_cast %46 : vector<1x1x4x4x128xf32> to vector<4x4x128xf32>
    %48 = vector.shape_cast %47 : vector<4x4x128xf32> to vector<16x128xf32>
    %c0_47 = arith.constant 0 : index
    %c0_48 = arith.constant 0 : index
    %49 = vector.load %arg8[%c0_47, %c0_48] : memref<16x128xf32, #tpu.memory_space<vmem>>, vector<16x128xf32>
    %c512 = arith.constant 512 : index
    %c0_49 = arith.constant 0 : index
    %50 = vector.load %arg4[%c512, %c0_49] : memref<1152x128xf32, #tpu.memory_space<vmem>>, vector<128x128xf32>
    %cst_50 = arith.constant dense<0.000000e+00> : vector<16x128xf32>
    %51 = tpu.matmul %48, %50, %cst_50 {dimension_numbers = #tpu.dot_dimension_numbers<[1], [0], [0], [1], [0, 0, 1, 1], [], []>} : vector<16x128xf32>, vector<128x128xf32>, vector<16x128xf32> -> vector<16x128xf32>
    %52 = arith.addf %49, %51 : vector<16x128xf32>
    %c0_51 = arith.constant 0 : index
    %c0_52 = arith.constant 0 : index
    %53 = vector.load %arg8[%c0_51, %c0_52] : memref<16x128xf32, #tpu.memory_space<vmem>>, vector<16x128xf32>
    tpu.vector_store %arg8[%c0_51, %c0_52], %52 {strides = array<i32>} : memref<16x128xf32, #tpu.memory_space<vmem>>, vector<16x128xf32>,
    %c0_i32_53 = arith.constant 0 : i32
    %54 = arith.addi %3, %c0_i32_53 : i32
    %c0_54 = arith.constant 0 : index
    %c2_55 = arith.constant 2 : index
    %55 = arith.index_cast %54 : i32 to index
    %c1_56 = arith.constant 1 : index
    %c0_57 = arith.constant 0 : index
    %56 = vector.load %arg3[%c0_54, %c2_55, %55, %c1_56, %c0_57] : memref<1x4x5x5x128xf32, #tpu.memory_space<vmem>>, vector<1x1x4x4x128xf32>
    %57 = vector.shape_cast %56 : vector<1x1x4x4x128xf32> to vector<4x4x128xf32>
    %58 = vector.shape_cast %57 : vector<4x4x128xf32> to vector<16x128xf32>
    %c0_58 = arith.constant 0 : index
    %c0_59 = arith.constant 0 : index
    %59 = vector.load %arg8[%c0_58, %c0_59] : memref<16x128xf32, #tpu.memory_space<vmem>>, vector<16x128xf32>
    %c640 = arith.constant 640 : index
    %c0_60 = arith.constant 0 : index
    %60 = vector.load %arg4[%c640, %c0_60] : memref<1152x128xf32, #tpu.memory_space<vmem>>, vector<128x128xf32>
    %cst_61 = arith.constant dense<0.000000e+00> : vector<16x128xf32>
    %61 = tpu.matmul %58, %60, %cst_61 {dimension_numbers = #tpu.dot_dimension_numbers<[1], [0], [0], [1], [0, 0, 1, 1], [], []>} : vector<16x128xf32>, vector<128x128xf32>, vector<16x128xf32> -> vector<16x128xf32>
    %62 = arith.addf %59, %61 : vector<16x128xf32>
    %c0_62 = arith.constant 0 : index
    %c0_63 = arith.constant 0 : index
    %63 = vector.load %arg8[%c0_62, %c0_63] : memref<16x128xf32, #tpu.memory_space<vmem>>, vector<16x128xf32>
    tpu.vector_store %arg8[%c0_62, %c0_63], %62 {strides = array<i32>} : memref<16x128xf32, #tpu.memory_space<vmem>>, vector<16x128xf32>,
    %c1_i32 = arith.constant 1 : i32
    %64 = arith.addi %3, %c1_i32 : i32
    %c0_64 = arith.constant 0 : index
    %c0_65 = arith.constant 0 : index
    %65 = arith.index_cast %64 : i32 to index
    %c0_66 = arith.constant 0 : index
    %c0_67 = arith.constant 0 : index
    %66 = vector.load %arg3[%c0_64, %c0_65, %65, %c0_66, %c0_67] : memref<1x4x5x5x128xf32, #tpu.memory_space<vmem>>, vector<1x1x4x4x128xf32>
    %67 = vector.shape_cast %66 : vector<1x1x4x4x128xf32> to vector<4x4x128xf32>
    %68 = vector.shape_cast %67 : vector<4x4x128xf32> to vector<16x128xf32>
    %c0_68 = arith.constant 0 : index
    %c0_69 = arith.constant 0 : index
    %69 = vector.load %arg8[%c0_68, %c0_69] : memref<16x128xf32, #tpu.memory_space<vmem>>, vector<16x128xf32>
    %c768 = arith.constant 768 : index
    %c0_70 = arith.constant 0 : index
    %70 = vector.load %arg4[%c768, %c0_70] : memref<1152x128xf32, #tpu.memory_space<vmem>>, vector<128x128xf32>
    %cst_71 = arith.constant dense<0.000000e+00> : vector<16x128xf32>
    %71 = tpu.matmul %68, %70, %cst_71 {dimension_numbers = #tpu.dot_dimension_numbers<[1], [0], [0], [1], [0, 0, 1, 1], [], []>} : vector<16x128xf32>, vector<128x128xf32>, vector<16x128xf32> -> vector<16x128xf32>
    %72 = arith.addf %69, %71 : vector<16x128xf32>
    %c0_72 = arith.constant 0 : index
    %c0_73 = arith.constant 0 : index
    %73 = vector.load %arg8[%c0_72, %c0_73] : memref<16x128xf32, #tpu.memory_space<vmem>>, vector<16x128xf32>
    tpu.vector_store %arg8[%c0_72, %c0_73], %72 {strides = array<i32>} : memref<16x128xf32, #tpu.memory_space<vmem>>, vector<16x128xf32>,
    %c1_i32_74 = arith.constant 1 : i32
    %74 = arith.addi %3, %c1_i32_74 : i32
    %c0_75 = arith.constant 0 : index
    %c1_76 = arith.constant 1 : index
    %75 = arith.index_cast %74 : i32 to index
    %c0_77 = arith.constant 0 : index
    %c0_78 = arith.constant 0 : index
    %76 = vector.load %arg3[%c0_75, %c1_76, %75, %c0_77, %c0_78] : memref<1x4x5x5x128xf32, #tpu.memory_space<vmem>>, vector<1x1x4x4x128xf32>
    %77 = vector.shape_cast %76 : vector<1x1x4x4x128xf32> to vector<4x4x128xf32>
    %78 = vector.shape_cast %77 : vector<4x4x128xf32> to vector<16x128xf32>
    %c0_79 = arith.constant 0 : index
    %c0_80 = arith.constant 0 : index
    %79 = vector.load %arg8[%c0_79, %c0_80] : memref<16x128xf32, #tpu.memory_space<vmem>>, vector<16x128xf32>
    %c896 = arith.constant 896 : index
    %c0_81 = arith.constant 0 : index
    %80 = vector.load %arg4[%c896, %c0_81] : memref<1152x128xf32, #tpu.memory_space<vmem>>, vector<128x128xf32>
    %cst_82 = arith.constant dense<0.000000e+00> : vector<16x128xf32>
    %81 = tpu.matmul %78, %80, %cst_82 {dimension_numbers = #tpu.dot_dimension_numbers<[1], [0], [0], [1], [0, 0, 1, 1], [], []>} : vector<16x128xf32>, vector<128x128xf32>, vector<16x128xf32> -> vector<16x128xf32>
    %82 = arith.addf %79, %81 : vector<16x128xf32>
    %c0_83 = arith.constant 0 : index
    %c0_84 = arith.constant 0 : index
    %83 = vector.load %arg8[%c0_83, %c0_84] : memref<16x128xf32, #tpu.memory_space<vmem>>, vector<16x128xf32>
    tpu.vector_store %arg8[%c0_83, %c0_84], %82 {strides = array<i32>} : memref<16x128xf32, #tpu.memory_space<vmem>>, vector<16x128xf32>,
    %c1_i32_85 = arith.constant 1 : i32
    %84 = arith.addi %3, %c1_i32_85 : i32
    %c0_86 = arith.constant 0 : index
    %c0_87 = arith.constant 0 : index
    %85 = arith.index_cast %84 : i32 to index
    %c1_88 = arith.constant 1 : index
    %c0_89 = arith.constant 0 : index
    %86 = vector.load %arg3[%c0_86, %c0_87, %85, %c1_88, %c0_89] : memref<1x4x5x5x128xf32, #tpu.memory_space<vmem>>, vector<1x1x4x4x128xf32>
    %87 = vector.shape_cast %86 : vector<1x1x4x4x128xf32> to vector<4x4x128xf32>
    %88 = vector.shape_cast %87 : vector<4x4x128xf32> to vector<16x128xf32>
    %c0_90 = arith.constant 0 : index
    %c0_91 = arith.constant 0 : index
    %89 = vector.load %arg8[%c0_90, %c0_91] : memref<16x128xf32, #tpu.memory_space<vmem>>, vector<16x128xf32>
    %c1024 = arith.constant 1024 : index
    %c0_92 = arith.constant 0 : index
    %90 = vector.load %arg4[%c1024, %c0_92] : memref<1152x128xf32, #tpu.memory_space<vmem>>, vector<128x128xf32>
    %cst_93 = arith.constant dense<0.000000e+00> : vector<16x128xf32>
    %91 = tpu.matmul %88, %90, %cst_93 {dimension_numbers = #tpu.dot_dimension_numbers<[1], [0], [0], [1], [0, 0, 1, 1], [], []>} : vector<16x128xf32>, vector<128x128xf32>, vector<16x128xf32> -> vector<16x128xf32>
    %92 = arith.addf %89, %91 : vector<16x128xf32>
    %c0_94 = arith.constant 0 : index
    %c0_95 = arith.constant 0 : index
    %93 = vector.load %arg8[%c0_94, %c0_95] : memref<16x128xf32, #tpu.memory_space<vmem>>, vector<16x128xf32>
    tpu.vector_store %arg8[%c0_94, %c0_95], %92 {strides = array<i32>} : memref<16x128xf32, #tpu.memory_space<vmem>>, vector<16x128xf32>,
    %c0_96 = arith.constant 0 : index
    %c0_97 = arith.constant 0 : index
    %94 = vector.load %arg8[%c0_96, %c0_97] : memref<16x128xf32, #tpu.memory_space<vmem>>, vector<16x128xf32>
    %c0_i32_98 = arith.constant 0 : i32
    %95 = arith.cmpi eq, %arg2, %c0_i32_98 : i32
    %96 = arith.extui %95 : i1 to i32
    %c0_i32_99 = arith.constant 0 : i32
    %97 = arith.cmpi ne, %96, %c0_i32_99 : i32
    scf.if %97 {
      %cst_118 = arith.constant 0.000000e+00 : f32
      %113 = vector.broadcast %cst_118 : f32 to vector<1x1x128xf32>
      %c0_119 = arith.constant 0 : index
      %c0_120 = arith.constant 0 : index
      %c0_121 = arith.constant 0 : index
      %114 = vector.load %arg6[%c0_119, %c0_120, %c0_121] : memref<1x1x128xf32, #tpu.memory_space<vmem>>, vector<1x1x128xf32>
      tpu.vector_store %arg6[%c0_119, %c0_120, %c0_121], %113 {strides = array<i32>} : memref<1x1x128xf32, #tpu.memory_space<vmem>>, vector<1x1x128xf32>,
      %cst_122 = arith.constant 0.000000e+00 : f32
      %115 = vector.broadcast %cst_122 : f32 to vector<1x1x128xf32>
      %c0_123 = arith.constant 0 : index
      %c0_124 = arith.constant 0 : index
      %c0_125 = arith.constant 0 : index
      %116 = vector.load %arg7[%c0_123, %c0_124, %c0_125] : memref<1x1x128xf32, #tpu.memory_space<vmem>>, vector<1x1x128xf32>
      tpu.vector_store %arg7[%c0_123, %c0_124, %c0_125], %115 {strides = array<i32>} : memref<1x1x128xf32, #tpu.memory_space<vmem>>, vector<1x1x128xf32>,
    } else {
    }
    %c0_100 = arith.constant 0 : index
    %c0_101 = arith.constant 0 : index
    %c0_102 = arith.constant 0 : index
    %98 = vector.load %arg6[%c0_100, %c0_101, %c0_102] : memref<1x1x128xf32, #tpu.memory_space<vmem>>, vector<1x1x128xf32>
    %cst_103 = arith.constant dense<0.000000e+00> : vector<128xf32>
    %99 = vector.multi_reduction <add>, %94, %cst_103 [0] : vector<16x128xf32> to vector<128xf32>
    %100 = vector.shape_cast %99 : vector<128xf32> to vector<1x1x128xf32>
    %101 = arith.addf %98, %100 : vector<1x1x128xf32>
    %c0_104 = arith.constant 0 : index
    %c0_105 = arith.constant 0 : index
    %c0_106 = arith.constant 0 : index
    %102 = vector.load %arg6[%c0_104, %c0_105, %c0_106] : memref<1x1x128xf32, #tpu.memory_space<vmem>>, vector<1x1x128xf32>
    tpu.vector_store %arg6[%c0_104, %c0_105, %c0_106], %101 {strides = array<i32>} : memref<1x1x128xf32, #tpu.memory_space<vmem>>, vector<1x1x128xf32>,
    %c0_107 = arith.constant 0 : index
    %c0_108 = arith.constant 0 : index
    %c0_109 = arith.constant 0 : index
    %103 = vector.load %arg7[%c0_107, %c0_108, %c0_109] : memref<1x1x128xf32, #tpu.memory_space<vmem>>, vector<1x1x128xf32>
    %104 = arith.mulf %94, %94 : vector<16x128xf32>
    %cst_110 = arith.constant dense<0.000000e+00> : vector<128xf32>
    %105 = vector.multi_reduction <add>, %104, %cst_110 [0] : vector<16x128xf32> to vector<128xf32>
    %106 = vector.shape_cast %105 : vector<128xf32> to vector<1x1x128xf32>
    %107 = arith.addf %103, %106 : vector<1x1x128xf32>
    %c0_111 = arith.constant 0 : index
    %c0_112 = arith.constant 0 : index
    %c0_113 = arith.constant 0 : index
    %108 = vector.load %arg7[%c0_111, %c0_112, %c0_113] : memref<1x1x128xf32, #tpu.memory_space<vmem>>, vector<1x1x128xf32>
    tpu.vector_store %arg7[%c0_111, %c0_112, %c0_113], %107 {strides = array<i32>} : memref<1x1x128xf32, #tpu.memory_space<vmem>>, vector<1x1x128xf32>,
    %109 = vector.shape_cast %94 : vector<16x128xf32> to vector<4x4x128xf32>
    %c0_114 = arith.constant 0 : index
    %c0_115 = arith.constant 0 : index
    %c0_116 = arith.constant 0 : index
    %c0_117 = arith.constant 0 : index
    %110 = vector.load %arg5[%c0_114, %c0_115, %c0_116, %c0_117] : memref<1x4x4x128xf32, #tpu.memory_space<vmem>>, vector<1x4x4x128xf32>
    %111 = vector.shape_cast %110 : vector<1x4x4x128xf32> to vector<4x4x128xf32>
    %112 = vector.shape_cast %109 : vector<4x4x128xf32> to vector<1x4x4x128xf32>
    tpu.vector_store %arg5[%c0_114, %c0_115, %c0_116, %c0_117], %112 {strides = array<i32>} : memref<1x4x4x128xf32, #tpu.memory_space<vmem>>, vector<1x4x4x128xf32>,
    return
  }
  func.func @transform_0(%arg0: i32, %arg1: i32, %arg2: i32) -> (i32, i32, i32, i32, i32) {
    %c0_i32 = arith.constant 0 : i32
    %c0_i32_0 = arith.constant 0 : i32
    %c0_i32_1 = arith.constant 0 : i32
    %c0_i32_2 = arith.constant 0 : i32
    %c0_i32_3 = arith.constant 0 : i32
    return %arg0, %c0_i32, %c0_i32_0, %c0_i32_1, %c0_i32_2 : i32, i32, i32, i32, i32
  }
  func.func @transform_1(%arg0: i32, %arg1: i32, %arg2: i32) -> (i32, i32) {
    %c0_i32 = arith.constant 0 : i32
    %c0_i32_0 = arith.constant 0 : i32
    return %c0_i32, %arg1 : i32, i32
  }
  func.func @transform_2(%arg0: i32, %arg1: i32, %arg2: i32) -> (i32, i32, i32, i32) {
    %c0_i32 = arith.constant 0 : i32
    %c0_i32_0 = arith.constant 0 : i32
    return %arg0, %arg2, %c0_i32, %arg1 : i32, i32, i32, i32
  }
  func.func @transform_3(%arg0: i32, %arg1: i32, %arg2: i32) -> (i32, i32, i32) {
    %c0_i32 = arith.constant 0 : i32
    %c0_i32_0 = arith.constant 0 : i32
    return %arg0, %c0_i32, %arg1 : i32, i32, i32
  }
  func.func @transform_4(%arg0: i32, %arg1: i32, %arg2: i32) -> (i32, i32, i32) {
    %c0_i32 = arith.constant 0 : i32
    %c0_i32_0 = arith.constant 0 : i32
    return %arg0, %c0_i32, %arg1 : i32, i32, i32
  }
}

module attributes {stable_mosaic.version = 11 : i64} {
  func.func @_ws_kernel(%arg0: i32, %arg1: memref<32x128xf32, #tpu.memory_space<vmem>>, %arg2: memref<32x128xf32, #tpu.memory_space<vmem>>) attributes {dimension_semantics = [#tpu.dimension_semantics<parallel>], iteration_bounds = array<i64: 1>, scalar_prefetch = 0 : i64, scratch_operands = 0 : i64, tpu.core_type = #tpu.core_type<tc>, window_params = [{transform_indices = @transform_0, window_bounds = array<i64: 32, 128>}, {transform_indices = @transform_1, window_bounds = array<i64: 32, 128>}]} {
    %c0 = arith.constant 0 : index
    %c0_0 = arith.constant 0 : index
    %0 = vector.load %arg1[%c0, %c0_0] : memref<32x128xf32, #tpu.memory_space<vmem>>, vector<32x128xf32>
    %cst = arith.constant dense<0.000000e+00> : vector<128xf32>
    %1 = vector.multi_reduction <add>, %0, %cst [0] : vector<32x128xf32> to vector<128xf32>
    %2 = vector.shape_cast %1 : vector<128xf32> to vector<1x128xf32>
    %cst_1 = arith.constant 3.125000e-02 : f32
    %3 = vector.broadcast %cst_1 : f32 to vector<1x128xf32>
    %4 = arith.mulf %2, %3 : vector<1x128xf32>
    %5 = vector.broadcast %4 : vector<1x128xf32> to vector<32x128xf32>
    %6 = arith.subf %0, %5 : vector<32x128xf32>
    %7 = arith.mulf %6, %6 : vector<32x128xf32>
    %cst_2 = arith.constant dense<0.000000e+00> : vector<128xf32>
    %8 = vector.multi_reduction <add>, %7, %cst_2 [0] : vector<32x128xf32> to vector<128xf32>
    %9 = vector.shape_cast %8 : vector<128xf32> to vector<1x128xf32>
    %cst_3 = arith.constant 3.125000e-02 : f32
    %10 = vector.broadcast %cst_3 : f32 to vector<1x128xf32>
    %11 = arith.mulf %9, %10 : vector<1x128xf32>
    %cst_4 = arith.constant 1.000000e-10 : f32
    %12 = vector.broadcast %cst_4 : f32 to vector<1x128xf32>
    %13 = arith.addf %11, %12 : vector<1x128xf32>
    %14 = math.rsqrt %13 : vector<1x128xf32>
    %15 = vector.broadcast %14 : vector<1x128xf32> to vector<32x128xf32>
    %16 = arith.mulf %6, %15 : vector<32x128xf32>
    %c0_5 = arith.constant 0 : index
    %c0_6 = arith.constant 0 : index
    %17 = vector.load %arg2[%c0_5, %c0_6] : memref<32x128xf32, #tpu.memory_space<vmem>>, vector<32x128xf32>
    tpu.vector_store %arg2[%c0_5, %c0_6], %16 {strides = array<i32>} : memref<32x128xf32, #tpu.memory_space<vmem>>, vector<32x128xf32>,
    return
  }
  func.func @transform_0(%arg0: i32) -> (i32, i32) {
    %c0_i32 = arith.constant 0 : i32
    %c0_i32_0 = arith.constant 0 : i32
    return %c0_i32, %arg0 : i32, i32
  }
  func.func @transform_1(%arg0: i32) -> (i32, i32) {
    %c0_i32 = arith.constant 0 : i32
    %c0_i32_0 = arith.constant 0 : i32
    return %c0_i32, %arg0 : i32, i32
  }
}

module attributes {stable_mosaic.version = 11 : i64} {
  func.func @_conv1x1_gn_kernel(%arg0: i32, %arg1: i32, %arg2: i32, %arg3: memref<1x1x64xf32, #tpu.memory_space<vmem>>, %arg4: memref<1x1x64xf32, #tpu.memory_space<vmem>>, %arg5: memref<1x16x64xf32, #tpu.memory_space<vmem>>, %arg6: memref<64x128xf32, #tpu.memory_space<vmem>>, %arg7: memref<1x16x128xf32, #tpu.memory_space<vmem>>) attributes {dimension_semantics = [#tpu.dimension_semantics<parallel>, #tpu.dimension_semantics<parallel>, #tpu.dimension_semantics<arbitrary>], iteration_bounds = array<i64: 2, 1, 1>, scalar_prefetch = 0 : i64, scratch_operands = 0 : i64, tpu.core_type = #tpu.core_type<tc>, window_params = [{transform_indices = @transform_0, window_bounds = array<i64: 1, 1, 64>}, {transform_indices = @transform_1, window_bounds = array<i64: 1, 1, 64>}, {transform_indices = @transform_2, window_bounds = array<i64: 1, 16, 64>}, {transform_indices = @transform_3, window_bounds = array<i64: 64, 128>}, {transform_indices = @transform_4, window_bounds = array<i64: 1, 16, 128>}]} {
    %c0 = arith.constant 0 : index
    %c0_0 = arith.constant 0 : index
    %c0_1 = arith.constant 0 : index
    %0 = vector.load %arg5[%c0, %c0_0, %c0_1] : memref<1x16x64xf32, #tpu.memory_space<vmem>>, vector<1x16x64xf32>
    %1 = vector.shape_cast %0 : vector<1x16x64xf32> to vector<16x64xf32>
    %c0_2 = arith.constant 0 : index
    %c0_3 = arith.constant 0 : index
    %c0_4 = arith.constant 0 : index
    %2 = vector.load %arg3[%c0_2, %c0_3, %c0_4] : memref<1x1x64xf32, #tpu.memory_space<vmem>>, vector<1x1x64xf32>
    %3 = vector.shape_cast %2 : vector<1x1x64xf32> to vector<1x64xf32>
    %4 = vector.broadcast %3 : vector<1x64xf32> to vector<16x64xf32>
    %5 = arith.mulf %1, %4 : vector<16x64xf32>
    %c0_5 = arith.constant 0 : index
    %c0_6 = arith.constant 0 : index
    %c0_7 = arith.constant 0 : index
    %6 = vector.load %arg4[%c0_5, %c0_6, %c0_7] : memref<1x1x64xf32, #tpu.memory_space<vmem>>, vector<1x1x64xf32>
    %7 = vector.shape_cast %6 : vector<1x1x64xf32> to vector<1x64xf32>
    %8 = vector.broadcast %7 : vector<1x64xf32> to vector<16x64xf32>
    %9 = arith.addf %5, %8 : vector<16x64xf32>
    %cst = arith.constant 0.000000e+00 : f32
    %10 = vector.broadcast %cst : f32 to vector<16x64xf32>
    %11 = arith.maximumf %9, %10 : vector<16x64xf32>
    %c0_8 = arith.constant 0 : index
    %c0_9 = arith.constant 0 : index
    %12 = vector.load %arg6[%c0_8, %c0_9] : memref<64x128xf32, #tpu.memory_space<vmem>>, vector<64x128xf32>
    %cst_10 = arith.constant dense<0.000000e+00> : vector<16x128xf32>
    %13 = tpu.matmul %11, %12, %cst_10 {dimension_numbers = #tpu.dot_dimension_numbers<[1], [0], [0], [1], [0, 0, 1, 1], [], []>} : vector<16x64xf32>, vector<64x128xf32>, vector<16x128xf32> -> vector<16x128xf32>
    %c0_11 = arith.constant 0 : index
    %c0_12 = arith.constant 0 : index
    %c0_13 = arith.constant 0 : index
    %14 = vector.load %arg7[%c0_11, %c0_12, %c0_13] : memref<1x16x128xf32, #tpu.memory_space<vmem>>, vector<1x16x128xf32>
    %15 = vector.shape_cast %14 : vector<1x16x128xf32> to vector<16x128xf32>
    %16 = vector.shape_cast %13 : vector<16x128xf32> to vector<1x16x128xf32>
    tpu.vector_store %arg7[%c0_11, %c0_12, %c0_13], %16 {strides = array<i32>} : memref<1x16x128xf32, #tpu.memory_space<vmem>>, vector<1x16x128xf32>,
    return
  }
  func.func @transform_0(%arg0: i32, %arg1: i32, %arg2: i32) -> (i32, i32, i32) {
    %c0_i32 = arith.constant 0 : i32
    %c0_i32_0 = arith.constant 0 : i32
    %c0_i32_1 = arith.constant 0 : i32
    return %arg0, %c0_i32, %c0_i32_0 : i32, i32, i32
  }
  func.func @transform_1(%arg0: i32, %arg1: i32, %arg2: i32) -> (i32, i32, i32) {
    %c0_i32 = arith.constant 0 : i32
    %c0_i32_0 = arith.constant 0 : i32
    %c0_i32_1 = arith.constant 0 : i32
    return %arg0, %c0_i32, %c0_i32_0 : i32, i32, i32
  }
  func.func @transform_2(%arg0: i32, %arg1: i32, %arg2: i32) -> (i32, i32, i32) {
    %c0_i32 = arith.constant 0 : i32
    %c0_i32_0 = arith.constant 0 : i32
    return %arg0, %arg2, %c0_i32 : i32, i32, i32
  }
  func.func @transform_3(%arg0: i32, %arg1: i32, %arg2: i32) -> (i32, i32) {
    %c0_i32 = arith.constant 0 : i32
    %c0_i32_0 = arith.constant 0 : i32
    return %c0_i32, %arg1 : i32, i32
  }
  func.func @transform_4(%arg0: i32, %arg1: i32, %arg2: i32) -> (i32, i32, i32) {
    %c0_i32 = arith.constant 0 : i32
    return %arg0, %arg2, %arg1 : i32, i32, i32
  }
}

module attributes {stable_mosaic.version = 11 : i64} {
  func.func @_conv1x1_gn_kernel(%arg0: i32, %arg1: i32, %arg2: i32, %arg3: memref<1x1x128xf32, #tpu.memory_space<vmem>>, %arg4: memref<1x1x128xf32, #tpu.memory_space<vmem>>, %arg5: memref<1x16x128xf32, #tpu.memory_space<vmem>>, %arg6: memref<128x128xf32, #tpu.memory_space<vmem>>, %arg7: memref<1x16x128xf32, #tpu.memory_space<vmem>>, %arg8: memref<1x16x128xf32, #tpu.memory_space<vmem>>) attributes {dimension_semantics = [#tpu.dimension_semantics<parallel>, #tpu.dimension_semantics<parallel>, #tpu.dimension_semantics<arbitrary>], iteration_bounds = array<i64: 2, 1, 1>, scalar_prefetch = 0 : i64, scratch_operands = 0 : i64, tpu.core_type = #tpu.core_type<tc>, window_params = [{transform_indices = @transform_0, window_bounds = array<i64: 1, 1, 128>}, {transform_indices = @transform_1, window_bounds = array<i64: 1, 1, 128>}, {transform_indices = @transform_2, window_bounds = array<i64: 1, 16, 128>}, {transform_indices = @transform_3, window_bounds = array<i64: 128, 128>}, {transform_indices = @transform_4, window_bounds = array<i64: 1, 16, 128>}, {transform_indices = @transform_5, window_bounds = array<i64: 1, 16, 128>}]} {
    %c0 = arith.constant 0 : index
    %c0_0 = arith.constant 0 : index
    %c0_1 = arith.constant 0 : index
    %0 = vector.load %arg5[%c0, %c0_0, %c0_1] : memref<1x16x128xf32, #tpu.memory_space<vmem>>, vector<1x16x128xf32>
    %1 = vector.shape_cast %0 : vector<1x16x128xf32> to vector<16x128xf32>
    %c0_2 = arith.constant 0 : index
    %c0_3 = arith.constant 0 : index
    %c0_4 = arith.constant 0 : index
    %2 = vector.load %arg3[%c0_2, %c0_3, %c0_4] : memref<1x1x128xf32, #tpu.memory_space<vmem>>, vector<1x1x128xf32>
    %3 = vector.shape_cast %2 : vector<1x1x128xf32> to vector<1x128xf32>
    %4 = vector.broadcast %3 : vector<1x128xf32> to vector<16x128xf32>
    %5 = arith.mulf %1, %4 : vector<16x128xf32>
    %c0_5 = arith.constant 0 : index
    %c0_6 = arith.constant 0 : index
    %c0_7 = arith.constant 0 : index
    %6 = vector.load %arg4[%c0_5, %c0_6, %c0_7] : memref<1x1x128xf32, #tpu.memory_space<vmem>>, vector<1x1x128xf32>
    %7 = vector.shape_cast %6 : vector<1x1x128xf32> to vector<1x128xf32>
    %8 = vector.broadcast %7 : vector<1x128xf32> to vector<16x128xf32>
    %9 = arith.addf %5, %8 : vector<16x128xf32>
    %cst = arith.constant 0.000000e+00 : f32
    %10 = vector.broadcast %cst : f32 to vector<16x128xf32>
    %11 = arith.maximumf %9, %10 : vector<16x128xf32>
    %c0_8 = arith.constant 0 : index
    %c0_9 = arith.constant 0 : index
    %12 = vector.load %arg6[%c0_8, %c0_9] : memref<128x128xf32, #tpu.memory_space<vmem>>, vector<128x128xf32>
    %cst_10 = arith.constant dense<0.000000e+00> : vector<16x128xf32>
    %13 = tpu.matmul %11, %12, %cst_10 {dimension_numbers = #tpu.dot_dimension_numbers<[1], [0], [0], [1], [0, 0, 1, 1], [], []>} : vector<16x128xf32>, vector<128x128xf32>, vector<16x128xf32> -> vector<16x128xf32>
    %c0_11 = arith.constant 0 : index
    %c0_12 = arith.constant 0 : index
    %c0_13 = arith.constant 0 : index
    %14 = vector.load %arg7[%c0_11, %c0_12, %c0_13] : memref<1x16x128xf32, #tpu.memory_space<vmem>>, vector<1x16x128xf32>
    %15 = vector.shape_cast %14 : vector<1x16x128xf32> to vector<16x128xf32>
    %16 = arith.addf %13, %15 : vector<16x128xf32>
    %c0_14 = arith.constant 0 : index
    %c0_15 = arith.constant 0 : index
    %c0_16 = arith.constant 0 : index
    %17 = vector.load %arg8[%c0_14, %c0_15, %c0_16] : memref<1x16x128xf32, #tpu.memory_space<vmem>>, vector<1x16x128xf32>
    %18 = vector.shape_cast %17 : vector<1x16x128xf32> to vector<16x128xf32>
    %19 = vector.shape_cast %16 : vector<16x128xf32> to vector<1x16x128xf32>
    tpu.vector_store %arg8[%c0_14, %c0_15, %c0_16], %19 {strides = array<i32>} : memref<1x16x128xf32, #tpu.memory_space<vmem>>, vector<1x16x128xf32>,
    return
  }
  func.func @transform_0(%arg0: i32, %arg1: i32, %arg2: i32) -> (i32, i32, i32) {
    %c0_i32 = arith.constant 0 : i32
    %c0_i32_0 = arith.constant 0 : i32
    %c0_i32_1 = arith.constant 0 : i32
    return %arg0, %c0_i32, %c0_i32_0 : i32, i32, i32
  }
  func.func @transform_1(%arg0: i32, %arg1: i32, %arg2: i32) -> (i32, i32, i32) {
    %c0_i32 = arith.constant 0 : i32
    %c0_i32_0 = arith.constant 0 : i32
    %c0_i32_1 = arith.constant 0 : i32
    return %arg0, %c0_i32, %c0_i32_0 : i32, i32, i32
  }
  func.func @transform_2(%arg0: i32, %arg1: i32, %arg2: i32) -> (i32, i32, i32) {
    %c0_i32 = arith.constant 0 : i32
    %c0_i32_0 = arith.constant 0 : i32
    return %arg0, %arg2, %c0_i32 : i32, i32, i32
  }
  func.func @transform_3(%arg0: i32, %arg1: i32, %arg2: i32) -> (i32, i32) {
    %c0_i32 = arith.constant 0 : i32
    %c0_i32_0 = arith.constant 0 : i32
    return %c0_i32, %arg1 : i32, i32
  }
  func.func @transform_4(%arg0: i32, %arg1: i32, %arg2: i32) -> (i32, i32, i32) {
    %c0_i32 = arith.constant 0 : i32
    return %arg0, %arg2, %arg1 : i32, i32, i32
  }
  func.func @transform_5(%arg0: i32, %arg1: i32, %arg2: i32) -> (i32, i32, i32) {
    %c0_i32 = arith.constant 0 : i32
    return %arg0, %arg2, %arg1 : i32, i32, i32
  }
}

</mosaic_0001>

<bundles_post_ra>
// kernel: squeeze.6
= control target key start
LH: loop header
LB: loop body
LE: loop exit
PB: predicated region body
PF: predicated region fallthrough
CT: control target
= control target key end

     0   :  { %s354_s8 = smov 122   ;;  %s355_s9 = smov 124   ;;  %vm7_vm0 = vcmask 15360   ;;  %s653_s0 = inlined_call_operand.vmem [shape: f32[2,64], index: 0, kind: input, shape index: {}]   ;;  %s654_s1 = inlined_call_operand.vmem [shape: f32[2,32,2], index: 1, kind: output, shape index: {}]  }
   0x1   :  { %v4_v0 = vld [vmem:[%s653_s0] sm:$0x3]  ;;  %s353_s0 = smov 126   ;;  %s356_s10 = smov 120  }
   0x2   :  { %5 = vst [vmem:[#allocation0] sm:$0x3] %v4_v0  ;;  %s357_s11 = smov 118   ;;  %s358_s12 = smov 116  }
   0x3   :  { %s359_s13 = smov 114   ;;  %s360_s14 = smov 112  }
   0x4   :  { %s361_s15 = smov 110   ;;  %s362_s16 = smov 108  }
   0x5   :  { %s363_s17 = smov 106   ;;  %s364_s18 = smov 104  }
   0x6   :  { %s365_s19 = smov 102   ;;  %s366_s20 = smov 100  }
   0x7   :  { %s367_s21 = smov 98   ;;  %s368_s22 = smov 96  }
   0x8   :  { %s369_s23 = smov 94   ;;  %s370_s24 = smov 92  }
   0x9   :  { %v11_v1 = vld [vmem:[#allocation0] sm:$0x3]   ;;  %s371_s25 = smov 90   ;;  %s372_s26 = smov 88  }
   0xa   :  { %v27_v2 = vld [vmem:[#allocation0] sm:$0x3]   ;;  %12 = vrot.lane.b32.xlu0 %v11_v1, %s353_s0  ;;  %s373_s27 = smov 86   ;;  %s374_s28 = smov 84  }
   0xb   :  { %28 = vrot.lane.b32.xlu1 %v27_v2, %s354_s8  ;;  %v19_v3 = vld [vmem:[#allocation0] sm:$0x3]   ;;  %s375_s29 = smov 82   ;;  %s376_s30 = smov 80  }
   0xc   :  { %v35_v4 = vld [vmem:[#allocation0] sm:$0x3]   ;;  %s377_s6 = smov 78   ;;  %s378_s7 = smov 76  }
   0xd   :  { %v43_v5 = vld [vmem:[#allocation0] sm:$0x3]   ;;  %s379_s0 = smov 74   ;;  %s380_s8 = smov 72  }
   0xe   :  { %20 = vrot.lane.b32.xlu0 %v19_v3, %s355_s9  ;;  %v51_v6 = vld [vmem:[#allocation0] sm:$0x3]   ;;  %s381_s9 = smov 70  }
   0xf   :  { %36 = vrot.lane.b32.xlu1 %v35_v4, %s356_s10  ;;  %v59_v7 = vld [vmem:[#allocation0] sm:$0x3]   ;;  %s382_s10 = smov 68  }
  0x10   :  { %v67_v8 = vld [vmem:[#allocation0] sm:$0x3]  }
  0x11   :  { %v75_v9 = vld [vmem:[#allocation0] sm:$0x3]  }
  0x12   :  { %44 = vrot.lane.b32.xlu0 %v43_v5, %s357_s11  ;;  %v83_v10 = vld [vmem:[#allocation0] sm:$0x3]   ;;  %s383_s11 = smov 66  }
  0x13   :  { %52 = vrot.lane.b32.xlu1 %v51_v6, %s358_s12  ;;  %v91_v11 = vld [vmem:[#allocation0] sm:$0x3]  }
  0x14   :  { %v99_v12 = vld [vmem:[#allocation0] sm:$0x3]  }
  0x15   :  { %v107_v13 = vld [vmem:[#allocation0] sm:$0x3]  }
  0x16   :  { %60 = vrot.lane.b32.xlu0 %v59_v7, %s359_s13  ;;  %v115_v14 = vld [vmem:[#allocation0] sm:$0x3]  }
  0x17   :  { %68 = vrot.lane.b32.xlu1 %v67_v8, %s360_s14  ;;  %v123_v15 = vld [vmem:[#allocation0] sm:$0x3]  }
  0x18   :  { %v131_v16 = vld [vmem:[#allocation0] sm:$0x3]  }
  0x19   :  { %v139_v17 = vld [vmem:[#allocation0] sm:$0x3]  }
  0x1a   :  { %76 = vrot.lane.b32.xlu0 %v75_v9, %s361_s15  ;;  %v147_v18 = vld [vmem:[#allocation0] sm:$0x3]  }
  0x1b   :  { %84 = vrot.lane.b32.xlu1 %v83_v10, %s362_s16  ;;  %v155_v19 = vld [vmem:[#allocation0] sm:$0x3]  }
  0x1c   :  { %v163_v20 = vld [vmem:[#allocation0] sm:$0x3]  }
  0x1d   :  { %v171_v21 = vld [vmem:[#allocation0] sm:$0x3]  }
  0x1e   :  { %92 = vrot.lane.b32.xlu0 %v91_v11, %s363_s17  ;;  %v179_v22 = vld [vmem:[#allocation0] sm:$0x3]  }
  0x1f   :  { %100 = vrot.lane.b32.xlu1 %v99_v12, %s364_s18  ;;  %v187_v23 = vld [vmem:[#allocation0] sm:$0x3]  }
  0x20   :  { %v195_v24 = vld [vmem:[#allocation0] sm:$0x3]  }
  0x21   :  { %v203_v25 = vld [vmem:[#allocation0] sm:$0x3]  }
  0x22   :  { %108 = vrot.lane.b32.xlu0 %v107_v13, %s365_s19  ;;  %v211_v26 = vld [vmem:[#allocation0] sm:$0x3]  }
  0x23   :  { %116 = vrot.lane.b32.xlu1 %v115_v14, %s366_s20  ;;  %v6_v27 = vld [vmem:[#allocation0] sm:$0x3]  }
  0x24   :  { %8 = vst.msk [vmem:[%s654_s1] sm:$0x1] %vm7_vm0, %v6_v27   ;;  %259 = vst.msk [vmem:[%s654_s1 + $0x1f] sm:$0x2] %vm7_vm0, %v6_v27   ;;  %v219_v28 = vld [vmem:[#allocation0] sm:$0x3]  }
  0x25   :  { %v227_v29 = vld [vmem:[#allocation0] sm:$0x3]  }
  0x26   :  { %124 = vrot.lane.b32.xlu0 %v123_v15, %s367_s21  ;;  %v235_v30 = vld [vmem:[#allocation0] sm:$0x3]  }
  0x27   :  { %132 = vrot.lane.b32.xlu1 %v131_v16, %s368_s22  ;;  %v243_v31 = vld [vmem:[#allocation0] sm:$0x3]  }
  0x28   :  { %v251_v32 = vld [vmem:[#allocation0] sm:$0x3]  }
  0x2a   :  { %140 = vrot.lane.b32.xlu0 %v139_v17, %s369_s23 }
  0x2b   :  { %148 = vrot.lane.b32.xlu1 %v147_v18, %s370_s24 }
  0x2e   :  { %156 = vrot.lane.b32.xlu0 %v155_v19, %s371_s25 }
  0x2f   :  { %164 = vrot.lane.b32.xlu1 %v163_v20, %s372_s26 }
  0x32   :  { %172 = vrot.lane.b32.xlu0 %v171_v21, %s373_s27 }
  0x33   :  { %180 = vrot.lane.b32.xlu1 %v179_v22, %s374_s28 }
  0x36   :  { %188 = vrot.lane.b32.xlu0 %v187_v23, %s375_s29 }
  0x37   :  { %196 = vrot.lane.b32.xlu1 %v195_v24, %s376_s30 }
  0x3a   :  { %204 = vrot.lane.b32.xlu0 %v203_v25, %s377_s6 }
  0x3b   :  { %212 = vrot.lane.b32.xlu1 %v211_v26, %s378_s7 }
  0x3e   :  { %220 = vrot.lane.b32.xlu0 %v219_v28, %s379_s0 }
  0x3f   :  { %228 = vrot.lane.b32.xlu1 %v227_v29, %s380_s8 }
  0x42   :  { %236 = vrot.lane.b32.xlu0 %v235_v30, %s381_s9 }
  0x43   :  { %244 = vrot.lane.b32.xlu1 %v243_v31, %s382_s10 }
  0x46   :  { %252 = vrot.lane.b32.xlu0 %v251_v32, %s383_s11 }
  0x7c   :  { %v13_v33 = vpop.permute.xlu0 %12  }
  0x7d   :  { %v29_v34 = vpop.permute.xlu1 %28   ;;  %260 = vst.msk [vmem:[%s654_s1 + $0x1] sm:$0x1] %vm7_vm0, %v13_v33   ;;  %261 = vst.msk [vmem:[%s654_s1 + $0x20] sm:$0x2] %vm7_vm0, %v13_v33  }
  0x7e   :  { %264 = vst.msk [vmem:[%s654_s1 + $0x3] sm:$0x1] %vm7_vm0, %v29_v34   ;;  %265 = vst.msk [vmem:[%s654_s1 + $0x22] sm:$0x2] %vm7_vm0, %v29_v34  }
  0x80   :  { %v21_v35 = vpop.permute.xlu0 %20  }
  0x81   :  { %v37_v36 = vpop.permute.xlu1 %36   ;;  %262 = vst.msk [vmem:[%s654_s1 + $0x2] sm:$0x1] %vm7_vm0, %v21_v35   ;;  %263 = vst.msk [vmem:[%s654_s1 + $0x21] sm:$0x2] %vm7_vm0, %v21_v35  }
  0x82   :  { %266 = vst.msk [vmem:[%s654_s1 + $0x4] sm:$0x1] %vm7_vm0, %v37_v36   ;;  %267 = vst.msk [vmem:[%s654_s1 + $0x23] sm:$0x2] %vm7_vm0, %v37_v36  }
  0x84   :  { %v45_v37 = vpop.permute.xlu0 %44  }
  0x85   :  { %v53_v38 = vpop.permute.xlu1 %52   ;;  %268 = vst.msk [vmem:[%s654_s1 + $0x5] sm:$0x1] %vm7_vm0, %v45_v37   ;;  %269 = vst.msk [vmem:[%s654_s1 + $0x24] sm:$0x2] %vm7_vm0, %v45_v37  }
  0x86   :  { %270 = vst.msk [vmem:[%s654_s1 + $0x6] sm:$0x1] %vm7_vm0, %v53_v38   ;;  %271 = vst.msk [vmem:[%s654_s1 + $0x25] sm:$0x2] %vm7_vm0, %v53_v38  }
  0x88   :  { %v61_v39 = vpop.permute.xlu0 %60  }
  0x89   :  { %v69_v40 = vpop.permute.xlu1 %68   ;;  %272 = vst.msk [vmem:[%s654_s1 + $0x7] sm:$0x1] %vm7_vm0, %v61_v39   ;;  %273 = vst.msk [vmem:[%s654_s1 + $0x26] sm:$0x2] %vm7_vm0, %v61_v39  }
  0x8a   :  { %274 = vst.msk [vmem:[%s654_s1 + $0x8] sm:$0x1] %vm7_vm0, %v69_v40   ;;  %275 = vst.msk [vmem:[%s654_s1 + $0x27] sm:$0x2] %vm7_vm0, %v69_v40  }
  0x8c   :  { %v77_v41 = vpop.permute.xlu0 %76  }
  0x8d   :  { %v85_v42 = vpop.permute.xlu1 %84   ;;  %276 = vst.msk [vmem:[%s654_s1 + $0x9] sm:$0x1] %vm7_vm0, %v77_v41   ;;  %277 = vst.msk [vmem:[%s654_s1 + $0x28] sm:$0x2] %vm7_vm0, %v77_v41  }
  0x8e   :  { %278 = vst.msk [vmem:[%s654_s1 + $0xa] sm:$0x1] %vm7_vm0, %v85_v42   ;;  %279 = vst.msk [vmem:[%s654_s1 + $0x29] sm:$0x2] %vm7_vm0, %v85_v42  }
  0x90   :  { %v93_v43 = vpop.permute.xlu0 %92  }
  0x91   :  { %v101_v44 = vpop.permute.xlu1 %100   ;;  %280 = vst.msk [vmem:[%s654_s1 + $0xb] sm:$0x1] %vm7_vm0, %v93_v43   ;;  %281 = vst.msk [vmem:[%s654_s1 + $0x2a] sm:$0x2] %vm7_vm0, %v93_v43  }
  0x92   :  { %282 = vst.msk [vmem:[%s654_s1 + $0xc] sm:$0x1] %vm7_vm0, %v101_v44   ;;  %283 = vst.msk [vmem:[%s654_s1 + $0x2b] sm:$0x2] %vm7_vm0, %v101_v44  }
  0x94   :  { %v109_v45 = vpop.permute.xlu0 %108  }
  0x95   :  { %v117_v46 = vpop.permute.xlu1 %116   ;;  %284 = vst.msk [vmem:[%s654_s1 + $0xd] sm:$0x1] %vm7_vm0, %v109_v45   ;;  %285 = vst.msk [vmem:[%s654_s1 + $0x2c] sm:$0x2] %vm7_vm0, %v109_v45  }
  0x96   :  { %286 = vst.msk [vmem:[%s654_s1 + $0xe] sm:$0x1] %vm7_vm0, %v117_v46   ;;  %287 = vst.msk [vmem:[%s654_s1 + $0x2d] sm:$0x2] %vm7_vm0, %v117_v46  }
  0x98   :  { %v125_v47 = vpop.permute.xlu0 %124  }
  0x99   :  { %v133_v48 = vpop.permute.xlu1 %132   ;;  %288 = vst.msk [vmem:[%s654_s1 + $0xf] sm:$0x1] %vm7_vm0, %v125_v47   ;;  %289 = vst.msk [vmem:[%s654_s1 + $0x2e] sm:$0x2] %vm7_vm0, %v125_v47  }
  0x9a   :  { %290 = vst.msk [vmem:[%s654_s1 + $0x10] sm:$0x1] %vm7_vm0, %v133_v48   ;;  %291 = vst.msk [vmem:[%s654_s1 + $0x2f] sm:$0x2] %vm7_vm0, %v133_v48  }
  0x9c   :  { %v141_v49 = vpop.permute.xlu0 %140  }
  0x9d   :  { %v149_v50 = vpop.permute.xlu1 %148   ;;  %292 = vst.msk [vmem:[%s654_s1 + $0x11] sm:$0x1] %vm7_vm0, %v141_v49   ;;  %293 = vst.msk [vmem:[%s654_s1 + $0x30] sm:$0x2] %vm7_vm0, %v141_v49  }
  0x9e   :  { %294 = vst.msk [vmem:[%s654_s1 + $0x12] sm:$0x1] %vm7_vm0, %v149_v50   ;;  %295 = vst.msk [vmem:[%s654_s1 + $0x31] sm:$0x2] %vm7_vm0, %v149_v50  }
  0xa0   :  { %v157_v51 = vpop.permute.xlu0 %156  }
  0xa1   :  { %v165_v52 = vpop.permute.xlu1 %164   ;;  %296 = vst.msk [vmem:[%s654_s1 + $0x13] sm:$0x1] %vm7_vm0, %v157_v51   ;;  %297 = vst.msk [vmem:[%s654_s1 + $0x32] sm:$0x2] %vm7_vm0, %v157_v51  }
  0xa2   :  { %298 = vst.msk [vmem:[%s654_s1 + $0x14] sm:$0x1] %vm7_vm0, %v165_v52   ;;  %299 = vst.msk [vmem:[%s654_s1 + $0x33] sm:$0x2] %vm7_vm0, %v165_v52  }
  0xa4   :  { %v173_v53 = vpop.permute.xlu0 %172  }
  0xa5   :  { %v181_v54 = vpop.permute.xlu1 %180   ;;  %300 = vst.msk [vmem:[%s654_s1 + $0x15] sm:$0x1] %vm7_vm0, %v173_v53   ;;  %301 = vst.msk [vmem:[%s654_s1 + $0x34] sm:$0x2] %vm7_vm0, %v173_v53  }
  0xa6   :  { %302 = vst.msk [vmem:[%s654_s1 + $0x16] sm:$0x1] %vm7_vm0, %v181_v54   ;;  %303 = vst.msk [vmem:[%s654_s1 + $0x35] sm:$0x2] %vm7_vm0, %v181_v54  }
  0xa8   :  { %v189_v55 = vpop.permute.xlu0 %188  }
  0xa9   :  { %v197_v56 = vpop.permute.xlu1 %196   ;;  %304 = vst.msk [vmem:[%s654_s1 + $0x17] sm:$0x1] %vm7_vm0, %v189_v55   ;;  %305 = vst.msk [vmem:[%s654_s1 + $0x36] sm:$0x2] %vm7_vm0, %v189_v55  }
  0xaa   :  { %306 = vst.msk [vmem:[%s654_s1 + $0x18] sm:$0x1] %vm7_vm0, %v197_v56   ;;  %307 = vst.msk [vmem:[%s654_s1 + $0x37] sm:$0x2] %vm7_vm0, %v197_v56  }
  0xac   :  { %v205_v57 = vpop.permute.xlu0 %204  }
  0xad   :  { %v213_v58 = vpop.permute.xlu1 %212   ;;  %308 = vst.msk [vmem:[%s654_s1 + $0x19] sm:$0x1] %vm7_vm0, %v205_v57   ;;  %309 = vst.msk [vmem:[%s654_s1 + $0x38] sm:$0x2] %vm7_vm0, %v205_v57  }
  0xae   :  { %310 = vst.msk [vmem:[%s654_s1 + $0x1a] sm:$0x1] %vm7_vm0, %v213_v58   ;;  %311 = vst.msk [vmem:[%s654_s1 + $0x39] sm:$0x2] %vm7_vm0, %v213_v58  }
  0xb0   :  { %v221_v59 = vpop.permute.xlu0 %220  }
  0xb1   :  { %v229_v60 = vpop.permute.xlu1 %228   ;;  %312 = vst.msk [vmem:[%s654_s1 + $0x1b] sm:$0x1] %vm7_vm0, %v221_v59   ;;  %313 = vst.msk [vmem:[%s654_s1 + $0x3a] sm:$0x2] %vm7_vm0, %v221_v59  }
  0xb2   :  { %314 = vst.msk [vmem:[%s654_s1 + $0x1c] sm:$0x1] %vm7_vm0, %v229_v60   ;;  %315 = vst.msk [vmem:[%s654_s1 + $0x3b] sm:$0x2] %vm7_vm0, %v229_v60  }
  0xb4   :  { %v237_v61 = vpop.permute.xlu0 %236  }
  0xb5   :  { %v245_v62 = vpop.permute.xlu1 %244   ;;  %316 = vst.msk [vmem:[%s654_s1 + $0x1d] sm:$0x1] %vm7_vm0, %v237_v61   ;;  %317 = vst.msk [vmem:[%s654_s1 + $0x3c] sm:$0x2] %vm7_vm0, %v237_v61  }
  0xb6   :  { %318 = vst.msk [vmem:[%s654_s1 + $0x1e] sm:$0x1] %vm7_vm0, %v245_v62   ;;  %319 = vst.msk [vmem:[%s654_s1 + $0x3d] sm:$0x2] %vm7_vm0, %v245_v62  }
  0xb8   :  { %v253_v63 = vpop.permute.xlu0 %252  }
  0xb9   :  { %320 = vst.msk [vmem:[%s654_s1 + $0x1f] sm:$0x1] %vm7_vm0, %v253_v63   ;;  %321 = vst.msk [vmem:[%s654_s1 + $0x3e] sm:$0x2] %vm7_vm0, %v253_v63  }

// kernel: preact_bottleneck_forward.13
= control target key start
LH: loop header
LB: loop body
LE: loop exit
PB: predicated region body
PF: predicated region fallthrough
CT: control target
= control target key end

     0   :  { %8 = vsyncpa [#allocation3], 0  ;;  %s692_s0 = inlined_call_operand.hbm [shape: f32[2,64,64], index: 0, kind: input, shape index: {}]   ;;  %s693_s1 = inlined_call_operand.vmem [shape: f32[2,1,64], index: 1, kind: output, shape index: {0}]   ;;  %s694_s2 = inlined_call_operand.vmem [shape: f32[2,1,64], index: 2, kind: output, shape index: {1}]  }
   0x1   :  { %10 = vsyncpa [#allocation3 + $0x1], 0  ;;  %s525_s9 = smov 0   ;;  %s527_s10 = smov 0  }
   0x2   :  { %s529_s11 = smov 0   ;;  %s531_s12 = smov 0  }
   0x3   :  { %s533_s13 = smov 0   ;;  %s535_s14 = smov 0  }
   0x4 LB: > { %s354_s15 = sadd.s32 4294967295, %s504_s14   ;;  %s28_s16 = sadd.s32 1, %s500_s13  ;;  %s504_s14 = sphi %s535_s14, %s16_s14   ;;  %s500_s13 = sphi %s533_s13, %s702_s13   ;;  %s496_s12 = sphi %s531_s12, %s701_s12   ;;  %s492_s11 = sphi %s529_s11, %s700_s11   ;;  %s488_s10 = sphi %s527_s10, %s699_s10   ;;  %s484_s9 = sphi %s525_s9, %s698_s9  }
   0x5   : > { %p30_p0 = scmp.ge.s32.totalorder %s28_s16, 2  ;;  %s37_s17 = sadd.s32 1, %s492_s11 }
   0x6   : > { %p44_p1 = scmp.ne.s32.totalorder %s492_s11, %s488_s10  ;;  %p45_p2 = scmp.eq.s32.totalorder %s504_s14, 0 }
   0x7   : > { %s704_s16 = smov (%p30_p0, %s28_s16), 0  ;;  %p50_p4 = scmp.ne.s32.totalorder %s488_s10, %s484_s9 }
   0x8   : > { %p561_p3 = por %p45_p2, %p44_p1  ;;  %s32_s19 = ssub.s32 %s500_s13, %s704_s16 }
   0x9   : > { %p51_p5 = scmp.eq.s32.totalorder %s354_s15, 0  ;;  %p35_p6 = scmp.eq.s32.totalorder %s32_s19, 0 }
   0xa   : > { %p372_p8 = scmp.lt.s32.totalorder %s504_s14, 2  ;;  %s126_s22 = sand.u32 1, %s492_s11  }
   0xb   : > { %p568_p7 = por %p51_p5, %p50_p4  ;;  %s365_s23 = sshll.u32 %s500_s13, 10 }
   0xc   : > { %s574_s21 = scalar_select %p35_p6, %s492_s11, %s37_s17  }
   0xd   : > { %s358_s24 = sshll.u32 %s126_s22, 6  ;;  %s581_s27 = scalar_lea.hbm %s692_s0, %s365_s23 }
   0xe   : > { %s130_s28 = scalar_lea.vmem [#allocation2], %s358_s24  ;;  %p585_p9 = pnand %p372_p8, %p561_p3 }
   0xf   : > { %s139_s29 = sshll.u32 %s130_s28, 4  ;;  %s591_s3 = scalar_lea.sflag [#allocation3], %s126_s22  ;;  %s589_s29 = int_to_ptr.vmem [resolvable:$true] %s139_s29 }
  0x10   : > { %s424_s4 = scalar_lea.hbm %s581_s27, 1024  ;;  %p426_p11 = pneg %p585_p9 }
  0x11   : > { %p425_p10 = scmp.ne.s32.totalorder %s581_s27, %s424_s4  ;;  %s429_s7 = scalar_lea.hbm %s692_s0, 2048 }
  0x12   : > { %p430_p0 = scmp.lt.u32.totalorder %s581_s27, %s692_s0  ;;  %p431_p1 = scmp.lt.u32.totalorder %s429_s7, %s424_s4 }
  0x13   : > { %p427_p12 = pnand %p426_p11, %p425_p10  ;;  %p433_p3 = scmp.lt.u32.totalorder %s424_s4, %s581_s27 }
  0x14   : > { %p432_p2 = por %p431_p1, %p430_p0 }
  0x15   : > { %p428_p13 = pneg %p427_p12 }
  0x16   : > { %p434_p4 = por %p433_p3, %p432_p2 }
  0x18   : > { %p435_p5 = pnand %p434_p4, %p428_p13 }
  0x1a   : > { %438 = shalt.err (!%p435_p5)
}
  0x1b   : > { %s439_s15 = scalar_lea.vmem %s589_s29, 1024  ;;  %s506_s17 = smov [#allocation2]  }
  0x1c   : > { %p440_p6 = scmp.ne.s32.totalorder %s589_s29, %s439_s15  ;;  %s444_s18 = sshll.u32 %s506_s17, 4  ;;  %s445_s18 = int_to_ptr.vmem [resolvable:$false] %s444_s18 }
  0x1d   : > { %s446_s19 = scalar_lea.vmem %s445_s18, 2048  ;;  %p447_p12 = scmp.lt.s32.totalorder %s589_s29, %s445_s18 }
  0x1e   : > { %p442_p8 = pnand %p440_p6, %p426_p11  ;;  %p448_p0 = scmp.lt.s32.totalorder %s446_s19, %s439_s15 }
  0x20   : > { %p443_p10 = pneg %p442_p8  ;;  %p449_p1 = por %p448_p0, %p447_p12 }
  0x22   : > { %p450_p2 = pnand %p449_p1, %p443_p10 }
  0x24   : > { %453 = shalt.err (!%p450_p2)
}
  0x25   : > { %s507_s22 = smov 128   ;;  %s508_s23 = smov 8  }
  0x26   : > { %371 = dma.hbm_to_vmem [thread:$0]  (!%p585_p9), %s581_s27, 1024, %s589_s29, %s591_s3, %s507_s22, %s507_s22, %s508_s23  }
  0x27   : > { %p361_p11 = scmp.ge.s32.totalorder %s504_s14, 1  ;;  %p147_p13 = scmp.lt.s32.totalorder %s504_s14, 3 }
  0x29   : > { %p148_p3 = pnand %p361_p11, %p147_p13 }
  0x2a   : > { %s153_s24 = sand.u32 (!%p148_p3), 1, %s488_s10  }
  0x2b   : > { %151 = sbr.rel (%p148_p3) target bundleno = 85 (0x55), region = 24  ;;  %s362_s25 = sshll.u32 (!%p148_p3), %s153_s24, 6 }
  0x2c   : > { %s154_s26 = scalar_lea.sflag (!%p148_p3), [#allocation3], %s153_s24  ;;  %s622_s28 = scalar_lea.vmem (!%p148_p3), [#allocation2], %s362_s25 }
  0x32   : > { %479 = dma.done.wait (%p568_p7), %s154_s26, 1024  }
  0x33   : > { %481 = vsyncadd (%p568_p7), %s154_s26, 4294966272  ;;  %p180_p9 = scmp.lt.s32.totalorder %s496_s12, 1  ;;  %vm190_vm0 = vcmask 516096   ;;  %v509_v0 = vmov 0.0   ;;  %vm202_vm1 = vcmask 523264   ;;  %v193_v1 = vld [vmem:[%s622_s28] sm:$0xff] }
  0x34   : > { %v194_v2 = vld [vmem:[%s622_s28 + $0x8] sm:$0xff]  ;;  %v195_v3 = vld [vmem:[%s622_s28 + $0x10] sm:$0xff]  ;;  %v196_v4 = vld [vmem:[%s622_s28 + $0x18] sm:$0xff]  ;;  %v203_v5 = vsel %vm202_vm1, %v193_v1, 0.0  ;;  %v228_v8 = vmul.f32 %v193_v1, %v193_v1 }
  0x35   : > { %s706_s12 = smov (!%p180_p9, %s496_s12), 1  ;;  %v204_v6 = vsel %vm202_vm1, %v194_v2, 0.0  ;;  %v206_v7 = vsel %vm202_vm1, %v195_v3, 0.0  ;;  %v197_v9 = vld [vmem:[%s622_s28 + $0x20] sm:$0xff]  ;;  %v208_v11 = vsel %vm202_vm1, %v196_v4, 0.0  ;;  %v229_v12 = vmul.f32 %v194_v2, %v194_v2  ;;  %v198_v14 = vld [vmem:[%s622_s28 + $0x28] sm:$0xff] }
  0x36   : > { %s633_s30 = scalar_lea.vmem %s693_s1, %s706_s12  ;;  %s638_s20 = scalar_lea.vmem %s694_s2, %s706_s12  ;;  %v205_v10 = vadd.f32 %v204_v6, %v203_v5  ;;  %v230_v13 = vmul.f32 %v195_v3, %v195_v3  ;;  %v231_v16 = vmul.f32 %v196_v4, %v196_v4  ;;  %v210_v17 = vsel %vm202_vm1, %v197_v9, 0.0  ;;  %v199_v21 = vld [vmem:[%s622_s28 + $0x30] sm:$0xff]  ;;  %v200_v28 = vld [vmem:[%s622_s28 + $0x38] sm:$0xff] }
  0x37   : > { %191 = vst.msk [vmem:[%s633_s30] sm:$0x1] %vm190_vm0, %v509_v0  ;;  %192 = vst.msk [vmem:[%s638_s20] sm:$0x1] %vm190_vm0, %v509_v0  ;;  %v232_v18 = vmul.f32 %v197_v9, %v197_v9  ;;  %v236_v19 = vsel %vm202_vm1, %v228_v8, 0.0  ;;  %v237_v20 = vsel %vm202_vm1, %v229_v12, 0.0  ;;  %v233_v26 = vmul.f32 %v198_v14, %v198_v14 }
  0x38   : > { %v207_v15 = vadd.f32 %v206_v7, %v205_v10  ;;  %v238_v23 = vadd.f32 %v237_v20, %v236_v19  ;;  %v239_v24 = vsel %vm202_vm1, %v230_v13, 0.0  ;;  %v212_v25 = vsel %vm202_vm1, %v198_v14, 0.0 }
  0x39   : > { %v241_v27 = vsel %vm202_vm1, %v231_v16, 0.0  ;;  %v214_v31 = vsel %vm202_vm1, %v199_v21, 0.0  ;;  %v234_v32 = vmul.f32 %v199_v21, %v199_v21  ;;  %v243_v33 = vsel %vm202_vm1, %v232_v18, 0.0 }
  0x3a   : > { %v209_v22 = vadd.f32 %v208_v11, %v207_v15  ;;  %v240_v30 = vadd.f32 %v239_v24, %v238_v23  ;;  %v216_v36 = vsel %vm202_vm1, %v200_v28, 0.0  ;;  %v235_v37 = vmul.f32 %v200_v28, %v200_v28 }
  0x3b   : > { %v245_v38 = vsel %vm202_vm1, %v233_v26, 0.0  ;;  %v247_v41 = vsel %vm202_vm1, %v234_v32, 0.0 }
  0x3c   : > { %v211_v29 = vadd.f32 %v210_v17, %v209_v22  ;;  %v242_v35 = vadd.f32 %v241_v27, %v240_v30  ;;  %v249_v44 = vsel %vm202_vm1, %v235_v37, 0.0 }
  0x3e   : > { %v213_v34 = vadd.f32 %v212_v25, %v211_v29  ;;  %v244_v40 = vadd.f32 %v243_v33, %v242_v35  ;;  %v201_v55 = vld [vmem:[%s633_s30] sm:$0x1] }
  0x3f   : > { %v227_v60 = vld [vmem:[%s638_s20] sm:$0x1] }
  0x40   : > { %v215_v39 = vadd.f32 %v214_v31, %v213_v34  ;;  %v246_v43 = vadd.f32 %v245_v38, %v244_v40 }
  0x42   : > { %v217_v42 = vadd.f32 %v216_v36, %v215_v39  ;;  %v248_v46 = vadd.f32 %v247_v41, %v246_v43 }
  0x44   : > { %v218_v45 = vrot.slane %v217_v42, 4  ;;  %v250_v48 = vadd.f32 %v249_v44, %v248_v46 }
  0x46   : > { %v219_v47 = vadd.f32 %v218_v45, %v217_v42  ;;  %v251_v50 = vrot.slane %v250_v48, 4 }
  0x48   : > { %v220_v49 = vrot.slane %v219_v47, 2  ;;  %v252_v52 = vadd.f32 %v251_v50, %v250_v48 }
  0x4a   : > { %v221_v51 = vadd.f32 %v220_v49, %v219_v47  ;;  %v253_v54 = vrot.slane %v252_v52, 2 }
  0x4c   : > { %v222_v53 = vrot.slane %v221_v51, 1  ;;  %v254_v57 = vadd.f32 %v253_v54, %v252_v52 }
  0x4e   : > { %v223_v56 = vadd.f32 %v222_v53, %v221_v51  ;;  %v255_v59 = vrot.slane %v254_v57, 1 }
  0x50   : > { %v224_v58 = vadd.f32 %v223_v56, %v201_v55  ;;  %v256_v61 = vadd.f32 %v255_v59, %v254_v57 }
  0x52   : > { %226 = vst.msk [vmem:[%s633_s30] sm:$0x1] %vm190_vm0, %v224_v58  ;;  %v257_v62 = vadd.f32 %v256_v61, %v227_v60 }
  0x54   : > { %258 = vst.msk [vmem:[%s638_s20] sm:$0x1] %vm190_vm0, %v257_v62 }
  0x55 PF: > { %s16_s14 = sadd.s32 1, %s504_s14   ;;  %s698_s9 = smov %s488_s10 }
  0x56   : > { %p13_p7 = scmp.ge.s32.totalorder %s16_s14, 4   ;;  %s699_s10 = smov %s492_s11 }
  0x57   : > { %s700_s11 = smov %s574_s21  ;;  %s701_s12 = smov %s500_s13 }
  0x58   : > { %s702_s13 = smov %s704_s16  ;;  %15 = sbr.rel (!%p13_p7) target bundleno = 4 (0x4), region = 80 }
  0x5f   :  { %288 = vsyncpa [#allocation3], 1 }
  0x60   :  { %290 = vsyncpa [#allocation3 + $0x1], 1 }

// kernel: preact_bottleneck_forward.9
= control target key start
LH: loop header
LB: loop body
LE: loop exit
PB: predicated region body
PF: predicated region fallthrough
CT: control target
= control target key end

     0   :  { %s142_s0 = inlined_call_operand.vmem [shape: f32[64,128], index: 0, kind: input, shape index: {}]   ;;  %s143_s1 = inlined_call_operand.vmem [shape: f32[64,128], index: 1, kind: output, shape index: {}]  }
   0x1   :  { %v8_v0 = vld [vmem:[%s142_s0] sm:$0xff]  ;;  %v9_v1 = vld [vmem:[%s142_s0 + $0x8] sm:$0xff]  ;;  %v10_v2 = vld [vmem:[%s142_s0 + $0x10] sm:$0xff] }
   0x2   :  { %v16_v3 = vadd.f32 %v9_v1, %v8_v0  ;;  %v11_v4 = vld [vmem:[%s142_s0 + $0x18] sm:$0xff]  ;;  %v12_v6 = vld [vmem:[%s142_s0 + $0x20] sm:$0xff]  ;;  %v13_v8 = vld [vmem:[%s142_s0 + $0x28] sm:$0xff] }
   0x3   :  { %v14_v10 = vld [vmem:[%s142_s0 + $0x30] sm:$0xff]  ;;  %v15_v12 = vld [vmem:[%s142_s0 + $0x38] sm:$0xff] }
   0x4   :  { %v17_v5 = vadd.f32 %v16_v3, %v10_v2 }
   0x6   :  { %v18_v7 = vadd.f32 %v17_v5, %v11_v4 }
   0x8   :  { %v19_v9 = vadd.f32 %v18_v7, %v12_v6 }
   0xa   :  { %v20_v11 = vadd.f32 %v19_v9, %v13_v8 }
   0xc   :  { %v21_v13 = vadd.f32 %v20_v11, %v14_v10 }
   0xe   :  { %v22_v14 = vadd.f32 %v21_v13, %v15_v12 }
  0x10   :  { %v23_v15 = vrot.slane %v22_v14, 4 }
  0x12   :  { %v24_v16 = vadd.f32 %v23_v15, %v22_v14 }
  0x14   :  { %v25_v17 = vrot.slane %v24_v16, 2 }
  0x16   :  { %v26_v18 = vadd.f32 %v25_v17, %v24_v16 }
  0x18   :  { %v27_v19 = vrot.slane %v26_v18, 1 }
  0x1a   :  { %v28_v20 = vadd.f32 %v27_v19, %v26_v18 }
  0x1c   :  { %v29_v21 = vmul.f32 0.015625, %v28_v20 }
  0x1e   :  { %v30_v22 = vsub.f32 %v8_v0, %v29_v21  ;;  %v31_v23 = vsub.f32 %v9_v1, %v29_v21  ;;  %v32_v24 = vsub.f32 %v10_v2, %v29_v21  ;;  %v33_v25 = vsub.f32 %v11_v4, %v29_v21 }
  0x1f   :  { %v34_v26 = vsub.f32 %v12_v6, %v29_v21  ;;  %v35_v30 = vsub.f32 %v13_v8, %v29_v21  ;;  %v36_v33 = vsub.f32 %v14_v10, %v29_v21  ;;  %v37_v36 = vsub.f32 %v15_v12, %v29_v21 }
  0x20   :  { %v38_v27 = vmul.f32 %v30_v22, %v30_v22  ;;  %v39_v28 = vmul.f32 %v31_v23, %v31_v23  ;;  %v40_v29 = vmul.f32 %v32_v24, %v32_v24  ;;  %v41_v31 = vmul.f32 %v33_v25, %v33_v25 }
  0x21   :  { %v42_v34 = vmul.f32 %v34_v26, %v34_v26  ;;  %v43_v37 = vmul.f32 %v35_v30, %v35_v30  ;;  %v44_v39 = vmul.f32 %v36_v33, %v36_v33  ;;  %v45_v41 = vmul.f32 %v37_v36, %v37_v36 }
  0x22   :  { %v46_v32 = vadd.f32 %v39_v28, %v38_v27 }
  0x24   :  { %v47_v35 = vadd.f32 %v46_v32, %v40_v29 }
  0x26   :  { %v48_v38 = vadd.f32 %v47_v35, %v41_v31 }
  0x28   :  { %v49_v40 = vadd.f32 %v48_v38, %v42_v34 }
  0x2a   :  { %v50_v42 = vadd.f32 %v49_v40, %v43_v37 }
  0x2c   :  { %v51_v43 = vadd.f32 %v50_v42, %v44_v39 }
  0x2e   :  { %v52_v44 = vadd.f32 %v51_v43, %v45_v41 }
  0x30   :  { %v53_v45 = vrot.slane %v52_v44, 4 }
  0x32   :  { %v54_v46 = vadd.f32 %v53_v45, %v52_v44 }
  0x34   :  { %v55_v47 = vrot.slane %v54_v46, 2 }
  0x36   :  { %v56_v48 = vadd.f32 %v55_v47, %v54_v46 }
  0x38   :  { %v57_v49 = vrot.slane %v56_v48, 1 }
  0x3a   :  { %v58_v50 = vadd.f32 %v57_v49, %v56_v48 }
  0x3c   :  { %v59_v51 = vmul.f32 0.015625, %v58_v50 }
  0x3e   :  { %v60_v52 = vadd.f32 1e-10, %v59_v51 }
  0x40   :  { %82 = vrsqrt.f32 %v60_v52 }
  0x4a   :  { %v83_v53 = vpop.eup %82 }
  0x4b   :  { %v62_v54 = vmul.f32 %v83_v53, %v30_v22  ;;  %v63_v55 = vmul.f32 %v83_v53, %v31_v23  ;;  %v64_v56 = vmul.f32 %v83_v53, %v32_v24  ;;  %v65_v57 = vmul.f32 %v83_v53, %v33_v25 }
  0x4c   :  { %v66_v58 = vmul.f32 %v83_v53, %v34_v26  ;;  %v67_v59 = vmul.f32 %v83_v53, %v35_v30  ;;  %v68_v60 = vmul.f32 %v83_v53, %v36_v33  ;;  %v69_v61 = vmul.f32 %v83_v53, %v37_v36 }
  0x4d   :  { %70 = vst [vmem:[%s143_s1] sm:$0xff] %v62_v54  ;;  %71 = vst [vmem:[%s143_s1 + $0x8] sm:$0xff] %v63_v55 }
  0x4e   :  { %72 = vst [vmem:[%s143_s1 + $0x10] sm:$0xff] %v64_v56  ;;  %73 = vst [vmem:[%s143_s1 + $0x18] sm:$0xff] %v65_v57 }
  0x4f   :  { %74 = vst [vmem:[%s143_s1 + $0x20] sm:$0xff] %v66_v58  ;;  %75 = vst [vmem:[%s143_s1 + $0x28] sm:$0xff] %v67_v59 }
  0x50   :  { %76 = vst [vmem:[%s143_s1 + $0x30] sm:$0xff] %v68_v60  ;;  %77 = vst [vmem:[%s143_s1 + $0x38] sm:$0xff] %v69_v61 }

// kernel: preact_bottleneck_forward.14
= control target key start
LH: loop header
LB: loop body
LE: loop exit
PB: predicated region body
PF: predicated region fallthrough
CT: control target
= control target key end

     0   :  { %s1002_s21 = smov 0   ;;  %s1004_s22 = smov 0   ;;  %s1100_s0 = inlined_call_operand.vmem [shape: f32[2,1,64], index: 0, kind: input, shape index: {}]   ;;  %s1101_s1 = inlined_call_operand.vmem [shape: f32[2,1,64], index: 1, kind: input, shape index: {}]   ;;  %s1102_s2 = inlined_call_operand.vmem [shape: f32[2,64,64], index: 2, kind: input, shape index: {}]   ;;  %s1103_s3 = inlined_call_operand.vmem [shape: f32[64,128], index: 3, kind: input, shape index: {}]   ;;  %s1104_s4 = inlined_call_operand.vmem [shape: f32[2,64,128], index: 4, kind: output, shape index: {0}]   ;;  %s1105_s5 = inlined_call_operand.vmem [shape: f32[2,1,128], index: 5, kind: output, shape index: {1}]   ;;  %s1106_s6 = inlined_call_operand.vmem [shape: f32[2,1,128], index: 6, kind: output, shape index: {2}]  }
   0x1   :  { %s1006_s23 = smov 0  }
   0x2 LB: > { %s36_s24 = sadd.s32 1, %s960_s22  ;;  %p830_p0 = scmp.ge.s32.totalorder %s964_s23, 1  ;;  %s964_s23 = sphi %s1006_s23, %s17_s23   ;;  %s960_s22 = sphi %s1004_s22, %s1108_s22   ;;  %s956_s21 = sphi %s1002_s21, %s1107_s21  }
   0x3   : > { %p38_p1 = scmp.ge.s32.totalorder %s36_s24, 2  ;;  %p276_p2 = scmp.lt.s32.totalorder %s964_s23, 3 }
   0x5   : > { %s1110_s24 = smov (%p38_p1, %s36_s24), 0  ;;  %p277_p3 = pnand %p830_p0, %p276_p2 }
   0x6   : > { %v430_v0 = vld [vmem:[%s1103_s3] sm:$0xff] (!%p277_p3)  ;;  %v431_v1 = vld [vmem:[%s1103_s3 + $0x8] sm:$0xff] (!%p277_p3)  ;;  %v432_v2 = vld [vmem:[%s1103_s3 + $0x10] sm:$0xff] (!%p277_p3)  ;;  %p339_p4 = scmp.lt.s32.totalorder (!%p277_p3), %s956_s21, 1  ;;  %vm438_vm0 = vcmask (!%p277_p3), 523264   ;;  %v966_v46 = vmov (!%p277_p3), 0.0  }
   0x7   : > { %280 = sbr.rel (%p277_p3) target bundleno = 272 (0x110), region = 36  ;;  %v893_v3 = vpack.c.bf16 (!%p277_p3), %v431_v1, %v430_v0  ;;  %v433_v4 = vld [vmem:[%s1103_s3 + $0x18] sm:$0xff] (!%p277_p3)  ;;  %v434_v6 = vld [vmem:[%s1103_s3 + $0x20] sm:$0xff] (!%p277_p3)  ;;  %v435_v7 = vld [vmem:[%s1103_s3 + $0x28] sm:$0xff] (!%p277_p3) }
   0x8   : > { %v897_v5 = vpack.c.bf16 (!%p277_p3), %v433_v4, %v432_v2  ;;  %v901_v8 = vpack.c.bf16 (!%p277_p3), %v435_v7, %v434_v6  ;;  %v436_v10 = vld [vmem:[%s1103_s3 + $0x30] sm:$0xff] (!%p277_p3)  ;;  %v437_v11 = vld [vmem:[%s1103_s3 + $0x38] sm:$0xff] (!%p277_p3) }
   0x9   : > { %894 = vmatprep.subr.bf16.mxu0 (!%p277_p3), %v893_v3  ;;  %909 = vmatprep.subr.bf16.mxu1 (!%p277_p3), %v893_v3  ;;  %v905_v22 = vpack.c.bf16 (!%p277_p3), %v437_v11, %v436_v10 }
   0xa   : > { %896 = vmatpush3.bf16.msra.mxu0 (!%p277_p3), %v893_v3  ;;  %913 = vmatpush3.bf16.msra.mxu1 (!%p277_p3), %v893_v3 }
   0xb   : > { %898 = vmatprep.subr.bf16.mxu0 (!%p277_p3), %v897_v5  ;;  %910 = vmatprep.subr.bf16.mxu1 (!%p277_p3), %v897_v5 }
   0xe   : > { %s1112_s21 = smov (!%p339_p4, %s956_s21), 1  ;;  %900 = vmatpush3.bf16.msra.mxu0 %v897_v5  ;;  %914 = vmatpush3.bf16.msra.mxu1 %v897_v5 }
   0xf   : > { %s341_s15 = scalar_lea.vmem %s1100_s0, %s1112_s21  ;;  %s344_s18 = scalar_lea.vmem %s1101_s1, %s1112_s21  ;;  %902 = vmatprep.subr.bf16.mxu0 %v901_v8  ;;  %911 = vmatprep.subr.bf16.mxu1 %v901_v8 }
  0x10   : > { %s847_s19 = sshll.u32 %s1112_s21, 6  ;;  %v835_v9 = vld [vmem:[%s341_s15] ss:$0 sm:$0xff]  ;;  %s1072_s9 = scalar_lea.vmem %s1105_s5, %s1112_s21 }
  0x11   : > { %s353_s30 = scalar_lea.vmem %s1102_s2, %s847_s19  ;;  %v836_v12 = vld [vmem:[%s344_s18] ss:$0 sm:$0xff]  ;;  %s1078_s12 = scalar_lea.vmem %s1106_s6, %s1112_s21  ;;  %572 = vst [vmem:[%s1072_s9] sm:$0x1] %v966_v46 }
  0x12   : > { %v384_v13 = vld [vmem:[%s353_s30] sm:$0xff]  ;;  %v385_v14 = vld [vmem:[%s353_s30 + $0x8] sm:$0xff]  ;;  %v386_v15 = vld [vmem:[%s353_s30 + $0x10] sm:$0xff]  ;;  %904 = vmatpush3.bf16.msra.mxu0 %v901_v8  ;;  %915 = vmatpush3.bf16.msra.mxu1 %v901_v8  ;;  %573 = vst [vmem:[%s1078_s12] sm:$0x1] %v966_v46  ;;  %s370_s15 = scalar_lea.vmem %s1104_s4, %s847_s19 }
  0x13   : > { %v399_v16 = vmul.f32 %v835_v9, %v384_v13  ;;  %v400_v17 = vmul.f32 %v835_v9, %v385_v14  ;;  %v401_v18 = vmul.f32 %v835_v9, %v386_v15  ;;  %v387_v19 = vld [vmem:[%s353_s30 + $0x18] sm:$0xff]  ;;  %v388_v20 = vld [vmem:[%s353_s30 + $0x20] sm:$0xff]  ;;  %v389_v21 = vld [vmem:[%s353_s30 + $0x28] sm:$0xff]  ;;  %906 = vmatprep.subr.bf16.mxu0 %v905_v22  ;;  %912 = vmatprep.subr.bf16.mxu1 %v905_v22 }
  0x14   : > { %v403_v23 = vmul.f32 %v835_v9, %v388_v20  ;;  %v404_v24 = vmul.f32 %v835_v9, %v389_v21  ;;  %v390_v25 = vld [vmem:[%s353_s30 + $0x30] sm:$0xff]  ;;  %v391_v26 = vld [vmem:[%s353_s30 + $0x38] sm:$0xff]  ;;  %v402_v28 = vmul.f32 %v835_v9, %v387_v19 }
  0x15   : > { %v414_v27 = vadd.f32 %v836_v12, %v399_v16  ;;  %v405_v29 = vmul.f32 %v835_v9, %v390_v25  ;;  %v415_v30 = vadd.f32 %v836_v12, %v400_v17  ;;  %v406_v33 = vmul.f32 %v835_v9, %v391_v26 }
  0x16   : > { %v418_v31 = vadd.f32 %v836_v12, %v403_v23  ;;  %v419_v32 = vadd.f32 %v836_v12, %v404_v24  ;;  %v416_v35 = vadd.f32 %v836_v12, %v401_v18  ;;  %v417_v39 = vadd.f32 %v836_v12, %v402_v28  ;;  %908 = vmatpush3.bf16.msra.mxu0 %v905_v22 }
  0x17   : > { %v422_v34 = vmax.f32 %v414_v27, 0.0  ;;  %v420_v36 = vadd.f32 %v836_v12, %v405_v29  ;;  %v423_v38 = vmax.f32 %v415_v30, 0.0  ;;  %v421_v41 = vadd.f32 %v836_v12, %v406_v33  ;;  %916 = vmatpush3.bf16.msra.mxu1 %v905_v22 }
  0x18   : > { %v426_v37 = vmax.f32 %v418_v31, 0.0  ;;  %v427_v40 = vmax.f32 %v419_v32, 0.0  ;;  %v424_v42 = vmax.f32 %v416_v35, 0.0  ;;  %v425_v44 = vmax.f32 %v417_v39, 0.0  ;;  %v574_v22 = vld [vmem:[%s1072_s9] sm:$0x1] }
  0x19   : > { %881 = vmatprep.mubr.msk.f32.mxu0 %vm438_vm0, %v422_v34  ;;  %v428_v43 = vmax.f32 %v420_v36, 0.0  ;;  %v429_v45 = vmax.f32 %v421_v41, 0.0  ;;  %v590_v25 = vld [vmem:[%s1078_s12] sm:$0x1] }
  0x1a   : > { %887 = vmatprep.mubr.msk.f32.mxu1 %vm438_vm0, %v426_v37  ;;  %882 = vmatmul.mubr.msk.f32.vlgmr.msra.gmra.mrb[0].mxu0 %vm438_vm0, %v423_v38 }
  0x1b   : > { %888 = vmatmul.mubr.msk.f32.vlgmr.msra.gmra.mrb[0].mxu1 %vm438_vm0, %v427_v40  ;;  %884 = vmatprep.mubr.msk.f32.mxu0 %vm438_vm0, %v424_v42 }
  0x1c   : > { %890 = vmatprep.mubr.msk.f32.mxu1 %vm438_vm0, %v428_v43 }
  0x1e   : > { %885 = vmatmul.mubr.msk.f32.gmra.mrb[2].mxu0 %vm438_vm0, %v425_v44 }
  0x1f   : > { %891 = vmatmul.mubr.msk.f32.gmra.mrb[2].mxu1 %vm438_vm0, %v429_v45 }
  0xed   : > { %v883_v47 = vpop.f32.mrb[0].mxu0 }
  0xee   : > { %v889_v48 = vpop.f32.mrb[0].mxu1  ;;  %v592_v49 = vmul.f32 %v883_v47, %v883_v47  ;;  %615 = vst [vmem:[%s370_s15 + $0x8] sm:$0xff] %v883_v47  ;;  %v529_v50 = vpop.f32.mrb[1].mxu0 }
  0xef   : > { %619 = vst [vmem:[%s370_s15 + $0x28] sm:$0xff] %v889_v48  ;;  %v549_v51 = vpop.f32.mrb[1].mxu1  ;;  %v575_v52 = vadd.f32 %v883_v47, %v529_v50  ;;  %v591_v53 = vmul.f32 %v529_v50, %v529_v50  ;;  %614 = vst [vmem:[%s370_s15] sm:$0xff] %v529_v50  ;;  %v596_v3 = vmul.f32 %v889_v48, %v889_v48 }
  0xf0   : > { %618 = vst [vmem:[%s370_s15 + $0x20] sm:$0xff] %v549_v51  ;;  %v595_v0 = vmul.f32 %v549_v51, %v549_v51 }
  0xf1   : > { %v599_v54 = vadd.f32 %v592_v49, %v591_v53  ;;  %v886_v55 = vpop.f32.mrb[2].mxu0 }
  0xf2   : > { %v892_v56 = vpop.f32.mrb[2].mxu1  ;;  %617 = vst [vmem:[%s370_s15 + $0x18] sm:$0xff] %v886_v55  ;;  %v539_v57 = vpop.f32.mrb[3].mxu0  ;;  %v594_v61 = vmul.f32 %v886_v55, %v886_v55 }
  0xf3   : > { %621 = vst [vmem:[%s370_s15 + $0x38] sm:$0xff] %v892_v56  ;;  %v559_v58 = vpop.f32.mrb[3].mxu1  ;;  %v576_v59 = vadd.f32 %v575_v52, %v539_v57  ;;  %v593_v60 = vmul.f32 %v539_v57, %v539_v57  ;;  %616 = vst [vmem:[%s370_s15 + $0x10] sm:$0xff] %v539_v57  ;;  %v598_v9 = vmul.f32 %v892_v56, %v892_v56 }
  0xf4   : > { %620 = vst [vmem:[%s370_s15 + $0x30] sm:$0xff] %v559_v58  ;;  %v597_v6 = vmul.f32 %v559_v58, %v559_v58 }
  0xf5   : > { %v577_v62 = vadd.f32 %v886_v55, %v576_v59  ;;  %v600_v63 = vadd.f32 %v599_v54, %v593_v60 }
  0xf7   : > { %v601_v1 = vadd.f32 %v600_v63, %v594_v61  ;;  %v578_v2 = vadd.f32 %v577_v62, %v549_v51 }
  0xf9   : > { %v602_v4 = vadd.f32 %v601_v1, %v595_v0  ;;  %v579_v5 = vadd.f32 %v889_v48, %v578_v2 }
  0xfb   : > { %v580_v7 = vadd.f32 %v579_v5, %v559_v58  ;;  %v603_v8 = vadd.f32 %v602_v4, %v596_v3 }
  0xfd   : > { %v581_v10 = vadd.f32 %v892_v56, %v580_v7  ;;  %v604_v11 = vadd.f32 %v603_v8, %v597_v6 }
  0xff   : > { %v582_v12 = vrot.slane %v581_v10, 4  ;;  %v605_v13 = vadd.f32 %v604_v11, %v598_v9 }
 0x101   : > { %v583_v14 = vadd.f32 %v582_v12, %v581_v10  ;;  %v606_v15 = vrot.slane %v605_v13, 4 }
 0x103   : > { %v584_v16 = vrot.slane %v583_v14, 2  ;;  %v607_v17 = vadd.f32 %v606_v15, %v605_v13 }
 0x105   : > { %v585_v18 = vadd.f32 %v584_v16, %v583_v14  ;;  %v608_v19 = vrot.slane %v607_v17, 2 }
 0x107   : > { %v586_v20 = vrot.slane %v585_v18, 1  ;;  %v609_v21 = vadd.f32 %v608_v19, %v607_v17 }
 0x109   : > { %v587_v23 = vadd.f32 %v586_v20, %v585_v18  ;;  %v610_v24 = vrot.slane %v609_v21, 1 }
 0x10b   : > { %v588_v26 = vadd.f32 %v587_v23, %v574_v22  ;;  %v611_v27 = vadd.f32 %v610_v24, %v609_v21 }
 0x10d   : > { %589 = vst [vmem:[%s1072_s9] sm:$0x1] %v588_v26  ;;  %v612_v28 = vadd.f32 %v611_v27, %v590_v25 }
 0x10f   : > { %613 = vst [vmem:[%s1078_s12] sm:$0x1] %v612_v28 }
 0x110 PF: > { %s17_s23 = sadd.s32 1, %s964_s23   ;;  %s1107_s21 = smov %s960_s22 }
 0x111   : > { %p14_p5 = scmp.ge.s32.totalorder %s17_s23, 4   ;;  %s1108_s22 = smov %s1110_s24 }
 0x113   :  { %16 = sbr.rel (!%p14_p5) target bundleno = 2 (0x2), region = 103 }

// kernel: preact_bottleneck_forward.10
= control target key start
LH: loop header
LB: loop body
LE: loop exit
PB: predicated region body
PF: predicated region fallthrough
CT: control target
= control target key end

     0   :  { %s776_s0 = inlined_call_operand.vmem [shape: f32[288,128], index: 0, kind: input, shape index: {}]   ;;  %s777_s1 = inlined_call_operand.vmem [shape: f32[288,128], index: 1, kind: output, shape index: {}]  }
   0x1   :  { %v293_v0 = vld [vmem:[%s776_s0] sm:$0xff]  ;;  %v298_v1 = vld [vmem:[%s776_s0 + $0x8] sm:$0xff]  ;;  %v303_v2 = vld [vmem:[%s776_s0 + $0x10] sm:$0xff] }
   0x2   :  { %v44_v3 = vadd.f32 %v298_v1, %v293_v0  ;;  %v310_v4 = vld [vmem:[%s776_s0 + $0x18] sm:$0xff]  ;;  %v316_v6 = vld [vmem:[%s776_s0 + $0x20] sm:$0xff]  ;;  %v322_v8 = vld [vmem:[%s776_s0 + $0x28] sm:$0xff] }
   0x3   :  { %v328_v10 = vld [vmem:[%s776_s0 + $0x30] sm:$0xff]  ;;  %v334_v12 = vld [vmem:[%s776_s0 + $0x38] sm:$0xff]  ;;  %v340_v14 = vld [vmem:[%s776_s0 + $0x40] sm:$0xff] }
   0x4   :  { %v45_v5 = vadd.f32 %v44_v3, %v303_v2  ;;  %v346_v16 = vld [vmem:[%s776_s0 + $0x48] sm:$0xff]  ;;  %v352_v18 = vld [vmem:[%s776_s0 + $0x50] sm:$0xff]  ;;  %v358_v20 = vld [vmem:[%s776_s0 + $0x58] sm:$0xff] }
   0x5   :  { %v364_v22 = vld [vmem:[%s776_s0 + $0x60] sm:$0xff]  ;;  %v21_v24 = vld [vmem:[%s776_s0 + $0x68] sm:$0xff]  ;;  %v22_v26 = vld [vmem:[%s776_s0 + $0x70] sm:$0xff] }
   0x6   :  { %v46_v7 = vadd.f32 %v45_v5, %v310_v4  ;;  %v23_v28 = vld [vmem:[%s776_s0 + $0x78] sm:$0xff]  ;;  %v24_v30 = vld [vmem:[%s776_s0 + $0x80] sm:$0xff]  ;;  %v25_v32 = vld [vmem:[%s776_s0 + $0x88] sm:$0xff] }
   0x7   :  { %v26_v34 = vld [vmem:[%s776_s0 + $0x90] sm:$0xff]  ;;  %v27_v36 = vld [vmem:[%s776_s0 + $0x98] sm:$0xff]  ;;  %v28_v38 = vld [vmem:[%s776_s0 + $0xa0] sm:$0xff] }
   0x8   :  { %v47_v9 = vadd.f32 %v46_v7, %v316_v6  ;;  %v29_v40 = vld [vmem:[%s776_s0 + $0xa8] sm:$0xff]  ;;  %v30_v42 = vld [vmem:[%s776_s0 + $0xb0] sm:$0xff]  ;;  %v31_v44 = vld [vmem:[%s776_s0 + $0xb8] sm:$0xff] }
   0x9   :  { %v32_v46 = vld [vmem:[%s776_s0 + $0xc0] sm:$0xff]  ;;  %v33_v48 = vld [vmem:[%s776_s0 + $0xc8] sm:$0xff]  ;;  %v34_v50 = vld [vmem:[%s776_s0 + $0xd0] sm:$0xff] }
   0xa   :  { %v48_v11 = vadd.f32 %v47_v9, %v322_v8  ;;  %v35_v52 = vld [vmem:[%s776_s0 + $0xd8] sm:$0xff]  ;;  %v36_v54 = vld [vmem:[%s776_s0 + $0xe0] sm:$0xff]  ;;  %v37_v56 = vld [vmem:[%s776_s0 + $0xe8] sm:$0xff] }
   0xb   :  { %v38_v58 = vld [vmem:[%s776_s0 + $0xf0] sm:$0xff]  ;;  %v39_v60 = vld [vmem:[%s776_s0 + $0xf8] sm:$0xff]  ;;  %v40_v62 = vld [vmem:[%s776_s0 + $0x100] sm:$0xff] }
   0xc   :  { %v49_v13 = vadd.f32 %v48_v11, %v328_v10  ;;  %v41_v3 = vld [vmem:[%s776_s0 + $0x108] sm:$0xff]  ;;  %v42_v7 = vld [vmem:[%s776_s0 + $0x110] sm:$0xff]  ;;  %v43_v11 = vld [vmem:[%s776_s0 + $0x118] sm:$0xff] }
   0xe   :  { %v50_v15 = vadd.f32 %v49_v13, %v334_v12 }
  0x10   :  { %v51_v17 = vadd.f32 %v50_v15, %v340_v14 }
  0x12   :  { %v52_v19 = vadd.f32 %v51_v17, %v346_v16 }
  0x14   :  { %v53_v21 = vadd.f32 %v52_v19, %v352_v18 }
  0x16   :  { %v54_v23 = vadd.f32 %v53_v21, %v358_v20 }
  0x18   :  { %v55_v25 = vadd.f32 %v54_v23, %v364_v22 }
  0x1a   :  { %v56_v27 = vadd.f32 %v55_v25, %v21_v24 }
  0x1c   :  { %v57_v29 = vadd.f32 %v56_v27, %v22_v26 }
  0x1e   :  { %v58_v31 = vadd.f32 %v57_v29, %v23_v28 }
  0x20   :  { %v59_v33 = vadd.f32 %v58_v31, %v24_v30 }
  0x22   :  { %v60_v35 = vadd.f32 %v59_v33, %v25_v32 }
  0x24   :  { %v61_v37 = vadd.f32 %v60_v35, %v26_v34 }
  0x26   :  { %v62_v39 = vadd.f32 %v61_v37, %v27_v36 }
  0x28   :  { %v63_v41 = vadd.f32 %v62_v39, %v28_v38 }
  0x2a   :  { %v64_v43 = vadd.f32 %v63_v41, %v29_v40 }
  0x2c   :  { %v65_v45 = vadd.f32 %v64_v43, %v30_v42 }
  0x2e   :  { %v66_v47 = vadd.f32 %v65_v45, %v31_v44 }
  0x30   :  { %v67_v49 = vadd.f32 %v66_v47, %v32_v46 }
  0x32   :  { %v68_v51 = vadd.f32 %v67_v49, %v33_v48 }
  0x34   :  { %v69_v53 = vadd.f32 %v68_v51, %v34_v50 }
  0x36   :  { %v70_v55 = vadd.f32 %v69_v53, %v35_v52 }
  0x38   :  { %v71_v57 = vadd.f32 %v70_v55, %v36_v54 }
  0x3a   :  { %v72_v59 = vadd.f32 %v71_v57, %v37_v56 }
  0x3c   :  { %v73_v61 = vadd.f32 %v72_v59, %v38_v58 }
  0x3e   :  { %v74_v63 = vadd.f32 %v73_v61, %v39_v60 }
  0x40   :  { %v75_v5 = vadd.f32 %v74_v63, %v40_v62 }
  0x42   :  { %v76_v9 = vadd.f32 %v75_v5, %v41_v3 }
  0x44   :  { %v77_v13 = vadd.f32 %v76_v9, %v42_v7 }
  0x46   :  { %v78_v15 = vadd.f32 %v77_v13, %v43_v11 }
  0x48   :  { %v79_v17 = vrot.slane %v78_v15, 4 }
  0x4a   :  { %v80_v19 = vadd.f32 %v79_v17, %v78_v15 }
  0x4c   :  { %v81_v21 = vrot.slane %v80_v19, 2 }
  0x4e   :  { %v82_v23 = vadd.f32 %v81_v21, %v80_v19 }
  0x50   :  { %v83_v25 = vrot.slane %v82_v23, 1 }
  0x52   :  { %v84_v27 = vadd.f32 %v83_v25, %v82_v23 }
  0x54   :  { %v85_v29 = vmul.f32 0.0034722222, %v84_v27 }
  0x56   :  { %v437_v31 = vsub.f32 %v21_v24, %v85_v29  ;;  %v439_v33 = vsub.f32 %v22_v26, %v85_v29  ;;  %v441_v35 = vsub.f32 %v23_v28, %v85_v29  ;;  %v443_v37 = vsub.f32 %v24_v30, %v85_v29 }
  0x57   :  { %v445_v39 = vsub.f32 %v25_v32, %v85_v29  ;;  %v447_v41 = vsub.f32 %v26_v34, %v85_v29  ;;  %v449_v43 = vsub.f32 %v27_v36, %v85_v29  ;;  %v451_v45 = vsub.f32 %v28_v38, %v85_v29 }
  0x58   :  { %v453_v47 = vsub.f32 %v29_v40, %v85_v29  ;;  %v455_v49 = vsub.f32 %v30_v42, %v85_v29  ;;  %v457_v24 = vsub.f32 %v31_v44, %v85_v29  ;;  %v459_v26 = vsub.f32 %v32_v46, %v85_v29 }
  0x59   :  { %v461_v28 = vsub.f32 %v33_v48, %v85_v29  ;;  %v463_v30 = vsub.f32 %v34_v50, %v85_v29  ;;  %v465_v32 = vsub.f32 %v35_v52, %v85_v29  ;;  %v467_v34 = vsub.f32 %v36_v54, %v85_v29 }
  0x5a   :  { %v469_v36 = vsub.f32 %v37_v56, %v85_v29  ;;  %v471_v38 = vsub.f32 %v38_v58, %v85_v29  ;;  %v473_v40 = vsub.f32 %v39_v60, %v85_v29  ;;  %v475_v42 = vsub.f32 %v40_v62, %v85_v29 }
  0x5b   :  { %v477_v44 = vsub.f32 %v41_v3, %v85_v29  ;;  %v479_v46 = vsub.f32 %v42_v7, %v85_v29  ;;  %v481_v48 = vsub.f32 %v43_v11, %v85_v29  ;;  %v484_v50 = vsub.f32 %v293_v0, %v85_v29 }
  0x5c   :  { %v487_v51 = vsub.f32 %v298_v1, %v85_v29  ;;  %v490_v52 = vsub.f32 %v303_v2, %v85_v29  ;;  %v493_v53 = vsub.f32 %v310_v4, %v85_v29  ;;  %v500_v56 = vsub.f32 %v316_v6, %v85_v29 }
  0x5d   :  { %v122_v54 = vmul.f32 %v484_v50, %v484_v50  ;;  %v505_v1 = vsub.f32 %v322_v8, %v85_v29  ;;  %v510_v57 = vsub.f32 %v328_v10, %v85_v29  ;;  %v515_v6 = vsub.f32 %v334_v12, %v85_v29 }
  0x5e   :  { %v123_v55 = vmul.f32 %v487_v51, %v487_v51  ;;  %v124_v0 = vmul.f32 %v490_v52, %v490_v52  ;;  %v125_v2 = vmul.f32 %v493_v53, %v493_v53  ;;  %v126_v58 = vmul.f32 %v500_v56, %v500_v56 }
  0x5f   :  { %v127_v60 = vmul.f32 %v505_v1, %v505_v1  ;;  %v520_v8 = vsub.f32 %v340_v14, %v85_v29  ;;  %v128_v62 = vmul.f32 %v510_v57, %v510_v57  ;;  %v525_v10 = vsub.f32 %v346_v16, %v85_v29 }
  0x60   :  { %v158_v4 = vadd.f32 %v123_v55, %v122_v54  ;;  %v129_v3 = vmul.f32 %v515_v6, %v515_v6  ;;  %v530_v12 = vsub.f32 %v352_v18, %v85_v29  ;;  %v535_v14 = vsub.f32 %v358_v20, %v85_v29 }
  0x61   :  { %v130_v7 = vmul.f32 %v520_v8, %v520_v8  ;;  %v131_v11 = vmul.f32 %v525_v10, %v525_v10  ;;  %v540_v16 = vsub.f32 %v364_v22, %v85_v29  ;;  %v135_v23 = vmul.f32 %v437_v31, %v437_v31 }
  0x62   :  { %v159_v59 = vadd.f32 %v158_v4, %v124_v0  ;;  %v132_v15 = vmul.f32 %v530_v12, %v530_v12  ;;  %v133_v18 = vmul.f32 %v535_v14, %v535_v14  ;;  %v136_v22 = vmul.f32 %v439_v33, %v439_v33 }
  0x63   :  { %v134_v21 = vmul.f32 %v540_v16, %v540_v16  ;;  %v137_v29 = vmul.f32 %v441_v35, %v441_v35  ;;  %v138_v55 = vmul.f32 %v443_v37, %v443_v37 }
  0x64   :  { %v160_v61 = vadd.f32 %v159_v59, %v125_v2  ;;  %v139_v2 = vmul.f32 %v445_v39, %v445_v39 }
  0x66   :  { %v161_v63 = vadd.f32 %v160_v61, %v126_v58  ;;  %v140_v58 = vmul.f32 %v447_v41, %v447_v41 }
  0x68   :  { %v162_v5 = vadd.f32 %v161_v63, %v127_v60  ;;  %v141_v60 = vmul.f32 %v449_v43, %v449_v43 }
  0x6a   :  { %v163_v9 = vadd.f32 %v162_v5, %v128_v62  ;;  %v142_v62 = vmul.f32 %v451_v45, %v451_v45 }
  0x6c   :  { %v164_v13 = vadd.f32 %v163_v9, %v129_v3  ;;  %v143_v3 = vmul.f32 %v453_v47, %v453_v47 }
  0x6e   :  { %v165_v17 = vadd.f32 %v164_v13, %v130_v7  ;;  %v144_v7 = vmul.f32 %v455_v49, %v455_v49 }
  0x70   :  { %v166_v19 = vadd.f32 %v165_v17, %v131_v11  ;;  %v145_v11 = vmul.f32 %v457_v24, %v457_v24 }
  0x72   :  { %v167_v20 = vadd.f32 %v166_v19, %v132_v15  ;;  %v146_v15 = vmul.f32 %v459_v26, %v459_v26 }
  0x74   :  { %v168_v25 = vadd.f32 %v167_v20, %v133_v18  ;;  %v147_v18 = vmul.f32 %v461_v28, %v461_v28 }
  0x76   :  { %v169_v27 = vadd.f32 %v168_v25, %v134_v21  ;;  %v148_v21 = vmul.f32 %v463_v30, %v463_v30 }
  0x78   :  { %v170_v54 = vadd.f32 %v169_v27, %v135_v23  ;;  %v149_v23 = vmul.f32 %v465_v32, %v465_v32 }
  0x7a   :  { %v171_v0 = vadd.f32 %v170_v54, %v136_v22  ;;  %v150_v22 = vmul.f32 %v467_v34, %v467_v34 }
  0x7c   :  { %v172_v4 = vadd.f32 %v171_v0, %v137_v29  ;;  %v151_v29 = vmul.f32 %v469_v36, %v469_v36 }
  0x7e   :  { %v173_v59 = vadd.f32 %v172_v4, %v138_v55  ;;  %v152_v55 = vmul.f32 %v471_v38, %v471_v38 }
  0x80   :  { %v174_v61 = vadd.f32 %v173_v59, %v139_v2  ;;  %v153_v2 = vmul.f32 %v473_v40, %v473_v40 }
  0x82   :  { %v175_v63 = vadd.f32 %v174_v61, %v140_v58  ;;  %v154_v58 = vmul.f32 %v475_v42, %v475_v42 }
  0x84   :  { %v176_v5 = vadd.f32 %v175_v63, %v141_v60  ;;  %v155_v60 = vmul.f32 %v477_v44, %v477_v44 }
  0x86   :  { %v177_v9 = vadd.f32 %v176_v5, %v142_v62  ;;  %v156_v62 = vmul.f32 %v479_v46, %v479_v46 }
  0x88   :  { %v178_v13 = vadd.f32 %v177_v9, %v143_v3  ;;  %v157_v3 = vmul.f32 %v481_v48, %v481_v48 }
  0x8a   :  { %v179_v17 = vadd.f32 %v178_v13, %v144_v7 }
  0x8c   :  { %v180_v19 = vadd.f32 %v179_v17, %v145_v11 }
  0x8e   :  { %v181_v20 = vadd.f32 %v180_v19, %v146_v15 }
  0x90   :  { %v182_v25 = vadd.f32 %v181_v20, %v147_v18 }
  0x92   :  { %v183_v27 = vadd.f32 %v182_v25, %v148_v21 }
  0x94   :  { %v184_v54 = vadd.f32 %v183_v27, %v149_v23 }
  0x96   :  { %v185_v0 = vadd.f32 %v184_v54, %v150_v22 }
  0x98   :  { %v186_v4 = vadd.f32 %v185_v0, %v151_v29 }
  0x9a   :  { %v187_v59 = vadd.f32 %v186_v4, %v152_v55 }
  0x9c   :  { %v188_v61 = vadd.f32 %v187_v59, %v153_v2 }
  0x9e   :  { %v189_v63 = vadd.f32 %v188_v61, %v154_v58 }
  0xa0   :  { %v190_v5 = vadd.f32 %v189_v63, %v155_v60 }
  0xa2   :  { %v191_v7 = vadd.f32 %v190_v5, %v156_v62 }
  0xa4   :  { %v192_v9 = vadd.f32 %v191_v7, %v157_v3 }
  0xa6   :  { %v193_v11 = vrot.slane %v192_v9, 4 }
  0xa8   :  { %v194_v13 = vadd.f32 %v193_v11, %v192_v9 }
  0xaa   :  { %v195_v15 = vrot.slane %v194_v13, 2 }
  0xac   :  { %v196_v17 = vadd.f32 %v195_v15, %v194_v13 }
  0xae   :  { %v197_v18 = vrot.slane %v196_v17, 1 }
  0xb0   :  { %v198_v19 = vadd.f32 %v197_v18, %v196_v17 }
  0xb2   :  { %v199_v21 = vmul.f32 0.0034722222, %v198_v19 }
  0xb4   :  { %v200_v20 = vadd.f32 1e-10, %v199_v21 }
  0xb6   :  { %278 = vrsqrt.f32 %v200_v20 }
  0xc0   :  { %v594_v23 = vpop.eup %278 }
  0xc1   :  { %v202_v25 = vmul.f32 %v594_v23, %v484_v50  ;;  %v203_v22 = vmul.f32 %v594_v23, %v487_v51  ;;  %v204_v27 = vmul.f32 %v594_v23, %v490_v52  ;;  %v205_v29 = vmul.f32 %v594_v23, %v493_v53 }
  0xc2   :  { %v206_v54 = vmul.f32 %v594_v23, %v500_v56  ;;  %v207_v55 = vmul.f32 %v594_v23, %v505_v1  ;;  %v208_v0 = vmul.f32 %v594_v23, %v510_v57  ;;  %v209_v50 = vmul.f32 %v594_v23, %v515_v6 }
  0xc3   :  { %238 = vst [vmem:[%s777_s1] sm:$0xff] %v202_v25  ;;  %239 = vst [vmem:[%s777_s1 + $0x8] sm:$0xff] %v203_v22  ;;  %v210_v51 = vmul.f32 %v594_v23, %v520_v8  ;;  %v211_v52 = vmul.f32 %v594_v23, %v525_v10  ;;  %v212_v53 = vmul.f32 %v594_v23, %v530_v12 }
  0xc4   :  { %240 = vst [vmem:[%s777_s1 + $0x10] sm:$0xff] %v204_v27  ;;  %241 = vst [vmem:[%s777_s1 + $0x18] sm:$0xff] %v205_v29  ;;  %v213_v56 = vmul.f32 %v594_v23, %v535_v14  ;;  %v214_v1 = vmul.f32 %v594_v23, %v540_v16  ;;  %v215_v57 = vmul.f32 %v594_v23, %v437_v31 }
  0xc5   :  { %242 = vst [vmem:[%s777_s1 + $0x20] sm:$0xff] %v206_v54  ;;  %243 = vst [vmem:[%s777_s1 + $0x28] sm:$0xff] %v207_v55  ;;  %v216_v6 = vmul.f32 %v594_v23, %v439_v33  ;;  %v217_v8 = vmul.f32 %v594_v23, %v441_v35  ;;  %v218_v31 = vmul.f32 %v594_v23, %v443_v37 }
  0xc6   :  { %244 = vst [vmem:[%s777_s1 + $0x30] sm:$0xff] %v208_v0  ;;  %245 = vst [vmem:[%s777_s1 + $0x38] sm:$0xff] %v209_v50  ;;  %v219_v33 = vmul.f32 %v594_v23, %v445_v39  ;;  %v220_v35 = vmul.f32 %v594_v23, %v447_v41  ;;  %v221_v10 = vmul.f32 %v594_v23, %v449_v43 }
  0xc7   :  { %246 = vst [vmem:[%s777_s1 + $0x40] sm:$0xff] %v210_v51  ;;  %247 = vst [vmem:[%s777_s1 + $0x48] sm:$0xff] %v211_v52  ;;  %v222_v37 = vmul.f32 %v594_v23, %v451_v45  ;;  %v223_v39 = vmul.f32 %v594_v23, %v453_v47  ;;  %v224_v41 = vmul.f32 %v594_v23, %v455_v49 }
  0xc8   :  { %248 = vst [vmem:[%s777_s1 + $0x50] sm:$0xff] %v212_v53  ;;  %249 = vst [vmem:[%s777_s1 + $0x58] sm:$0xff] %v213_v56  ;;  %v225_v43 = vmul.f32 %v594_v23, %v457_v24  ;;  %v226_v45 = vmul.f32 %v594_v23, %v459_v26  ;;  %v227_v47 = vmul.f32 %v594_v23, %v461_v28 }
  0xc9   :  { %250 = vst [vmem:[%s777_s1 + $0x60] sm:$0xff] %v214_v1  ;;  %251 = vst [vmem:[%s777_s1 + $0x68] sm:$0xff] %v215_v57  ;;  %v228_v49 = vmul.f32 %v594_v23, %v463_v30  ;;  %v229_v24 = vmul.f32 %v594_v23, %v465_v32  ;;  %v230_v26 = vmul.f32 %v594_v23, %v467_v34 }
  0xca   :  { %252 = vst [vmem:[%s777_s1 + $0x70] sm:$0xff] %v216_v6  ;;  %253 = vst [vmem:[%s777_s1 + $0x78] sm:$0xff] %v217_v8  ;;  %v231_v28 = vmul.f32 %v594_v23, %v469_v36  ;;  %v232_v30 = vmul.f32 %v594_v23, %v471_v38  ;;  %v233_v32 = vmul.f32 %v594_v23, %v473_v40 }
  0xcb   :  { %254 = vst [vmem:[%s777_s1 + $0x80] sm:$0xff] %v218_v31  ;;  %255 = vst [vmem:[%s777_s1 + $0x88] sm:$0xff] %v219_v33  ;;  %v234_v34 = vmul.f32 %v594_v23, %v475_v42  ;;  %v235_v36 = vmul.f32 %v594_v23, %v477_v44  ;;  %v236_v38 = vmul.f32 %v594_v23, %v479_v46 }
  0xcc   :  { %256 = vst [vmem:[%s777_s1 + $0x90] sm:$0xff] %v220_v35  ;;  %257 = vst [vmem:[%s777_s1 + $0x98] sm:$0xff] %v221_v10  ;;  %v237_v40 = vmul.f32 %v594_v23, %v481_v48 }
  0xcd   :  { %258 = vst [vmem:[%s777_s1 + $0xa0] sm:$0xff] %v222_v37  ;;  %259 = vst [vmem:[%s777_s1 + $0xa8] sm:$0xff] %v223_v39 }
  0xce   :  { %260 = vst [vmem:[%s777_s1 + $0xb0] sm:$0xff] %v224_v41  ;;  %261 = vst [vmem:[%s777_s1 + $0xb8] sm:$0xff] %v225_v43 }
  0xcf   :  { %262 = vst [vmem:[%s777_s1 + $0xc0] sm:$0xff] %v226_v45  ;;  %263 = vst [vmem:[%s777_s1 + $0xc8] sm:$0xff] %v227_v47 }
  0xd0   :  { %264 = vst [vmem:[%s777_s1 + $0xd0] sm:$0xff] %v228_v49  ;;  %265 = vst [vmem:[%s777_s1 + $0xd8] sm:$0xff] %v229_v24 }
  0xd1   :  { %266 = vst [vmem:[%s777_s1 + $0xe0] sm:$0xff] %v230_v26  ;;  %267 = vst [vmem:[%s777_s1 + $0xe8] sm:$0xff] %v231_v28 }
  0xd2   :  { %268 = vst [vmem:[%s777_s1 + $0xf0] sm:$0xff] %v232_v30  ;;  %269 = vst [vmem:[%s777_s1 + $0xf8] sm:$0xff] %v233_v32 }
  0xd3   :  { %270 = vst [vmem:[%s777_s1 + $0x100] sm:$0xff] %v234_v34  ;;  %271 = vst [vmem:[%s777_s1 + $0x108] sm:$0xff] %v235_v36 }
  0xd4   :  { %272 = vst [vmem:[%s777_s1 + $0x110] sm:$0xff] %v236_v38  ;;  %273 = vst [vmem:[%s777_s1 + $0x118] sm:$0xff] %v237_v40 }

// kernel: preact_bottleneck_forward.11
= control target key start
LH: loop header
LB: loop body
LE: loop exit
PB: predicated region body
PF: predicated region fallthrough
CT: control target
= control target key end

     0   :  { %s90_s0 = inlined_call_operand.vmem [shape: f32[32,128], index: 0, kind: input, shape index: {}]   ;;  %s91_s1 = inlined_call_operand.vmem [shape: f32[32,128], index: 1, kind: output, shape index: {}]  }
   0x1   :  { %v8_v0 = vld [vmem:[%s90_s0] sm:$0xff]  ;;  %v9_v1 = vld [vmem:[%s90_s0 + $0x8] sm:$0xff]  ;;  %v10_v2 = vld [vmem:[%s90_s0 + $0x10] sm:$0xff] }
   0x2   :  { %v12_v3 = vadd.f32 %v9_v1, %v8_v0  ;;  %v11_v4 = vld [vmem:[%s90_s0 + $0x18] sm:$0xff] }
   0x4   :  { %v13_v5 = vadd.f32 %v12_v3, %v10_v2 }
   0x6   :  { %v14_v6 = vadd.f32 %v13_v5, %v11_v4 }
   0x8   :  { %v15_v7 = vrot.slane %v14_v6, 4 }
   0xa   :  { %v16_v8 = vadd.f32 %v15_v7, %v14_v6 }
   0xc   :  { %v17_v9 = vrot.slane %v16_v8, 2 }
   0xe   :  { %v18_v10 = vadd.f32 %v17_v9, %v16_v8 }
  0x10   :  { %v19_v11 = vrot.slane %v18_v10, 1 }
  0x12   :  { %v20_v12 = vadd.f32 %v19_v11, %v18_v10 }
  0x14   :  { %v21_v13 = vmul.f32 0.03125, %v20_v12 }
  0x16   :  { %v22_v14 = vsub.f32 %v8_v0, %v21_v13  ;;  %v23_v15 = vsub.f32 %v9_v1, %v21_v13  ;;  %v24_v16 = vsub.f32 %v10_v2, %v21_v13  ;;  %v25_v17 = vsub.f32 %v11_v4, %v21_v13 }
  0x18   :  { %v26_v18 = vmul.f32 %v22_v14, %v22_v14  ;;  %v27_v19 = vmul.f32 %v23_v15, %v23_v15  ;;  %v28_v20 = vmul.f32 %v24_v16, %v24_v16  ;;  %v29_v21 = vmul.f32 %v25_v17, %v25_v17 }
  0x1a   :  { %v30_v22 = vadd.f32 %v27_v19, %v26_v18 }
  0x1c   :  { %v31_v23 = vadd.f32 %v30_v22, %v28_v20 }
  0x1e   :  { %v32_v24 = vadd.f32 %v31_v23, %v29_v21 }
  0x20   :  { %v33_v25 = vrot.slane %v32_v24, 4 }
  0x22   :  { %v34_v26 = vadd.f32 %v33_v25, %v32_v24 }
  0x24   :  { %v35_v27 = vrot.slane %v34_v26, 2 }
  0x26   :  { %v36_v28 = vadd.f32 %v35_v27, %v34_v26 }
  0x28   :  { %v37_v29 = vrot.slane %v36_v28, 1 }
  0x2a   :  { %v38_v30 = vadd.f32 %v37_v29, %v36_v28 }
  0x2c   :  { %v39_v31 = vmul.f32 0.03125, %v38_v30 }
  0x2e   :  { %v40_v32 = vadd.f32 1e-10, %v39_v31 }
  0x30   :  { %54 = vrsqrt.f32 %v40_v32 }
  0x3a   :  { %v55_v33 = vpop.eup %54 }
  0x3b   :  { %v42_v34 = vmul.f32 %v55_v33, %v22_v14  ;;  %v43_v35 = vmul.f32 %v55_v33, %v23_v15  ;;  %v44_v36 = vmul.f32 %v55_v33, %v24_v16  ;;  %v45_v37 = vmul.f32 %v55_v33, %v25_v17 }
  0x3d   :  { %46 = vst [vmem:[%s91_s1] sm:$0xff] %v42_v34  ;;  %47 = vst [vmem:[%s91_s1 + $0x8] sm:$0xff] %v43_v35 }
  0x3e   :  { %48 = vst [vmem:[%s91_s1 + $0x10] sm:$0xff] %v44_v36  ;;  %49 = vst [vmem:[%s91_s1 + $0x18] sm:$0xff] %v45_v37 }

// kernel: preact_bottleneck_forward.15
= control target key start
LH: loop header
LB: loop body
LE: loop exit
PB: predicated region body
PF: predicated region fallthrough
CT: control target
= control target key end

     0   :  { %s680_s15 = smov 0   ;;  %s682_s16 = smov 0   ;;  %s748_s0 = inlined_call_operand.vmem [shape: f32[2,1,64], index: 0, kind: input, shape index: {}]   ;;  %s749_s1 = inlined_call_operand.vmem [shape: f32[2,1,64], index: 1, kind: input, shape index: {}]   ;;  %s750_s2 = inlined_call_operand.vmem [shape: f32[2,16,64], index: 2, kind: input, shape index: {}]   ;;  %s751_s3 = inlined_call_operand.vmem [shape: f32[64,128], index: 3, kind: input, shape index: {}]   ;;  %s752_s4 = inlined_call_operand.vmem [shape: f32[2,16,128], index: 4, kind: output, shape index: {}]  }
   0x1   :  { %s684_s17 = smov 0  }
   0x2 LB: > { %s33_s18 = sadd.s32 1, %s649_s16  ;;  %p549_p0 = scmp.ge.s32.totalorder %s653_s17, 1  ;;  %s653_s17 = sphi %s684_s17, %s14_s17   ;;  %s649_s16 = sphi %s682_s16, %s754_s16   ;;  %s645_s15 = sphi %s680_s15, %s753_s15  }
   0x3   : > { %p35_p1 = scmp.ge.s32.totalorder %s33_s18, 2  ;;  %p217_p2 = scmp.lt.s32.totalorder %s653_s17, 3 }
   0x5   : > { %s756_s18 = smov (%p35_p1, %s33_s18), 0  ;;  %p218_p3 = pnand %p549_p0, %p217_p2 }
   0x6   : > { %v319_v0 = vld [vmem:[%s751_s3] sm:$0xff] (!%p218_p3)  ;;  %v320_v1 = vld [vmem:[%s751_s3 + $0x8] sm:$0xff] (!%p218_p3)  ;;  %v321_v2 = vld [vmem:[%s751_s3 + $0x10] sm:$0xff] (!%p218_p3)  ;;  %p264_p4 = scmp.lt.s32.totalorder (!%p218_p3), %s645_s15, 1  ;;  %vm327_vm0 = vcmask (!%p218_p3), 523264  }
   0x7   : > { %221 = sbr.rel (%p218_p3) target bundleno = 240 (0xf0), region = 36  ;;  %v591_v3 = vpack.c.bf16 (!%p218_p3), %v320_v1, %v319_v0  ;;  %v322_v4 = vld [vmem:[%s751_s3 + $0x18] sm:$0xff] (!%p218_p3)  ;;  %v323_v6 = vld [vmem:[%s751_s3 + $0x20] sm:$0xff] (!%p218_p3)  ;;  %v324_v7 = vld [vmem:[%s751_s3 + $0x28] sm:$0xff] (!%p218_p3) }
   0x8   : > { %v595_v5 = vpack.c.bf16 (!%p218_p3), %v322_v4, %v321_v2  ;;  %v599_v8 = vpack.c.bf16 (!%p218_p3), %v324_v7, %v323_v6  ;;  %v325_v10 = vld [vmem:[%s751_s3 + $0x30] sm:$0xff] (!%p218_p3)  ;;  %v326_v11 = vld [vmem:[%s751_s3 + $0x38] sm:$0xff] (!%p218_p3) }
   0x9   : > { %592 = vmatprep.subr.bf16.mxu0 (!%p218_p3), %v591_v3  ;;  %v603_v17 = vpack.c.bf16 (!%p218_p3), %v326_v11, %v325_v10 }
   0xa   : > { %594 = vmatpush3.bf16.msra.mxu0 (!%p218_p3), %v591_v3 }
   0xb   : > { %596 = vmatprep.subr.bf16.mxu0 (!%p218_p3), %v595_v5 }
   0xe   : > { %s758_s15 = smov (!%p264_p4, %s645_s15), 1  ;;  %598 = vmatpush3.bf16.msra.mxu0 %v595_v5 }
   0xf   : > { %s266_s7 = scalar_lea.vmem %s748_s0, %s758_s15  ;;  %s269_s10 = scalar_lea.vmem %s749_s1, %s758_s15  ;;  %600 = vmatprep.subr.bf16.mxu0 %v599_v8 }
  0x10   : > { %s560_s11 = sshll.u32 %s758_s15, 4  ;;  %v554_v9 = vld [vmem:[%s266_s7] ss:$0 sm:$0xff] }
  0x11   : > { %s278_s22 = scalar_lea.vmem %s750_s2, %s560_s11  ;;  %v555_v14 = vld [vmem:[%s269_s10] ss:$0 sm:$0xff]  ;;  %s295_s24 = scalar_lea.vmem %s752_s4, %s560_s11 }
  0x12   : > { %v297_v12 = vld [vmem:[%s278_s22] sm:$0xff]  ;;  %v298_v13 = vld [vmem:[%s278_s22 + $0x8] sm:$0xff]  ;;  %602 = vmatpush3.bf16.msra.mxu0 %v599_v8 }
  0x13   : > { %v306_v15 = vmul.f32 %v554_v9, %v297_v12  ;;  %v307_v16 = vmul.f32 %v554_v9, %v298_v13  ;;  %604 = vmatprep.subr.bf16.mxu0 %v603_v17 }
  0x15   : > { %v315_v18 = vadd.f32 %v555_v14, %v306_v15  ;;  %v316_v19 = vadd.f32 %v555_v14, %v307_v16 }
  0x16   : > { %606 = vmatpush3.bf16.msra.mxu0 %v603_v17 }
  0x17   : > { %v317_v20 = vmax.f32 %v315_v18, 0.0  ;;  %v318_v21 = vmax.f32 %v316_v19, 0.0 }
  0x19   : > { %588 = vmatprep.mubr.msk.f32.mxu0 %vm327_vm0, %v317_v20 }
  0x1a   : > { %589 = vmatmul.mubr.msk.f32.vlgmr.msra.gmra.mrb[0].mxu0 %vm327_vm0, %v318_v21 }
  0xed   : > { %v590_v22 = vpop.f32.mrb[0].mxu0 }
  0xee   : > { %410 = vst [vmem:[%s295_s24 + $0x8] sm:$0xff] %v590_v22  ;;  %v400_v23 = vpop.f32.mrb[1].mxu0 }
  0xef   : > { %409 = vst [vmem:[%s295_s24] sm:$0xff] %v400_v23 }
  0xf0 PF: > { %s14_s17 = sadd.s32 1, %s653_s17   ;;  %s753_s15 = smov %s649_s16 }
  0xf1   : > { %p11_p5 = scmp.ge.s32.totalorder %s14_s17, 4   ;;  %s754_s16 = smov %s756_s18 }
  0xf3   :  { %13 = sbr.rel (!%p11_p5) target bundleno = 2 (0x2), region = 75 }

// kernel: preact_bottleneck_forward.17
= control target key start
LH: loop header
LB: loop body
LE: loop exit
PB: predicated region body
PF: predicated region fallthrough
CT: control target
= control target key end

     0   :  { %10 = vsyncpa [#allocation3], 0  ;;  %s1083_s0 = inlined_call_operand.vmem [shape: f32[2,1,128], index: 0, kind: input, shape index: {}]   ;;  %s1084_s1 = inlined_call_operand.vmem [shape: f32[2,1,128], index: 1, kind: input, shape index: {}]   ;;  %s1085_s2 = inlined_call_operand.vmem [shape: f32[2,16,128], index: 2, kind: input, shape index: {}]   ;;  %s1086_s3 = inlined_call_operand.vmem [shape: f32[128,128], index: 3, kind: input, shape index: {}]   ;;  %s1087_s4 = inlined_call_operand.vmem [shape: f32[2,16,128], index: 4, kind: input, shape index: {}]   ;;  %s1088_s5 = inlined_call_operand.hbm [shape: f32[2,16,128], index: 5, kind: output, shape index: {}]  }
   0x1   :  { %12 = vsyncpa [#allocation3 + $0x1], 0  ;;  %s902_s18 = smov 0   ;;  %s904_s19 = smov 0  }
   0x2   :  { %s906_s20 = smov 0   ;;  %s908_s21 = smov 0  }
   0x3   :  { %s910_s22 = smov 0   ;;  %s912_s23 = smov 0  }
   0x4 LB: > { %s626_s24 = sadd.s32 4294967295, %s867_s23   ;;  %s627_s25 = sadd.s32 4294967294, %s867_s23   ;;  %s867_s23 = sphi %s912_s23, %s18_s23   ;;  %s863_s22 = sphi %s910_s22, %s1095_s22   ;;  %s859_s21 = sphi %s908_s21, %s1094_s21   ;;  %s855_s20 = sphi %s906_s20, %s1093_s20   ;;  %s851_s19 = sphi %s904_s19, %s1092_s19   ;;  %s847_s18 = sphi %s902_s18, %s1091_s18  }
   0x5   : > { %s37_s26 = sadd.s32 1, %s863_s22  ;;  %s184_s27 = sadd.s32 1, %s855_s20 }
   0x6   : > { %p39_p0 = scmp.ge.s32.totalorder %s37_s26, 2  ;;  %p194_p1 = scmp.ne.s32.totalorder %s855_s20, %s851_s19 }
   0x7   : > { %p195_p2 = scmp.eq.s32.totalorder %s626_s24, 1  ;;  %p200_p3 = scmp.ne.s32.totalorder %s851_s19, %s847_s18 }
   0x8   : > { %s1097_s26 = smov (%p39_p0, %s37_s26), 0  ;;  %p201_p5 = scmp.eq.s32.totalorder %s627_s25, 1 }
   0x9   : > { %p942_p4 = por %p195_p2, %p194_p1  ;;  %s177_s29 = ssub.s32 %s863_s22, %s1097_s26 }
   0xa   : > { %p631_p6 = scmp.ge.s32.totalorder %s867_s23, 1  ;;  %p182_p7 = scmp.eq.s32.totalorder %s177_s29, 0 }
   0xb   : > { %p949_p8 = por %p201_p5, %p200_p3  ;;  %p267_p9 = scmp.lt.s32.totalorder %s867_s23, 3 }
   0xc   : > { %s955_s6 = scalar_select %p182_p7, %s855_s20, %s184_s27  }
   0xd   : > { %p268_p10 = pnand %p631_p6, %p267_p9 }
   0xe   : > { %v377_v0 = vld [vmem:[%s1086_s3] sm:$0xff] (!%p268_p10)  ;;  %v378_v1 = vld [vmem:[%s1086_s3 + $0x8] sm:$0xff] (!%p268_p10)  ;;  %v379_v2 = vld [vmem:[%s1086_s3 + $0x10] sm:$0xff] (!%p268_p10)  ;;  %p321_p11 = scmp.lt.s32.totalorder (!%p268_p10), %s859_s21, 1  ;;  %s646_s16 = sshll.u32 (!%p268_p10), %s859_s21, 8 }
   0xf   : > { %271 = sbr.rel (%p268_p10) target bundleno = 279 (0x117), region = 40  ;;  %v700_v3 = vpack.c.bf16 (!%p268_p10), %v378_v1, %v377_v0  ;;  %v380_v4 = vld [vmem:[%s1086_s3 + $0x18] sm:$0xff] (!%p268_p10)  ;;  %v381_v6 = vld [vmem:[%s1086_s3 + $0x20] sm:$0xff] (!%p268_p10)  ;;  %v382_v7 = vld [vmem:[%s1086_s3 + $0x28] sm:$0xff] (!%p268_p10)  ;;  %s1035_s27 = scalar_lea.hbm (!%p268_p10), %s1088_s5, %s646_s16 }
  0x10   : > { %v704_v5 = vpack.c.bf16 (!%p268_p10), %v380_v4, %v379_v2  ;;  %v708_v8 = vpack.c.bf16 (!%p268_p10), %v382_v7, %v381_v6  ;;  %v383_v10 = vld [vmem:[%s1086_s3 + $0x30] sm:$0xff] (!%p268_p10)  ;;  %v384_v11 = vld [vmem:[%s1086_s3 + $0x38] sm:$0xff] (!%p268_p10)  ;;  %v385_v16 = vld [vmem:[%s1086_s3 + $0x40] sm:$0xff] (!%p268_p10)  ;;  %s869_s29 = smov (!%p268_p10), [#allocation2]  }
  0x11   : > { %701 = vmatprep.subr.bf16.mxu0 (!%p268_p10), %v700_v3  ;;  %v712_v15 = vpack.c.bf16 (!%p268_p10), %v384_v11, %v383_v10  ;;  %v386_v17 = vld [vmem:[%s1086_s3 + $0x48] sm:$0xff] (!%p268_p10)  ;;  %v387_v21 = vld [vmem:[%s1086_s3 + $0x50] sm:$0xff] (!%p268_p10)  ;;  %v388_v22 = vld [vmem:[%s1086_s3 + $0x58] sm:$0xff] (!%p268_p10) }
  0x12   : > { %703 = vmatpush3.bf16.msra.mxu0 (!%p268_p10), %v700_v3  ;;  %v716_v20 = vpack.c.bf16 (!%p268_p10), %v386_v17, %v385_v16  ;;  %v720_v23 = vpack.c.bf16 (!%p268_p10), %v388_v22, %v387_v21  ;;  %v389_v24 = vld [vmem:[%s1086_s3 + $0x60] sm:$0xff] (!%p268_p10)  ;;  %v390_v25 = vld [vmem:[%s1086_s3 + $0x68] sm:$0xff] (!%p268_p10)  ;;  %v391_v28 = vld [vmem:[%s1086_s3 + $0x70] sm:$0xff] (!%p268_p10) }
  0x13   : > { %705 = vmatprep.subr.bf16.mxu0 (!%p268_p10), %v704_v5  ;;  %v724_v27 = vpack.c.bf16 (!%p268_p10), %v390_v25, %v389_v24  ;;  %v392_v29 = vld [vmem:[%s1086_s3 + $0x78] sm:$0xff] (!%p268_p10) }
  0x14   : > { %v728_v31 = vpack.c.bf16 (!%p268_p10), %v392_v29, %v391_v28 }
  0x16   : > { %s977_s25 = scalar_select %p321_p11, %s859_s21, 1  ;;  %707 = vmatpush3.bf16.msra.mxu0 %v704_v5 }
  0x17   : > { %709 = vmatprep.subr.bf16.mxu0 %v708_v8 }
  0x18   : > { %s323_s7 = scalar_lea.vmem %s1083_s0, %s977_s25  ;;  %s326_s10 = scalar_lea.vmem %s1084_s1, %s977_s25 }
  0x19   : > { %s644_s11 = sshll.u32 %s977_s25, 4  ;;  %v637_v9 = vld [vmem:[%s323_s7] ss:$0 sm:$0xff]  ;;  %s793_s7 = sshll.u32 %s869_s29, 4  ;;  %s794_s7 = int_to_ptr.vmem [resolvable:$false] %s793_s7 }
  0x1a   : > { %s335_s24 = scalar_lea.vmem %s1085_s2, %s644_s11  ;;  %v638_v13 = vld [vmem:[%s326_s10] ss:$0 sm:$0xff]  ;;  %711 = vmatpush3.bf16.msra.mxu0 %v708_v8  ;;  %s352_s13 = scalar_lea.vmem %s1087_s4, %s644_s11 }
  0x1b   : > { %v355_v12 = vld [vmem:[%s335_s24] sm:$0xff]  ;;  %713 = vmatprep.subr.bf16.mxu0 %v712_v15  ;;  %v356_v26 = vld [vmem:[%s335_s24 + $0x8] sm:$0xff]  ;;  %s318_s24 = sand.u32 1, %s851_s19   ;;  %s795_s8 = scalar_lea.vmem %s794_s7, 512 }
  0x1c   : > { %v364_v14 = vmul.f32 %v637_v9, %v355_v12  ;;  %v365_v30 = vmul.f32 %v637_v9, %v356_v26  ;;  %s632_s9 = sshll.u32 %s318_s24, 4  ;;  %v394_v34 = vld [vmem:[%s352_s13 + $0x8] sm:$0xff]  ;;  %v393_v35 = vld [vmem:[%s352_s13] sm:$0xff]  ;;  %s1037_s11 = scalar_lea.sflag [#allocation3], %s318_s24 }
  0x1d   : > { %s320_s14 = scalar_lea.vmem [#allocation2], %s632_s9 }
  0x1e   : > { %v373_v18 = vadd.f32 %v638_v13, %v364_v14  ;;  %715 = vmatpush3.bf16.msra.mxu0 %v712_v15  ;;  %v374_v32 = vadd.f32 %v638_v13, %v365_v30  ;;  %s489_s15 = sshll.u32 %s320_s14, 4  ;;  %s1030_s15 = int_to_ptr.vmem [resolvable:$true] %s489_s15 }
  0x1f   : > { %717 = vmatprep.subr.bf16.mxu0 %v716_v20  ;;  %s789_s21 = scalar_lea.vmem %s1030_s15, 256  ;;  %p796_p1 = scmp.lt.s32.totalorder %s1030_s15, %s794_s7 }
  0x20   : > { %v375_v19 = vmax.f32 %v373_v18, 0.0  ;;  %v376_v33 = vmax.f32 %v374_v32, 0.0  ;;  %p790_p12 = scmp.ne.s32.totalorder %s1030_s15, %s789_s21  ;;  %p797_p2 = scmp.lt.s32.totalorder %s795_s8, %s789_s21 }
  0x22   : > { %697 = vmatprep.mubr.f32.mxu0 %v375_v19  ;;  %719 = vmatpush3.bf16.msra.mxu0 %v716_v20  ;;  %p791_p13 = pnand %p790_p12, %p942_p4  ;;  %p798_p3 = por %p797_p2, %p796_p1 }
  0x23   : > { %721 = vmatprep.subr.bf16.mxu0 %v720_v23 }
  0x24   : > { %p792_p0 = pneg %p791_p13 }
  0x26   : > { %723 = vmatpush3.bf16.msra.mxu0 %v720_v23  ;;  %p799_p5 = pnand %p798_p3, %p792_p0 }
  0x27   : > { %725 = vmatprep.subr.bf16.mxu0 %v724_v27 }
  0x2a   : > { %727 = vmatpush3.bf16.msra.mxu0 %v724_v27 }
  0x2b   : > { %729 = vmatprep.subr.bf16.mxu0 %v728_v31 }
  0x2e   : > { %731 = vmatpush3.bf16.msra.mxu0 %v728_v31 }
  0x31   : > { %698 = vmatmul.mubr.f32.vlgmr.msra.gmra.mrb[0].mxu0 %v376_v33 }
 0x104   : > { %v699_v36 = vpop.f32.mrb[0].mxu0 }
 0x105   : > { %v467_v37 = vadd.f32 %v699_v36, %v394_v34  ;;  %v461_v38 = vpop.f32.mrb[1].mxu0 }
 0x106   : > { %v462_v39 = vadd.f32 %v461_v38, %v393_v35 }
 0x107   : > { %471 = vst [vmem:[%s320_s14 + $0x8] sm:$0xff] %v467_v37 }
 0x108   : > { %470 = vst [vmem:[%s320_s14] sm:$0xff] %v462_v39 }
 0x109   : > { %802 = shalt.err (!%p799_p5)
}
 0x10a   : > { %s803_s24 = scalar_lea.hbm %s1035_s27, 256  ;;  %s807_s10 = scalar_lea.hbm %s1088_s5, 512 }
 0x10b   : > { %p804_p6 = scmp.ne.s32.totalorder %s1035_s27, %s803_s24  ;;  %p808_p10 = scmp.lt.u32.totalorder %s1035_s27, %s1088_s5 }
 0x10c   : > { %p809_p11 = scmp.lt.u32.totalorder %s807_s10, %s803_s24  ;;  %p811_p13 = scmp.lt.u32.totalorder %s803_s24, %s1035_s27 }
 0x10d   : > { %p805_p7 = pnand %p804_p6, %p942_p4 }
 0x10e   : > { %p810_p12 = por %p809_p11, %p808_p10 }
 0x10f   : > { %p806_p9 = pneg %p805_p7 }
 0x110   : > { %p812_p0 = por %p811_p13, %p810_p12 }
 0x112   : > { %p813_p1 = pnand %p812_p0, %p806_p9 }
 0x114   : > { %816 = shalt.err (!%p813_p1)
}
 0x115   : > { %s870_s16 = smov 128   ;;  %s871_s17 = smov 8  }
 0x116   : > { %732 = dma.vmem_to_hbm [thread:$0]  (%p942_p4), %s1030_s15, 256, %s1035_s27, %s1037_s11, %s870_s16, %s870_s16, %s871_s17  }
 0x117 PF: > { %p738_p2 = scmp.ge.s32.totalorder %s867_s23, 2  ;;  %s504_s25 = sand.u32 1, %s847_s18  }
 0x118   : > { %s505_s21 = scalar_lea.sflag [#allocation3], %s504_s25 }
 0x119   : > { %p735_p3 = pnand %p738_p2, %p949_p8 }
 0x11b   : > { %842 = dma.done.wait (!%p735_p3), %s505_s21, 256  }
 0x11c   : > { %844 = vsyncadd (!%p735_p3), %s505_s21, 4294967040  ;;  %s18_s23 = sadd.s32 1, %s867_s23   ;;  %s1091_s18 = smov %s851_s19 }
 0x11d   : > { %p15_p5 = scmp.ge.s32.totalorder %s18_s23, 4   ;;  %s1092_s19 = smov %s855_s20 }
 0x11e   : > { %s1093_s20 = smov %s955_s6  ;;  %s1094_s21 = smov %s863_s22 }
 0x11f   : > { %s1095_s22 = smov %s1097_s26  ;;  %17 = sbr.rel (!%p15_p5) target bundleno = 4 (0x4), region = 87 }
 0x126   :  { %510 = vsyncpa [#allocation3], 1 }
 0x127   :  { %512 = vsyncpa [#allocation3 + $0x1], 1 }

// kernel: preact_bottleneck_forward.16
= control target key start
LH: loop header
LB: loop body
LE: loop exit
PB: predicated region body
PF: predicated region fallthrough
CT: control target
= control target key end

     0   :  { %s2436_s15 = smov 0   ;;  %s2438_s16 = smov 0   ;;  %s2943_s0 = inlined_call_operand.vmem [shape: f32[2,4,5,5,128], index: 0, kind: input, shape index: {}]   ;;  %s2944_s1 = inlined_call_operand.vmem [shape: f32[1152,128], index: 1, kind: input, shape index: {}]   ;;  %s2945_s2 = inlined_call_operand.vmem [shape: f32[2,4,4,128], index: 2, kind: output, shape index: {0}]   ;;  %s2946_s3 = inlined_call_operand.vmem [shape: f32[2,1,128], index: 3, kind: output, shape index: {1}]   ;;  %s2947_s4 = inlined_call_operand.vmem [shape: f32[2,1,128], index: 4, kind: output, shape index: {2}]  }
   0x1   :  { %s2440_s17 = smov 0  }
   0x2 LB: > { %s34_s18 = sadd.s32 1, %s2404_s16  ;;  %p1526_p0 = scmp.ge.s32.totalorder %s2408_s17, 1  ;;  %s2408_s17 = sphi %s2440_s17, %s15_s17   ;;  %s2404_s16 = sphi %s2438_s16, %s2949_s16   ;;  %s2400_s15 = sphi %s2436_s15, %s2948_s15  }
   0x3   : > { %p36_p1 = scmp.ge.s32.totalorder %s34_s18, 2  ;;  %p203_p2 = scmp.lt.s32.totalorder %s2408_s17, 3 }
   0x5   : > { %s2951_s18 = smov (%p36_p1, %s34_s18), 0  ;;  %p204_p3 = pnand %p1526_p0, %p203_p2 }
   0x6   : > { %v297_v0 = vld [vmem:[%s2944_s1] sm:$0xff] (!%p204_p3)  ;;  %v298_v1 = vld [vmem:[%s2944_s1 + $0x8] sm:$0xff] (!%p204_p3)  ;;  %p252_p4 = scmp.lt.s32.totalorder (!%p204_p3), %s2400_s15, 1  ;;  %v299_v5 = vld [vmem:[%s2944_s1 + $0x10] sm:$0xff] (!%p204_p3) }
   0x7   : > { %207 = sbr.rel (%p204_p3) target bundleno = 404 (0x194), region = 28  ;;  %v739_v2 = vld [vmem:[%s2944_s1 + $0x200] sm:$0xff] (!%p204_p3)  ;;  %v2038_v3 = vpack.c.bf16 (!%p204_p3), %v298_v1, %v297_v0  ;;  %v740_v4 = vld [vmem:[%s2944_s1 + $0x208] sm:$0xff] (!%p204_p3)  ;;  %v300_v6 = vld [vmem:[%s2944_s1 + $0x18] sm:$0xff] (!%p204_p3) }
   0x8   : > { %v2166_v7 = vpack.c.bf16 (!%p204_p3), %v740_v4, %v739_v2  ;;  %v2042_v8 = vpack.c.bf16 (!%p204_p3), %v300_v6, %v299_v5  ;;  %v741_v9 = vld [vmem:[%s2944_s1 + $0x210] sm:$0xff] (!%p204_p3)  ;;  %v742_v10 = vld [vmem:[%s2944_s1 + $0x218] sm:$0xff] (!%p204_p3)  ;;  %v301_v11 = vld [vmem:[%s2944_s1 + $0x20] sm:$0xff] (!%p204_p3) }
   0x9   : > { %2039 = vmatprep.subr.bf16.mxu1 (!%p204_p3), %v2038_v3  ;;  %v2170_v12 = vpack.c.bf16 (!%p204_p3), %v742_v10, %v741_v9  ;;  %v302_v13 = vld [vmem:[%s2944_s1 + $0x28] sm:$0xff] (!%p204_p3)  ;;  %v743_v14 = vld [vmem:[%s2944_s1 + $0x220] sm:$0xff] (!%p204_p3)  ;;  %v303_v18 = vld [vmem:[%s2944_s1 + $0x30] sm:$0xff] (!%p204_p3) }
   0xa   : > { %v744_v15 = vld [vmem:[%s2944_s1 + $0x228] sm:$0xff] (!%p204_p3)  ;;  %2167 = vmatprep.subr.bf16.mxu0 (!%p204_p3), %v2166_v7  ;;  %2041 = vmatpush3.bf16.msra.mxu1 (!%p204_p3), %v2038_v3  ;;  %v2046_v16 = vpack.c.bf16 (!%p204_p3), %v302_v13, %v301_v11  ;;  %v304_v19 = vld [vmem:[%s2944_s1 + $0x38] sm:$0xff] (!%p204_p3)  ;;  %v745_v20 = vld [vmem:[%s2944_s1 + $0x230] sm:$0xff] (!%p204_p3) }
   0xb   : > { %2169 = vmatpush3.bf16.msra.mxu0 (!%p204_p3), %v2166_v7  ;;  %2043 = vmatprep.subr.bf16.mxu1 (!%p204_p3), %v2042_v8  ;;  %v2174_v17 = vpack.c.bf16 (!%p204_p3), %v744_v15, %v743_v14  ;;  %v746_v21 = vld [vmem:[%s2944_s1 + $0x238] sm:$0xff] (!%p204_p3)  ;;  %v2050_v22 = vpack.c.bf16 (!%p204_p3), %v304_v19, %v303_v18  ;;  %v305_v23 = vld [vmem:[%s2944_s1 + $0x40] sm:$0xff] (!%p204_p3)  ;;  %v306_v25 = vld [vmem:[%s2944_s1 + $0x48] sm:$0xff] (!%p204_p3) }
   0xc   : > { %2171 = vmatprep.subr.bf16.mxu0 (!%p204_p3), %v2170_v12  ;;  %v2178_v24 = vpack.c.bf16 (!%p204_p3), %v746_v21, %v745_v20  ;;  %v747_v26 = vld [vmem:[%s2944_s1 + $0x240] sm:$0xff] (!%p204_p3)  ;;  %v748_v27 = vld [vmem:[%s2944_s1 + $0x248] sm:$0xff] (!%p204_p3)  ;;  %v2054_v29 = vpack.c.bf16 (!%p204_p3), %v306_v25, %v305_v23  ;;  %v307_v30 = vld [vmem:[%s2944_s1 + $0x50] sm:$0xff] (!%p204_p3) }
   0xd   : > { %v308_v31 = vld [vmem:[%s2944_s1 + $0x58] sm:$0xff] (!%p204_p3)  ;;  %v2182_v33 = vpack.c.bf16 (!%p204_p3), %v748_v27, %v747_v26  ;;  %v749_v34 = vld [vmem:[%s2944_s1 + $0x250] sm:$0xff] (!%p204_p3)  ;;  %v309_v38 = vld [vmem:[%s2944_s1 + $0x60] sm:$0xff] (!%p204_p3) }
   0xe   : > { %s2953_s15 = smov (!%p252_p4, %s2400_s15), 1  ;;  %2045 = vmatpush3.bf16.msra.mxu1 %v2042_v8  ;;  %v750_v35 = vld [vmem:[%s2944_s1 + $0x258] sm:$0xff]  ;;  %v2058_v36 = vpack.c.bf16 %v308_v31, %v307_v30  ;;  %v310_v39 = vld [vmem:[%s2944_s1 + $0x68] sm:$0xff]  ;;  %v751_v40 = vld [vmem:[%s2944_s1 + $0x260] sm:$0xff] }
   0xf   : > { %s2342_s21 = smul.u32 160, %s2953_s15  ;;  %2173 = vmatpush3.bf16.msra.mxu0 %v2170_v12  ;;  %2047 = vmatprep.subr.bf16.mxu1 %v2046_v16  ;;  %v2186_v37 = vpack.c.bf16 %v750_v35, %v749_v34  ;;  %v752_v41 = vld [vmem:[%s2944_s1 + $0x268] sm:$0xff]  ;;  %v2062_v42 = vpack.c.bf16 %v310_v39, %v309_v38  ;;  %v311_v44 = vld [vmem:[%s2944_s1 + $0x70] sm:$0xff]  ;;  %v312_v45 = vld [vmem:[%s2944_s1 + $0x78] sm:$0xff]  ;;  %s2916_s13 = scalar_lea.vmem %s2946_s3, %s2953_s15 }
  0x10   : > { %2175 = vmatprep.subr.bf16.mxu0 %v2174_v17  ;;  %v2190_v43 = vpack.c.bf16 %v752_v41, %v751_v40  ;;  %v753_v46 = vld [vmem:[%s2944_s1 + $0x270] sm:$0xff]  ;;  %v754_v47 = vld [vmem:[%s2944_s1 + $0x278] sm:$0xff]  ;;  %v2066_v48 = vpack.c.bf16 %v312_v45, %v311_v44  ;;  %v408_v50 = vld [vmem:[%s2944_s1 + $0x80] sm:$0xff]  ;;  %s2922_s20 = scalar_lea.vmem %s2947_s4, %s2953_s15 }
  0x11   : > { %s2508_s6 = scalar_lea.vmem %s2943_s0, %s2342_s21  ;;  %v2194_v49 = vpack.c.bf16 %v754_v47, %v753_v46  ;;  %v409_v51 = vld [vmem:[%s2944_s1 + $0x88] sm:$0xff]  ;;  %v848_v52 = vld [vmem:[%s2944_s1 + $0x280] sm:$0xff]  ;;  %v410_v56 = vld [vmem:[%s2944_s1 + $0x90] sm:$0xff] }
  0x12   : > { %v2368_v28 = vld [vmem:[%s2508_s6] ss:$8 sps:$4 sm:$0xff]   ;;  %2049 = vmatpush3.bf16.msra.mxu1 %v2046_v16  ;;  %v2070_v54 = vpack.c.bf16 %v409_v51, %v408_v50  ;;  %v411_v57 = vld [vmem:[%s2944_s1 + $0x98] sm:$0xff]  ;;  %v850_v59 = vld [vmem:[%s2944_s1 + $0x290] sm:$0xff] }
  0x13   : > { %2177 = vmatpush3.bf16.msra.mxu0 %v2174_v17  ;;  %2051 = vmatprep.subr.bf16.mxu1 %v2050_v22  ;;  %v2369_v32 = vld [vmem:[%s2508_s6 + $0x78] ss:$8 sps:$4 sm:$0xff]   ;;  %v849_v53 = vld [vmem:[%s2944_s1 + $0x288] sm:$0xff]  ;;  %v2074_v62 = vpack.c.bf16 %v411_v57, %v410_v56  ;;  %v414_v8 = vld [vmem:[%s2944_s1 + $0xb0] sm:$0xff] }
  0x14   : > { %2179 = vmatprep.subr.bf16.mxu0 %v2178_v24  ;;  %1755 = vmatprep.mubr.f32.mxu1 %v2368_v28  ;;  %v2198_v55 = vpack.c.bf16 %v849_v53, %v848_v52  ;;  %v2370_v58 = vld [vmem:[%s2508_s6 + $0x10] ss:$8 sps:$4 sm:$0xff]   ;;  %v412_v0 = vld [vmem:[%s2944_s1 + $0xa0] sm:$0xff]  ;;  %v413_v1 = vld [vmem:[%s2944_s1 + $0xa8] sm:$0xff] }
  0x15   : > { %1895 = vmatprep.mubr.f32.mxu0 %v2369_v32  ;;  %v851_v60 = vld [vmem:[%s2944_s1 + $0x298] sm:$0xff]  ;;  %v2371_v61 = vld [vmem:[%s2508_s6 + $0x88] ss:$8 sps:$4 sm:$0xff]   ;;  %v852_v3 = vld [vmem:[%s2944_s1 + $0x2a0] sm:$0xff]  ;;  %v2078_v6 = vpack.c.bf16 %v413_v1, %v412_v0 }
  0x16   : > { %2053 = vmatpush3.bf16.msra.mxu1 %v2050_v22  ;;  %v2202_v63 = vpack.c.bf16 %v851_v60, %v850_v59  ;;  %v2372_v2 = vld [vmem:[%s2508_s6 + $0x28] ss:$8 sps:$4 sm:$0xff]   ;;  %v415_v9 = vld [vmem:[%s2944_s1 + $0xb8] sm:$0xff]  ;;  %v416_v13 = vld [vmem:[%s2944_s1 + $0xc0] sm:$0xff] }
  0x17   : > { %2181 = vmatpush3.bf16.msra.mxu0 %v2178_v24  ;;  %2055 = vmatprep.subr.bf16.mxu1 %v2054_v29  ;;  %v853_v4 = vld [vmem:[%s2944_s1 + $0x2a8] sm:$0xff]  ;;  %v2373_v5 = vld [vmem:[%s2508_s6 + $0x51] ss:$8 sps:$4 sm:$0xff]   ;;  %v2082_v12 = vpack.c.bf16 %v415_v9, %v414_v8  ;;  %v856_v16 = vld [vmem:[%s2944_s1 + $0x2c0] sm:$0xff] }
  0x18   : > { %2183 = vmatprep.subr.bf16.mxu0 %v2182_v33  ;;  %v2206_v7 = vpack.c.bf16 %v853_v4, %v852_v3  ;;  %v854_v10 = vld [vmem:[%s2944_s1 + $0x2b0] sm:$0xff]  ;;  %v855_v11 = vld [vmem:[%s2944_s1 + $0x2b8] sm:$0xff]  ;;  %v417_v15 = vld [vmem:[%s2944_s1 + $0xc8] sm:$0xff] }
  0x19   : > { %v2210_v14 = vpack.c.bf16 %v855_v11, %v854_v10  ;;  %v857_v17 = vld [vmem:[%s2944_s1 + $0x2c8] sm:$0xff]  ;;  %v2086_v18 = vpack.c.bf16 %v417_v15, %v416_v13  ;;  %v418_v20 = vld [vmem:[%s2944_s1 + $0xd0] sm:$0xff]  ;;  %v419_v21 = vld [vmem:[%s2944_s1 + $0xd8] sm:$0xff] }
  0x1a   : > { %2057 = vmatpush3.bf16.msra.mxu1 %v2054_v29  ;;  %v2214_v19 = vpack.c.bf16 %v857_v17, %v856_v16  ;;  %v858_v22 = vld [vmem:[%s2944_s1 + $0x2d0] sm:$0xff]  ;;  %v859_v23 = vld [vmem:[%s2944_s1 + $0x2d8] sm:$0xff]  ;;  %v2090_v24 = vpack.c.bf16 %v419_v21, %v418_v20  ;;  %v420_v26 = vld [vmem:[%s2944_s1 + $0xe0] sm:$0xff] }
  0x1b   : > { %2185 = vmatpush3.bf16.msra.mxu0 %v2182_v33  ;;  %2059 = vmatprep.subr.bf16.mxu1 %v2058_v36  ;;  %v2218_v25 = vpack.c.bf16 %v859_v23, %v858_v22  ;;  %v421_v27 = vld [vmem:[%s2944_s1 + $0xe8] sm:$0xff]  ;;  %v860_v28 = vld [vmem:[%s2944_s1 + $0x2e0] sm:$0xff]  ;;  %v422_v31 = vld [vmem:[%s2944_s1 + $0xf0] sm:$0xff] }
  0x1c   : > { %2187 = vmatprep.subr.bf16.mxu0 %v2186_v37  ;;  %v861_v29 = vld [vmem:[%s2944_s1 + $0x2e8] sm:$0xff]  ;;  %v2094_v30 = vpack.c.bf16 %v421_v27, %v420_v26  ;;  %v423_v33 = vld [vmem:[%s2944_s1 + $0xf8] sm:$0xff]  ;;  %v862_v34 = vld [vmem:[%s2944_s1 + $0x2f0] sm:$0xff] }
  0x1d   : > { %v2222_v32 = vpack.c.bf16 %v861_v29, %v860_v28  ;;  %v863_v35 = vld [vmem:[%s2944_s1 + $0x2f8] sm:$0xff]  ;;  %v518_v39 = vld [vmem:[%s2944_s1 + $0x108] sm:$0xff]  ;;  %v960_v40 = vld [vmem:[%s2944_s1 + $0x300] sm:$0xff] }
  0x1e   : > { %2061 = vmatpush3.bf16.msra.mxu1 %v2058_v36  ;;  %v2098_v36 = vpack.c.bf16 %v423_v33, %v422_v31  ;;  %v2226_v38 = vpack.c.bf16 %v863_v35, %v862_v34  ;;  %v961_v41 = vld [vmem:[%s2944_s1 + $0x308] sm:$0xff]  ;;  %v519_v44 = vld [vmem:[%s2944_s1 + $0x110] sm:$0xff]  ;;  %v520_v45 = vld [vmem:[%s2944_s1 + $0x118] sm:$0xff] }
  0x1f   : > { %2189 = vmatpush3.bf16.msra.mxu0 %v2186_v37  ;;  %2063 = vmatprep.subr.bf16.mxu1 %v2062_v42  ;;  %v517_v37 = vld [vmem:[%s2944_s1 + $0x100] sm:$0xff]  ;;  %v962_v47 = vld [vmem:[%s2944_s1 + $0x310] sm:$0xff]  ;;  %v2106_v50 = vpack.c.bf16 %v520_v45, %v519_v44  ;;  %v522_v53 = vld [vmem:[%s2944_s1 + $0x128] sm:$0xff] }
  0x20   : > { %2191 = vmatprep.subr.bf16.mxu0 %v2190_v43  ;;  %v2374_v46 = vld [vmem:[%s2508_s6 + $0x38] ss:$8 sps:$4 sm:$0xff]   ;;  %v965_v56 = vld [vmem:[%s2944_s1 + $0x328] sm:$0xff]  ;;  %v523_v60 = vld [vmem:[%s2944_s1 + $0x130] sm:$0xff] }
  0x21   : > { %v521_v52 = vld [vmem:[%s2944_s1 + $0x120] sm:$0xff]  ;;  %v2377_v57 = vld [vmem:[%s2508_s6 + $0x8] ss:$8 sps:$4 sm:$0xff]   ;;  %v528_v9 = vld [vmem:[%s2944_s1 + $0x158] sm:$0xff] }
  0x22   : > { %2065 = vmatpush3.bf16.msra.mxu1 %v2062_v42  ;;  %v2102_v42 = vpack.c.bf16 %v518_v39, %v517_v37  ;;  %v526_v3 = vld [vmem:[%s2944_s1 + $0x148] sm:$0xff]  ;;  %v968_v4 = vld [vmem:[%s2944_s1 + $0x340] sm:$0xff]  ;;  %v527_v8 = vld [vmem:[%s2944_s1 + $0x150] sm:$0xff] }
  0x23   : > { %2193 = vmatpush3.bf16.msra.mxu0 %v2190_v43  ;;  %2067 = vmatprep.subr.bf16.mxu1 %v2066_v48  ;;  %v2230_v43 = vpack.c.bf16 %v961_v41, %v960_v40  ;;  %v970_v10 = vld [vmem:[%s2944_s1 + $0x350] sm:$0xff]  ;;  %v971_v11 = vld [vmem:[%s2944_s1 + $0x358] sm:$0xff]  ;;  %v530_v15 = vld [vmem:[%s2944_s1 + $0x168] sm:$0xff] }
  0x24   : > { %2195 = vmatprep.subr.bf16.mxu0 %v2194_v49  ;;  %v2250_v13 = vpack.c.bf16 %v971_v11, %v970_v10  ;;  %v972_v16 = vld [vmem:[%s2944_s1 + $0x360] sm:$0xff]  ;;  %v973_v17 = vld [vmem:[%s2944_s1 + $0x368] sm:$0xff]  ;;  %v531_v20 = vld [vmem:[%s2944_s1 + $0x170] sm:$0xff] }
  0x25   : > { %v532_v21 = vld [vmem:[%s2944_s1 + $0x178] sm:$0xff]  ;;  %v974_v22 = vld [vmem:[%s2944_s1 + $0x370] sm:$0xff]  ;;  %v628_v26 = vld [vmem:[%s2944_s1 + $0x180] sm:$0xff] }
  0x26   : > { %2069 = vmatpush3.bf16.msra.mxu1 %v2066_v48  ;;  %v963_v48 = vld [vmem:[%s2944_s1 + $0x318] sm:$0xff]  ;;  %v629_v27 = vld [vmem:[%s2944_s1 + $0x188] sm:$0xff]  ;;  %v1071_v28 = vld [vmem:[%s2944_s1 + $0x380] sm:$0xff] }
  0x27   : > { %2197 = vmatpush3.bf16.msra.mxu0 %v2194_v49  ;;  %2071 = vmatprep.subr.bf16.mxu1 %v2070_v54  ;;  %v2375_v49 = vld [vmem:[%s2508_s6 + $0x61] ss:$8 sps:$4 sm:$0xff]   ;;  %v2234_v51 = vpack.c.bf16 %v963_v48, %v962_v47  ;;  %v975_v23 = vld [vmem:[%s2944_s1 + $0x378] sm:$0xff]  ;;  %v1073_v35 = vld [vmem:[%s2944_s1 + $0x390] sm:$0xff] }
  0x28   : > { %2199 = vmatprep.subr.bf16.mxu0 %v2198_v55  ;;  %v1072_v29 = vld [vmem:[%s2944_s1 + $0x388] sm:$0xff]  ;;  %v631_v33 = vld [vmem:[%s2944_s1 + $0x198] sm:$0xff]  ;;  %v632_v40 = vld [vmem:[%s2944_s1 + $0x1a0] sm:$0xff] }
  0x29   : > { %1756 = vmatmul.mubr.f32.vlgmr.msra.gmra.mrb[0].mxu1 %v2370_v58  ;;  %v2110_v58 = vpack.c.bf16 %v522_v53, %v521_v52  ;;  %v2262_v31 = vpack.c.bf16 %v1072_v29, %v1071_v28  ;;  %v2378_v34 = vld [vmem:[%s2508_s6 + $0x11] ss:$8 sps:$4 sm:$0xff]   ;;  %v633_v41 = vld [vmem:[%s2944_s1 + $0x1a8] sm:$0xff]  ;;  %v1188_v29 = vld [vmem:[%s2944_s1 + $0x440] sm:$0xff] }
  0x2a   : > { %2073 = vmatpush3.bf16.msra.mxu1 %v2070_v54  ;;  %1896 = vmatmul.mubr.f32.vlgmr.msra.gmra.mrb[0].mxu0 %v2371_v61  ;;  %v2376_v54 = vld [vmem:[%s2508_s6 + $0x1] ss:$8 sps:$4 sm:$0xff]   ;;  %v524_v61 = vld [vmem:[%s2944_s1 + $0x138] sm:$0xff]  ;;  %v634_v48 = vld [vmem:[%s2944_s1 + $0x1b0] sm:$0xff] }
  0x2b   : > { %2201 = vmatpush3.bf16.msra.mxu0 %v2198_v55  ;;  %2075 = vmatprep.subr.bf16.mxu1 %v2074_v62  ;;  %v964_v55 = vld [vmem:[%s2944_s1 + $0x320] sm:$0xff]  ;;  %v2114_v0 = vpack.c.bf16 %v524_v61, %v523_v60  ;;  %v1076_v44 = vld [vmem:[%s2944_s1 + $0x3a8] sm:$0xff]  ;;  %v2382_v45 = vld [vmem:[%s2508_s6 + $0x30] ss:$8 sps:$4 sm:$0xff]  }
  0x2c   : > { %2203 = vmatprep.subr.bf16.mxu0 %v2202_v63  ;;  %1790 = vmatprep.mubr.f32.mxu1 %v2372_v2  ;;  %v2238_v59 = vpack.c.bf16 %v965_v56, %v964_v55  ;;  %v525_v2 = vld [vmem:[%s2944_s1 + $0x140] sm:$0xff]  ;;  %v637_v55 = vld [vmem:[%s2944_s1 + $0x1c8] sm:$0xff]  ;;  %v638_v60 = vld [vmem:[%s2944_s1 + $0x1d0] sm:$0xff] }
  0x2d   : > { %1930 = vmatprep.mubr.f32.mxu0 %v2373_v5  ;;  %v969_v5 = vld [vmem:[%s2944_s1 + $0x348] sm:$0xff]  ;;  %v2379_v37 = vld [vmem:[%s2508_s6 + $0x18] ss:$8 sps:$4 sm:$0xff]   ;;  %v1085_v10 = vld [vmem:[%s2944_s1 + $0x3f0] sm:$0xff] }
  0x2e   : > { %2077 = vmatpush3.bf16.msra.mxu1 %v2074_v62  ;;  %v966_v62 = vld [vmem:[%s2944_s1 + $0x330] sm:$0xff]  ;;  %v1079_v56 = vld [vmem:[%s2944_s1 + $0x3c0] sm:$0xff]  ;;  %v639_v61 = vld [vmem:[%s2944_s1 + $0x1d8] sm:$0xff] }
  0x2f   : > { %2205 = vmatpush3.bf16.msra.mxu0 %v2202_v63  ;;  %2079 = vmatprep.subr.bf16.mxu1 %v2078_v6  ;;  %v967_v63 = vld [vmem:[%s2944_s1 + $0x338] sm:$0xff] }
  0x30   : > { %2207 = vmatprep.subr.bf16.mxu0 %v2206_v7  ;;  %v2242_v1 = vpack.c.bf16 %v967_v63, %v966_v62  ;;  %v1081_v62 = vld [vmem:[%s2944_s1 + $0x3d0] sm:$0xff]  ;;  %v1082_v63 = vld [vmem:[%s2944_s1 + $0x3d8] sm:$0xff] }
  0x31   : > { %v1086_v11 = vld [vmem:[%s2944_s1 + $0x3f8] sm:$0xff] }
  0x32   : > { %2081 = vmatpush3.bf16.msra.mxu1 %v2078_v6  ;;  %v2118_v6 = vpack.c.bf16 %v526_v3, %v525_v2  ;;  %v640_v2 = vld [vmem:[%s2944_s1 + $0x1e0] sm:$0xff]  ;;  %v641_v3 = vld [vmem:[%s2944_s1 + $0x1e8] sm:$0xff] }
  0x33   : > { %2209 = vmatpush3.bf16.msra.mxu0 %v2206_v7  ;;  %2083 = vmatprep.subr.bf16.mxu1 %v2082_v12  ;;  %v2246_v7 = vpack.c.bf16 %v969_v5, %v968_v4  ;;  %v1083_v4 = vld [vmem:[%s2944_s1 + $0x3e0] sm:$0xff]  ;;  %v1084_v5 = vld [vmem:[%s2944_s1 + $0x3e8] sm:$0xff] }
  0x34   : > { %2211 = vmatprep.subr.bf16.mxu0 %v2210_v14 }
  0x36   : > { %2085 = vmatpush3.bf16.msra.mxu1 %v2082_v12  ;;  %v2122_v12 = vpack.c.bf16 %v528_v9, %v527_v8  ;;  %v642_v8 = vld [vmem:[%s2944_s1 + $0x1f0] sm:$0xff]  ;;  %v643_v9 = vld [vmem:[%s2944_s1 + $0x1f8] sm:$0xff] }
  0x37   : > { %2213 = vmatpush3.bf16.msra.mxu0 %v2210_v14  ;;  %2087 = vmatprep.subr.bf16.mxu1 %v2086_v18  ;;  %v529_v14 = vld [vmem:[%s2944_s1 + $0x160] sm:$0xff] }
  0x38   : > { %2215 = vmatprep.subr.bf16.mxu0 %v2214_v19 }
  0x3a   : > { %2089 = vmatpush3.bf16.msra.mxu1 %v2086_v18  ;;  %v2126_v18 = vpack.c.bf16 %v530_v15, %v529_v14  ;;  %v1180_v14 = vld [vmem:[%s2944_s1 + $0x400] sm:$0xff]  ;;  %v1181_v15 = vld [vmem:[%s2944_s1 + $0x408] sm:$0xff] }
  0x3b   : > { %2217 = vmatpush3.bf16.msra.mxu0 %v2214_v19  ;;  %2091 = vmatprep.subr.bf16.mxu1 %v2090_v24  ;;  %v2254_v19 = vpack.c.bf16 %v973_v17, %v972_v16  ;;  %v2294_v16 = vpack.c.bf16 %v1181_v15, %v1180_v14  ;;  %v2381_v17 = vld [vmem:[%s2508_s6 + $0x60] ss:$8 sps:$4 sm:$0xff]  }
  0x3c   : > { %2219 = vmatprep.subr.bf16.mxu0 %v2218_v25 }
  0x3e   : > { %2093 = vmatpush3.bf16.msra.mxu1 %v2090_v24  ;;  %v2130_v24 = vpack.c.bf16 %v532_v21, %v531_v20  ;;  %v2383_v20 = vld [vmem:[%s2508_s6 + $0x40] ss:$8 sps:$4 sm:$0xff]  }
  0x3f   : > { %2221 = vmatpush3.bf16.msra.mxu0 %v2218_v25  ;;  %2095 = vmatprep.subr.bf16.mxu1 %v2094_v30  ;;  %v2258_v25 = vpack.c.bf16 %v975_v23, %v974_v22  ;;  %v2384_v21 = vld [vmem:[%s2508_s6 + $0x9] ss:$8 sps:$4 sm:$0xff]   ;;  %v1184_v23 = vld [vmem:[%s2944_s1 + $0x420] sm:$0xff] }
  0x40   : > { %2223 = vmatprep.subr.bf16.mxu0 %v2222_v32 }
  0x42   : > { %2097 = vmatpush3.bf16.msra.mxu1 %v2094_v30  ;;  %v2134_v30 = vpack.c.bf16 %v629_v27, %v628_v26  ;;  %v1186_v26 = vld [vmem:[%s2944_s1 + $0x430] sm:$0xff]  ;;  %v1187_v27 = vld [vmem:[%s2944_s1 + $0x438] sm:$0xff] }
  0x43   : > { %2225 = vmatpush3.bf16.msra.mxu0 %v2222_v32  ;;  %2099 = vmatprep.subr.bf16.mxu1 %v2098_v36  ;;  %v630_v32 = vld [vmem:[%s2944_s1 + $0x190] sm:$0xff]  ;;  %v2306_v28 = vpack.c.bf16 %v1187_v27, %v1186_v26 }
  0x44   : > { %2227 = vmatprep.subr.bf16.mxu0 %v2226_v38 }
  0x46   : > { %2101 = vmatpush3.bf16.msra.mxu1 %v2098_v36  ;;  %v1074_v36 = vld [vmem:[%s2944_s1 + $0x398] sm:$0xff] }
  0x47   : > { %2229 = vmatpush3.bf16.msra.mxu0 %v2226_v38  ;;  %2103 = vmatprep.subr.bf16.mxu1 %v2102_v42  ;;  %v2138_v38 = vpack.c.bf16 %v631_v33, %v630_v32  ;;  %v2266_v39 = vpack.c.bf16 %v1074_v36, %v1073_v35  ;;  %v1190_v32 = vld [vmem:[%s2944_s1 + $0x450] sm:$0xff]  ;;  %v1191_v33 = vld [vmem:[%s2944_s1 + $0x458] sm:$0xff]  ;;  %v1192_v35 = vld [vmem:[%s2944_s1 + $0x460] sm:$0xff] }
  0x48   : > { %2231 = vmatprep.subr.bf16.mxu0 %v2230_v43  ;;  %v1193_v36 = vld [vmem:[%s2944_s1 + $0x468] sm:$0xff] }
  0x49   : > { %1791 = vmatmul.mubr.f32.vlgmr.msra.gmra.mrb[0].mxu1 %v2374_v46  ;;  %v2142_v46 = vpack.c.bf16 %v633_v41, %v632_v40  ;;  %v2385_v41 = vld [vmem:[%s2508_s6 + $0x19] ss:$8 sps:$4 sm:$0xff]  }
  0x4a   : > { %2105 = vmatpush3.bf16.msra.mxu1 %v2102_v42  ;;  %1931 = vmatmul.mubr.f32.vlgmr.msra.gmra.mrb[0].mxu0 %v2375_v49  ;;  %v2380_v42 = vld [vmem:[%s2508_s6 + $0x50] ss:$8 sps:$4 sm:$0xff]   ;;  %s1560_s6 = sshll.u32 %s2953_s15, 4 }
  0x4b   : > { %2233 = vmatpush3.bf16.msra.mxu0 %v2230_v43  ;;  %2107 = vmatprep.subr.bf16.mxu1 %v2106_v50  ;;  %v1075_v43 = vld [vmem:[%s2944_s1 + $0x3a0] sm:$0xff]  ;;  %v635_v49 = vld [vmem:[%s2944_s1 + $0x1b8] sm:$0xff]  ;;  %s272_s23 = scalar_lea.vmem %s2945_s2, %s1560_s6 }
  0x4c   : > { %2235 = vmatprep.subr.bf16.mxu0 %v2234_v51  ;;  %1825 = vmatprep.mubr.f32.mxu1 %v2376_v54  ;;  %v2270_v47 = vpack.c.bf16 %v1076_v44, %v1075_v43  ;;  %v2146_v52 = vpack.c.bf16 %v635_v49, %v634_v48  ;;  %v636_v54 = vld [vmem:[%s2944_s1 + $0x1c0] sm:$0xff] }
  0x4d   : > { %1965 = vmatprep.mubr.f32.mxu0 %v2377_v57  ;;  %v1080_v57 = vld [vmem:[%s2944_s1 + $0x3c8] sm:$0xff] }
  0x4e   : > { %2109 = vmatpush3.bf16.msra.mxu1 %v2106_v50  ;;  %v1077_v50 = vld [vmem:[%s2944_s1 + $0x3b0] sm:$0xff] }
  0x4f   : > { %2237 = vmatpush3.bf16.msra.mxu0 %v2234_v51  ;;  %2111 = vmatprep.subr.bf16.mxu1 %v2110_v58  ;;  %v1078_v51 = vld [vmem:[%s2944_s1 + $0x3b8] sm:$0xff] }
  0x50   : > { %2239 = vmatprep.subr.bf16.mxu0 %v2238_v59  ;;  %v2274_v53 = vpack.c.bf16 %v1078_v51, %v1077_v50 }
  0x52   : > { %2113 = vmatpush3.bf16.msra.mxu1 %v2110_v58  ;;  %v2150_v58 = vpack.c.bf16 %v637_v55, %v636_v54 }
  0x53   : > { %2241 = vmatpush3.bf16.msra.mxu0 %v2238_v59  ;;  %2115 = vmatprep.subr.bf16.mxu1 %v2114_v0  ;;  %v2278_v59 = vpack.c.bf16 %v1080_v57, %v1079_v56 }
  0x54   : > { %2243 = vmatprep.subr.bf16.mxu0 %v2242_v1 }
  0x56   : > { %2117 = vmatpush3.bf16.msra.mxu1 %v2114_v0  ;;  %v2154_v0 = vpack.c.bf16 %v639_v61, %v638_v60 }
  0x57   : > { %2245 = vmatpush3.bf16.msra.mxu0 %v2242_v1  ;;  %2119 = vmatprep.subr.bf16.mxu1 %v2118_v6  ;;  %v2282_v1 = vpack.c.bf16 %v1082_v63, %v1081_v62 }
  0x58   : > { %2247 = vmatprep.subr.bf16.mxu0 %v2246_v7 }
  0x5a   : > { %2121 = vmatpush3.bf16.msra.mxu1 %v2118_v6  ;;  %v2158_v6 = vpack.c.bf16 %v641_v3, %v640_v2 }
  0x5b   : > { %2249 = vmatpush3.bf16.msra.mxu0 %v2246_v7  ;;  %2123 = vmatprep.subr.bf16.mxu1 %v2122_v12  ;;  %v2286_v7 = vpack.c.bf16 %v1084_v5, %v1083_v4 }
  0x5c   : > { %2251 = vmatprep.subr.bf16.mxu0 %v2250_v13 }
  0x5e   : > { %2125 = vmatpush3.bf16.msra.mxu1 %v2122_v12  ;;  %v2162_v12 = vpack.c.bf16 %v643_v9, %v642_v8 }
  0x5f   : > { %2253 = vmatpush3.bf16.msra.mxu0 %v2250_v13  ;;  %2127 = vmatprep.subr.bf16.mxu1 %v2126_v18  ;;  %v2290_v13 = vpack.c.bf16 %v1086_v11, %v1085_v10 }
  0x60   : > { %2255 = vmatprep.subr.bf16.mxu0 %v2254_v19 }
  0x62   : > { %2129 = vmatpush3.bf16.msra.mxu1 %v2126_v18  ;;  %v1182_v18 = vld [vmem:[%s2944_s1 + $0x410] sm:$0xff] }
  0x63   : > { %2257 = vmatpush3.bf16.msra.mxu0 %v2254_v19  ;;  %2131 = vmatprep.subr.bf16.mxu1 %v2130_v24  ;;  %v1183_v19 = vld [vmem:[%s2944_s1 + $0x418] sm:$0xff] }
  0x64   : > { %2259 = vmatprep.subr.bf16.mxu0 %v2258_v25  ;;  %v2298_v22 = vpack.c.bf16 %v1183_v19, %v1182_v18 }
  0x66   : > { %2133 = vmatpush3.bf16.msra.mxu1 %v2130_v24  ;;  %v1185_v24 = vld [vmem:[%s2944_s1 + $0x428] sm:$0xff] }
  0x67   : > { %2261 = vmatpush3.bf16.msra.mxu0 %v2258_v25  ;;  %2135 = vmatprep.subr.bf16.mxu1 %v2134_v30  ;;  %v2302_v25 = vpack.c.bf16 %v1185_v24, %v1184_v23 }
  0x68   : > { %2263 = vmatprep.subr.bf16.mxu0 %v2262_v31 }
  0x69   : > { %1826 = vmatmul.mubr.f32.vlgmr.msra.gmra.mrb[0].mxu1 %v2378_v34  ;;  %v2314_v34 = vpack.c.bf16 %v1191_v33, %v1190_v32 }
  0x6a   : > { %2137 = vmatpush3.bf16.msra.mxu1 %v2134_v30  ;;  %1966 = vmatmul.mubr.f32.vlgmr.msra.gmra.mrb[0].mxu0 %v2379_v37  ;;  %v1189_v30 = vld [vmem:[%s2944_s1 + $0x448] sm:$0xff]  ;;  %v2318_v37 = vpack.c.bf16 %v1193_v36, %v1192_v35 }
  0x6b   : > { %2265 = vmatpush3.bf16.msra.mxu0 %v2262_v31  ;;  %2139 = vmatprep.subr.bf16.mxu1 %v2138_v38  ;;  %v2310_v31 = vpack.c.bf16 %v1189_v30, %v1188_v29 }
  0x6c   : > { %2267 = vmatprep.subr.bf16.mxu0 %v2266_v39  ;;  %1860 = vmatprep.mubr.f32.mxu1 %v2380_v42  ;;  %v2410_v42 = vmov 0.0  }
  0x6d   : > { %2000 = vmatprep.mubr.f32.mxu0 %v2382_v45  ;;  %1289 = vst [vmem:[%s2916_s13] sm:$0x1] %v2410_v42  ;;  %1290 = vst [vmem:[%s2922_s20] sm:$0x1] %v2410_v42 }
  0x6e   : > { %2141 = vmatpush3.bf16.msra.mxu1 %v2138_v38  ;;  %v1194_v38 = vld [vmem:[%s2944_s1 + $0x470] sm:$0xff] }
  0x6f   : > { %2269 = vmatpush3.bf16.msra.mxu0 %v2266_v39  ;;  %2143 = vmatprep.subr.bf16.mxu1 %v2142_v46  ;;  %v1195_v39 = vld [vmem:[%s2944_s1 + $0x478] sm:$0xff] }
  0x70   : > { %2271 = vmatprep.subr.bf16.mxu0 %v2270_v47  ;;  %v2322_v40 = vpack.c.bf16 %v1195_v39, %v1194_v38 }
  0x72   : > { %2145 = vmatpush3.bf16.msra.mxu1 %v2142_v46 }
  0x73   : > { %2273 = vmatpush3.bf16.msra.mxu0 %v2270_v47  ;;  %2147 = vmatprep.subr.bf16.mxu1 %v2146_v52 }
  0x74   : > { %2275 = vmatprep.subr.bf16.mxu0 %v2274_v53  ;;  %v1301_v3 = vld [vmem:[%s2922_s20] sm:$0x1] }
  0x76   : > { %2149 = vmatpush3.bf16.msra.mxu1 %v2146_v52 }
  0x77   : > { %2277 = vmatpush3.bf16.msra.mxu0 %v2274_v53  ;;  %2151 = vmatprep.subr.bf16.mxu1 %v2150_v58 }
  0x78   : > { %2279 = vmatprep.subr.bf16.mxu0 %v2278_v59 }
  0x7a   : > { %2153 = vmatpush3.bf16.msra.mxu1 %v2150_v58 }
  0x7b   : > { %2281 = vmatpush3.bf16.msra.mxu0 %v2278_v59  ;;  %2155 = vmatprep.subr.bf16.mxu1 %v2154_v0 }
  0x7c   : > { %2283 = vmatprep.subr.bf16.mxu0 %v2282_v1 }
  0x7e   : > { %2157 = vmatpush3.bf16.msra.mxu1 %v2154_v0  ;;  %v1291_v0 = vld [vmem:[%s2916_s13] sm:$0x1] }
  0x7f   : > { %2285 = vmatpush3.bf16.msra.mxu0 %v2282_v1  ;;  %2159 = vmatprep.subr.bf16.mxu1 %v2158_v6 }
  0x80   : > { %2287 = vmatprep.subr.bf16.mxu0 %v2286_v7 }
  0x82   : > { %2161 = vmatpush3.bf16.msra.mxu1 %v2158_v6 }
  0x83   : > { %2289 = vmatpush3.bf16.msra.mxu0 %v2286_v7  ;;  %2163 = vmatprep.subr.bf16.mxu1 %v2162_v12 }
  0x84   : > { %2291 = vmatprep.subr.bf16.mxu0 %v2290_v13 }
  0x86   : > { %2165 = vmatpush3.bf16.msra.mxu1 %v2162_v12 }
  0x87   : > { %2293 = vmatpush3.bf16.msra.mxu0 %v2290_v13 }
  0x88   : > { %2295 = vmatprep.subr.bf16.mxu0 %v2294_v16 }
  0x89   : > { %1861 = vmatmul.mubr.f32.vlgmr.msra.gmra.mrb[0].mxu1 %v2381_v17 }
  0x8a   : > { %2001 = vmatmul.mubr.f32.vlgmr.msra.gmra.mrb[0].mxu0 %v2383_v20 }
  0x8b   : > { %2297 = vmatpush3.bf16.msra.mxu0 %v2294_v16  ;;  %2035 = vmatprep.mubr.f32.mxu0 %v2384_v21 }
  0x8c   : > { %2299 = vmatprep.subr.bf16.mxu0 %v2298_v22 }
  0x8f   : > { %2301 = vmatpush3.bf16.msra.mxu0 %v2298_v22 }
  0x90   : > { %2303 = vmatprep.subr.bf16.mxu0 %v2302_v25 }
  0x93   : > { %2305 = vmatpush3.bf16.msra.mxu0 %v2302_v25 }
  0x94   : > { %2307 = vmatprep.subr.bf16.mxu0 %v2306_v28 }
  0x97   : > { %2309 = vmatpush3.bf16.msra.mxu0 %v2306_v28 }
  0x98   : > { %2311 = vmatprep.subr.bf16.mxu0 %v2310_v31 }
  0x9b   : > { %2313 = vmatpush3.bf16.msra.mxu0 %v2310_v31 }
  0x9c   : > { %2315 = vmatprep.subr.bf16.mxu0 %v2314_v34 }
  0x9f   : > { %2317 = vmatpush3.bf16.msra.mxu0 %v2314_v34 }
  0xa0   : > { %2319 = vmatprep.subr.bf16.mxu0 %v2318_v37 }
  0xa3   : > { %2321 = vmatpush3.bf16.msra.mxu0 %v2318_v37 }
  0xa4   : > { %2323 = vmatprep.subr.bf16.mxu0 %v2322_v40 }
  0xa7   : > { %2325 = vmatpush3.bf16.msra.mxu0 %v2322_v40 }
  0xaa   : > { %2036 = vmatmul.mubr.f32.vlgmr.msra.gmra.mrb[0].mxu0 %v2385_v41 }
 0x15c   : > { %v1862_v43 = vpop.f32.mrb[0].mxu1 }
 0x15d   : > { %v718_v44 = vpop.f32.mrb[1].mxu1 }
 0x17d   : > { %v2037_v45 = vpop.f32.mrb[0].mxu0 }
 0x17e   : > { %v2326_v46 = vadd.f32 %v2037_v45, %v1862_v43  ;;  %v1270_v47 = vpop.f32.mrb[1].mxu0 }
 0x17f   : > { %v2327_v48 = vadd.f32 %v1270_v47, %v718_v44 }
 0x180   : > { %v1303_v49 = vmul.f32 %v2326_v46, %v2326_v46  ;;  %v1316_v50 = vcombine.high %v2326_v46, %v2326_v46  ;;  %1321 = vst [vmem:[%s272_s23 + $0x8] sm:$0xf] %v2326_v46 }
 0x181   : > { %v1292_v51 = vadd.f32 %v2327_v48, %v2326_v46  ;;  %v1302_v52 = vmul.f32 %v2327_v48, %v2327_v48  ;;  %v1315_v53 = vcombine.high %v2327_v48, %v2327_v48  ;;  %1319 = vst [vmem:[%s272_s23] sm:$0xf] %v2327_v48 }
 0x182   : > { %1322 = vst [vmem:[%s272_s23 + $0xc] sm:$0xf] %v1316_v50 }
 0x183   : > { %v1293_v54 = vrot.slane %v1292_v51, 4  ;;  %v1304_v55 = vadd.f32 %v1303_v49, %v1302_v52  ;;  %1320 = vst [vmem:[%s272_s23 + $0x4] sm:$0xf] %v1315_v53 }
 0x185   : > { %v1294_v56 = vadd.f32 %v1293_v54, %v1292_v51  ;;  %v1305_v57 = vrot.slane %v1304_v55, 4 }
 0x187   : > { %v1295_v58 = vrot.slane %v1294_v56, 2  ;;  %v1306_v59 = vadd.f32 %v1305_v57, %v1304_v55 }
 0x189   : > { %v1296_v60 = vadd.f32 %v1295_v58, %v1294_v56  ;;  %v1307_v61 = vrot.slane %v1306_v59, 2 }
 0x18b   : > { %v1297_v62 = vrot.slane %v1296_v60, 1  ;;  %v1308_v63 = vadd.f32 %v1307_v61, %v1306_v59 }
 0x18d   : > { %v1298_v1 = vadd.f32 %v1297_v62, %v1296_v60  ;;  %v1309_v2 = vrot.slane %v1308_v63, 1 }
 0x18f   : > { %v1299_v4 = vadd.f32 %v1298_v1, %v1291_v0  ;;  %v1310_v5 = vadd.f32 %v1309_v2, %v1308_v63 }
 0x191   : > { %1300 = vst [vmem:[%s2916_s13] sm:$0x1] %v1299_v4  ;;  %v1311_v6 = vadd.f32 %v1310_v5, %v1301_v3 }
 0x193   : > { %1312 = vst [vmem:[%s2922_s20] sm:$0x1] %v1311_v6 }
 0x194 PF: > { %s15_s17 = sadd.s32 1, %s2408_s17   ;;  %s2948_s15 = smov %s2404_s16 }
 0x195   : > { %p12_p5 = scmp.ge.s32.totalorder %s15_s17, 4   ;;  %s2949_s16 = smov %s2951_s18 }
 0x197   :  { %14 = sbr.rel (!%p12_p5) target bundleno = 2 (0x2), region = 95 }

</bundles_post_ra>
